<compile_context>
chip_gen: v6e
topology: v6e:2x2x1
jax: 0.10.0
libtpu: 0.0.40
codegen_flags: <defaults>
</compile_context>

<pallas_src>
import functools

import jax
import jax.numpy as jnp
import numpy as np
from jax.experimental import pallas as pl
from jax.experimental.pallas import tpu as pltpu


def _round_up(x, m):
    return (x + m - 1) // m * m


def _conv_bn_act_kernel(x_hbm, w_ref, p_ref, o_ref, xbuf, sem, acc_ref, *,
                        K, TH, Wt, n_h, Hp, use_act, use_lab, acc_in_regs):
    # x_hbm : (N*Hp, Wp, Ci) bf16 in HBM (memory_space=ANY), zero-padded.
    # w_ref : (K, K, Ci, TCo) bf16 HWIO weights (channel-padded), VMEM.
    # p_ref : (4, TCo) f32, rows = [bn_scale, bn_shift, lab_scale, lab_bias].
    # o_ref : (1, TH, Wt, TCo) output block.
    # xbuf  : (2, THp, Wp, Ci) bf16 double buffer for the halo window.
    # sem   : DMA semaphores (2,).
    # acc_ref: (TH*Wt, TCo) f32 accumulator scratch (used when tiles are big).
    n = pl.program_id(1)          # image index
    r = pl.program_id(2)          # row-tile index within the image
    THp = TH + K - 1
    Ci = w_ref.shape[2]
    TCo = o_ref.shape[-1]

    def start_fetch(row_tile, slot):
        start = n * Hp + row_tile * TH
        pltpu.make_async_copy(x_hbm.at[pl.ds(start, THp)],
                              xbuf.at[slot], sem.at[slot]).start()

    # Prime the pipeline once per (cout-tile, image) sweep (partition-safe for
    # megacore splits along the parallel c / n axes).
    @pl.when(r == 0)
    def _prime():
        start_fetch(0, 0)

    slot = r & 1
    # Wait for the current row tile's halo window.
    pltpu.make_async_copy(x_hbm.at[pl.ds(0, THp)],
                          xbuf.at[slot], sem.at[slot]).wait()

    # Prefetch the next row tile of the same image while computing this one.
    @pl.when(r + 1 < n_h)
    def _prefetch():
        start_fetch(r + 1, (r + 1) & 1)

    x_full = xbuf[slot]                                   # (THp, Wp, Ci) bf16

    def taps():
        for kw in range(K):
            # One sublane-shifted slice per kw (reused across the kh taps).
            x_kw = x_full[:, kw:kw + Wt, :]               # (THp, Wt, Ci)
            for kh in range(K):
                # Leading-axis slice + tile-aligned reshape (Wt%8==0, Ci%128==0).
                patch = x_kw[kh:kh + TH].reshape(TH * Wt, Ci)
                yield kh, kw, jnp.dot(patch, w_ref[kh, kw],
                                      preferred_element_type=jnp.float32)

    if acc_in_regs:
        acc = None
        for _, _, d in taps():
            acc = d if acc is None else acc + d
    else:
        for kh, kw, d in taps():
            if kh == 0 and kw == 0:
                acc_ref[...] = d
            else:
                acc_ref[...] += d
        acc = acc_ref[...]

    p = p_ref[...]                                        # (4, TCo) f32
    y = acc * p[0:1] + p[1:2]                             # folded BatchNorm
    if use_act:
        y = jnp.maximum(y, 0.0)                           # ReLU
        if use_lab:
            y = y * p[2:3] + p[3:4]                       # LearnableAffineBlock
    o_ref[...] = y.reshape(1, TH, Wt, TCo).astype(o_ref.dtype)


def conv_bn_act(x_nchw, weight_oihw, bn_gamma, bn_beta, bn_mean, bn_var,
                lab_scale=1.0, lab_bias=0.0, *, stride=1, use_act=True,
                use_lab=False, eps=1e-5, out_dtype=None):
    """ConvBNAct forward. Inputs follow PyTorch conventions (NCHW / OIHW)."""
    assert stride == 1, "TODO(synk): stride>1 ConvBNAct variants not implemented"
    N, Cin, H, W = x_nchw.shape
    Cout, Cin_w, KH, KW = weight_oihw.shape
    assert Cin == Cin_w and KH == KW and KH % 2 == 1
    K = KH
    pad = (K - 1) // 2
    out_dtype = x_nchw.dtype if out_dtype is None else jnp.dtype(out_dtype)
    out_isz = jnp.dtype(out_dtype).itemsize

    LANE = 128
    Ci = _round_up(Cin, LANE)                  # contraction dim (lane-aligned)
    Co = _round_up(Cout, LANE)                 # output lane dim (lane-aligned)
    Wt = _round_up(W, 8)                       # sublane-aligned compute width
    Wp = _round_up(Wt + 2 * pad, 8)            # padded (haloed) width, 8-aligned

    # --- per-chip VMEM budget (v7x has only 64 MiB per TensorCore) ---
    try:
        vmem_cap = int(pltpu.get_tpu_info().vmem_capacity_bytes)
    except Exception:
        vmem_cap = 64 * 1024 * 1024
    block_budget = max(8 << 20, min(20 << 20, vmem_cap // 3))

    # --- Cout tiling: keep the full weight resident when it fits, otherwise
    #     fall back to 128-wide cout tiles on the OUTER grid axis. ---
    def w_bytes(tco):
        return 2 * K * K * Ci * tco * 2        # double-buffered bf16 block
    TCo = Co if w_bytes(Co) <= block_budget // 2 else LANE
    n_co = Co // TCo

    # --- Row tiling: target ~1024 matmul rows per step, bounded by VMEM. ---
    def block_bytes(th):
        thp = th + K - 1
        m = th * Wt
        return (2 * thp * Wp * Ci * 2          # x halo double buffer (bf16)
                + w_bytes(TCo)                 # weights
                + m * TCo * 4                  # f32 accumulator scratch
                + 2 * m * TCo * out_isz)       # output double buffer

    TH = max(1, min(H, max(1, 1024 // Wt)))
    while TH > 1 and block_bytes(TH) > block_budget:
        TH = (TH + 1) // 2
    Hcomp = _round_up(H, TH)                   # computed rows (>= H, padded)
    n_h = Hcomp // TH
    Hp = Hcomp + 2 * pad
    THp = TH + K - 1

    # --- glue: single fused relayout NCHW f32 -> padded NHWC bf16 (batch folded
    #     into the row axis so halo windows are single contiguous DMA slices) ---
    x_nhwc = jnp.transpose(x_nchw, (0, 2, 3, 1))
    x_pad = jnp.pad(x_nhwc, ((0, 0),
                             (pad, Hcomp - H + pad),
                             (pad, Wp - W - pad),
                             (0, Ci - Cin)))
    x_flat = x_pad.astype(jnp.bfloat16).reshape(N * Hp, Wp, Ci)

    w_hwio = jnp.transpose(weight_oihw, (2, 3, 1, 0))        # (K, K, Cin, Cout)
    w_hwio = jnp.pad(w_hwio, ((0, 0), (0, 0), (0, Ci - Cin), (0, Co - Cout)))
    w_hwio = w_hwio.astype(jnp.bfloat16)

    # Folded BN + LAB params packed into one small f32 array.
    inv_std = 1.0 / jnp.sqrt(bn_var.astype(jnp.float32) + eps)
    scale = bn_gamma.astype(jnp.float32) * inv_std
    shift = bn_beta.astype(jnp.float32) - bn_mean.astype(jnp.float32) * scale
    lab_s = jnp.full((Cout,), lab_scale, jnp.float32)
    lab_b = jnp.full((Cout,), lab_bias, jnp.float32)
    params = jnp.pad(jnp.stack([scale, shift, lab_s, lab_b]),
                     ((0, 0), (0, Co - Cout)))               # (4, Co)

    acc_in_regs = TH * Wt * TCo * 4 <= 128 * 1024
    kernel = functools.partial(_conv_bn_act_kernel, K=K, TH=TH, Wt=Wt,
                               n_h=n_h, Hp=Hp, use_act=use_act,
                               use_lab=use_lab, acc_in_regs=acc_in_regs)

    cost = pl.CostEstimate(
        flops=2 * N * Hcomp * Wt * K * K * Ci * Co,
        transcendentals=0,
        bytes_accessed=int(x_flat.size * 2 * n_co + w_hwio.size * 2
                           + params.size * 4 + N * Hcomp * Wt * Co * out_isz))

    vmem_limit = int(min(48 << 20, vmem_cap * 7 // 10))

    out_full = pl.pallas_call(
        kernel,
        out_shape=jax.ShapeDtypeStruct((N, Hcomp, Wt, Co), out_dtype),
        grid_spec=pltpu.PrefetchScalarGridSpec(
            num_scalar_prefetch=0,
            # cout-tile axis OUTERMOST -> weight block fetched only n_co times.
            grid=(n_co, N, n_h),
            in_specs=[
                pl.BlockSpec(memory_space=pl.ANY),                      # x (HBM)
                pl.BlockSpec((K, K, Ci, TCo), lambda c, n, r: (0, 0, 0, c)),
                pl.BlockSpec((4, TCo), lambda c, n, r: (0, c)),
            ],
            out_specs=pl.BlockSpec((1, TH, Wt, TCo),
                                   lambda c, n, r: (n, r, 0, c)),
            scratch_shapes=[
                pltpu.VMEM((2, THp, Wp, Ci), jnp.bfloat16),   # x halo dbl-buffer
                pltpu.SemaphoreType.DMA((2,)),
                pltpu.VMEM((TH * Wt, TCo), jnp.float32),      # accumulator
            ],
        ),
        compiler_params=pltpu.CompilerParams(
            dimension_semantics=("parallel", "parallel", "arbitrary"),
            vmem_limit_bytes=vmem_limit),
        cost_estimate=cost,
    )(x_flat, w_hwio, params)

    # glue: un-pad + back to NCHW (module-boundary only; see TODO at top).
    out = out_full[:, :H, :W, :Cout]
    return jnp.transpose(out, (0, 3, 1, 2))


def _reference(x, w, gamma, beta, mean, var, eps=1e-5, use_act=True,
               use_lab=False, lab_scale=1.0, lab_bias=0.0):
    # Same bf16-quantized conv inputs as the kernel, f32 math.
    xq = x.astype(jnp.bfloat16).astype(jnp.float32)
    wq = w.astype(jnp.bfloat16).astype(jnp.float32)
    pad = (w.shape[2] - 1) // 2
    y = jax.lax.conv_general_dilated(
        xq, wq, window_strides=(1, 1), padding=((pad, pad), (pad, pad)),
        dimension_numbers=("NCHW", "OIHW", "NCHW"),
        precision=jax.lax.Precision.HIGHEST)
    y = ((y - mean[None, :, None, None]) / jnp.sqrt(var[None, :, None, None] + eps)
         * gamma[None, :, None, None] + beta[None, :, None, None])
    if use_act:
        y = jnp.maximum(y, 0.0)
        if use_lab:
            y = lab_scale * y + lab_bias
    return y


def _make_case(key, N, Cin, Cout, H, W, K, wscale):
    kx, kw, kg, kb, km, kv = jax.random.split(key, 6)
    x = jax.random.normal(kx, (N, Cin, H, W), jnp.float32)
    weight = jax.random.normal(kw, (Cout, Cin, K, K), jnp.float32) * wscale
    gamma = 1.0 + 0.1 * jax.random.normal(kg, (Cout,), jnp.float32)
    beta = 0.1 * jax.random.normal(kb, (Cout,), jnp.float32)
    mean = 0.1 * jax.random.normal(km, (Cout,), jnp.float32)
    var = jnp.abs(jax.random.normal(kv, (Cout,), jnp.float32)) + 0.5
    return x, weight, gamma, beta, mean, var


if __name__ == "__main__":
    key = jax.random.PRNGKey(0)
    k1, k2 = jax.random.split(key)

    # Case 1: ConvBNAct(in=4, out=8, k=3, s=1) defaults (use_act=True, no LAB).
    x, w, g, b, m, v = _make_case(k1, N=2, Cin=4, Cout=8, H=16, W=16, K=3,
                                  wscale=0.1)
    out = conv_bn_act(x, w, g, b, m, v, use_act=True, use_lab=False)
    out = jax.block_until_ready(out)
    ref = _reference(x, w, g, b, m, v, use_act=True, use_lab=False)
    np.testing.assert_allclose(np.asarray(out), np.asarray(ref),
                               rtol=2e-3, atol=2e-3)

    # Case 2: use_lab=True path (ReLU followed by learnable affine).
    out2 = conv_bn_act(x, w, g, b, m, v, lab_scale=1.25, lab_bias=0.1,
                       use_act=True, use_lab=True)
    out2 = jax.block_until_ready(out2)
    ref2 = _reference(x, w, g, b, m, v, use_act=True, use_lab=True,
                      lab_scale=1.25, lab_bias=0.1)
    np.testing.assert_allclose(np.asarray(out2), np.asarray(ref2),
                               rtol=2e-3, atol=2e-3)

    # Case 3: exercises row tiling with halo prefetch (n_h>1), padded H,
    # Cout not a multiple of 128, and the VMEM-scratch accumulator path.
    x3, w3, g3, b3, m3, v3 = _make_case(k2, N=2, Cin=32, Cout=160, H=40, W=64,
                                        K=3, wscale=0.05)
    out3 = conv_bn_act(x3, w3, g3, b3, m3, v3, use_act=True, use_lab=False)
    out3 = jax.block_until_ready(out3)
    ref3 = _reference(x3, w3, g3, b3, m3, v3, use_act=True, use_lab=False)
    np.testing.assert_allclose(np.asarray(out3), np.asarray(ref3),
                               rtol=2e-3, atol=2e-3)

    print("KERNEL_OK")
</pallas_src>

<mosaic_0001>
module attributes {stable_mosaic.version = 11 : i64} {
  func.func @_conv_bn_act_kernel(%arg0: i32, %arg1: i32, %arg2: i32, %arg3: memref<36x24x128xbf16, #tpu.memory_space<any>>, %arg4: memref<3x3x128x128xbf16, #tpu.memory_space<vmem>>, %arg5: memref<4x128xf32, #tpu.memory_space<vmem>>, %arg6: memref<1x16x16x128xf32, #tpu.memory_space<vmem>>, %arg7: memref<2x18x24x128xbf16, #tpu.memory_space<vmem>>, %arg8: memref<2x!tpu.dma_semaphore, #tpu.memory_space<semaphore_mem>>, %arg9: memref<256x128xf32, #tpu.memory_space<vmem>>) attributes {dimension_semantics = [#tpu.dimension_semantics<parallel>, #tpu.dimension_semantics<parallel>, #tpu.dimension_semantics<arbitrary>], iteration_bounds = array<i64: 1, 2, 1>, scalar_prefetch = 0 : i64, scratch_operands = 3 : i64, tpu.core_type = #tpu.core_type<tc>, window_params = [{}, {transform_indices = @transform_1, window_bounds = array<i64: 3, 3, 128, 128>}, {transform_indices = @transform_2, window_bounds = array<i64: 4, 128>}, {transform_indices = @transform_3, window_bounds = array<i64: 1, 16, 16, 128>}]} {
    %c0_i32 = arith.constant 0 : i32
    %0 = arith.cmpi eq, %arg2, %c0_i32 : i32
    %1 = arith.extui %0 : i1 to i32
    %c0_i32_0 = arith.constant 0 : i32
    %2 = arith.cmpi ne, %1, %c0_i32_0 : i32
    scf.if %2 {
      %c18_i32 = arith.constant 18 : i32
      %83 = arith.muli %arg1, %c18_i32 : i32
      %c0_i32_61 = arith.constant 0 : i32
      %84 = arith.addi %83, %c0_i32_61 : i32
      %c0_i32_62 = arith.constant 0 : i32
      %c0_i32_63 = arith.constant 0 : i32
      %c0_i32_64 = arith.constant 0 : i32
      %c0_i32_65 = arith.constant 0 : i32
      %85 = tpu.memref_slice %arg3[%84, %c0_i32_64, %c0_i32_65] : memref<36x24x128xbf16, #tpu.memory_space<any>> -> memref<18x24x128xbf16, #tpu.memory_space<any>>
      %c0_i32_66 = arith.constant 0 : i32
      %c0_i32_67 = arith.constant 0 : i32
      %c0_i32_68 = arith.constant 0 : i32
      %86 = tpu.memref_slice %arg7[%c0_i32_62, %c0_i32_66, %c0_i32_67, %c0_i32_68] : memref<2x18x24x128xbf16, #tpu.memory_space<vmem>> -> memref<1x18x24x128xbf16, #tpu.memory_space<vmem>>
      %87 = tpu.memref_squeeze %86 : memref<1x18x24x128xbf16, #tpu.memory_space<vmem>> -> memref<18x24x128xbf16, #tpu.memory_space<vmem>>
      %88 = tpu.memref_slice %arg8[%c0_i32_63] : memref<2x!tpu.dma_semaphore, #tpu.memory_space<semaphore_mem>> -> memref<1x!tpu.dma_semaphore, #tpu.memory_space<semaphore_mem>>
      %89 = tpu.memref_squeeze %88 : memref<1x!tpu.dma_semaphore, #tpu.memory_space<semaphore_mem>> -> memref<!tpu.dma_semaphore, #tpu.memory_space<semaphore_mem>>
      tpu.enqueue_dma source(%85 : memref<18x24x128xbf16, #tpu.memory_space<any>>) target(%87 : memref<18x24x128xbf16, #tpu.memory_space<vmem>>) target_semaphore(%89 : memref<!tpu.dma_semaphore, #tpu.memory_space<semaphore_mem>>)
    } else {
    }
    %c1_i32 = arith.constant 1 : i32
    %3 = arith.andi %arg2, %c1_i32 : i32
    %c0_i32_1 = arith.constant 0 : i32
    %c0_i32_2 = arith.constant 0 : i32
    %c0_i32_3 = arith.constant 0 : i32
    %4 = tpu.memref_slice %arg3[%c0_i32_1, %c0_i32_2, %c0_i32_3] : memref<36x24x128xbf16, #tpu.memory_space<any>> -> memref<18x24x128xbf16, #tpu.memory_space<any>>
    %c0_i32_4 = arith.constant 0 : i32
    %c0_i32_5 = arith.constant 0 : i32
    %c0_i32_6 = arith.constant 0 : i32
    %5 = tpu.memref_slice %arg7[%3, %c0_i32_4, %c0_i32_5, %c0_i32_6] : memref<2x18x24x128xbf16, #tpu.memory_space<vmem>> -> memref<1x18x24x128xbf16, #tpu.memory_space<vmem>>
    %6 = tpu.memref_squeeze %5 : memref<1x18x24x128xbf16, #tpu.memory_space<vmem>> -> memref<18x24x128xbf16, #tpu.memory_space<vmem>>
    %7 = tpu.memref_slice %arg8[%3] : memref<2x!tpu.dma_semaphore, #tpu.memory_space<semaphore_mem>> -> memref<1x!tpu.dma_semaphore, #tpu.memory_space<semaphore_mem>>
    %8 = tpu.memref_squeeze %7 : memref<1x!tpu.dma_semaphore, #tpu.memory_space<semaphore_mem>> -> memref<!tpu.dma_semaphore, #tpu.memory_space<semaphore_mem>>
    tpu.wait_dma2 semaphore(%8 : memref<!tpu.dma_semaphore, #tpu.memory_space<semaphore_mem>>) src(%4 : memref<18x24x128xbf16, #tpu.memory_space<any>>) dst(%6 : memref<18x24x128xbf16, #tpu.memory_space<vmem>>)
    %c1_i32_7 = arith.constant 1 : i32
    %9 = arith.addi %arg2, %c1_i32_7 : i32
    %c1_i32_8 = arith.constant 1 : i32
    %10 = arith.cmpi slt, %9, %c1_i32_8 : i32
    %11 = arith.extui %10 : i1 to i32
    %c0_i32_9 = arith.constant 0 : i32
    %12 = arith.cmpi ne, %11, %c0_i32_9 : i32
    scf.if %12 {
      %c1_i32_61 = arith.constant 1 : i32
      %83 = arith.addi %arg2, %c1_i32_61 : i32
      %c1_i32_62 = arith.constant 1 : i32
      %84 = arith.addi %arg2, %c1_i32_62 : i32
      %c1_i32_63 = arith.constant 1 : i32
      %85 = arith.andi %84, %c1_i32_63 : i32
      %c18_i32 = arith.constant 18 : i32
      %86 = arith.muli %arg1, %c18_i32 : i32
      %c16_i32 = arith.constant 16 : i32
      %87 = arith.muli %83, %c16_i32 : i32
      %88 = arith.addi %86, %87 : i32
      %c0_i32_64 = arith.constant 0 : i32
      %c0_i32_65 = arith.constant 0 : i32
      %89 = tpu.memref_slice %arg3[%88, %c0_i32_64, %c0_i32_65] : memref<36x24x128xbf16, #tpu.memory_space<any>> -> memref<18x24x128xbf16, #tpu.memory_space<any>>
      %c0_i32_66 = arith.constant 0 : i32
      %c0_i32_67 = arith.constant 0 : i32
      %c0_i32_68 = arith.constant 0 : i32
      %90 = tpu.memref_slice %arg7[%85, %c0_i32_66, %c0_i32_67, %c0_i32_68] : memref<2x18x24x128xbf16, #tpu.memory_space<vmem>> -> memref<1x18x24x128xbf16, #tpu.memory_space<vmem>>
      %91 = tpu.memref_squeeze %90 : memref<1x18x24x128xbf16, #tpu.memory_space<vmem>> -> memref<18x24x128xbf16, #tpu.memory_space<vmem>>
      %92 = tpu.memref_slice %arg8[%85] : memref<2x!tpu.dma_semaphore, #tpu.memory_space<semaphore_mem>> -> memref<1x!tpu.dma_semaphore, #tpu.memory_space<semaphore_mem>>
      %93 = tpu.memref_squeeze %92 : memref<1x!tpu.dma_semaphore, #tpu.memory_space<semaphore_mem>> -> memref<!tpu.dma_semaphore, #tpu.memory_space<semaphore_mem>>
      tpu.enqueue_dma source(%89 : memref<18x24x128xbf16, #tpu.memory_space<any>>) target(%91 : memref<18x24x128xbf16, #tpu.memory_space<vmem>>) target_semaphore(%93 : memref<!tpu.dma_semaphore, #tpu.memory_space<semaphore_mem>>)
    } else {
    }
    %13 = arith.index_cast %3 : i32 to index
    %c0 = arith.constant 0 : index
    %c0_10 = arith.constant 0 : index
    %c0_11 = arith.constant 0 : index
    %14 = vector.load %arg7[%13, %c0, %c0_10, %c0_11] : memref<2x18x24x128xbf16, #tpu.memory_space<vmem>>, vector<1x18x24x128xbf16>
    %15 = vector.shape_cast %14 : vector<1x18x24x128xbf16> to vector<18x24x128xbf16>
    %16 = vector.extract_strided_slice %15 {offsets = [0, 0, 0], sizes = [18, 16, 128], strides = [1, 1, 1]} : vector<18x24x128xbf16> to vector<18x16x128xbf16>
    %17 = vector.extract_strided_slice %16 {offsets = [0, 0, 0], sizes = [16, 16, 128], strides = [1, 1, 1]} : vector<18x16x128xbf16> to vector<16x16x128xbf16>
    %18 = vector.shape_cast %17 : vector<16x16x128xbf16> to vector<256x128xbf16>
    %c0_12 = arith.constant 0 : index
    %c0_13 = arith.constant 0 : index
    %c0_14 = arith.constant 0 : index
    %c0_15 = arith.constant 0 : index
    %19 = vector.load %arg4[%c0_12, %c0_13, %c0_14, %c0_15] : memref<3x3x128x128xbf16, #tpu.memory_space<vmem>>, vector<1x1x128x128xbf16>
    %20 = vector.shape_cast %19 : vector<1x1x128x128xbf16> to vector<128x128xbf16>
    %cst = arith.constant dense<0.000000e+00> : vector<256x128xf32>
    %21 = tpu.matmul %18, %20, %cst {dimension_numbers = #tpu.dot_dimension_numbers<[1], [0], [0], [1], [0, 0, 1, 1], [], []>} : vector<256x128xbf16>, vector<128x128xbf16>, vector<256x128xf32> -> vector<256x128xf32>
    %22 = vector.extract_strided_slice %16 {offsets = [1, 0, 0], sizes = [16, 16, 128], strides = [1, 1, 1]} : vector<18x16x128xbf16> to vector<16x16x128xbf16>
    %23 = vector.shape_cast %22 : vector<16x16x128xbf16> to vector<256x128xbf16>
    %c1 = arith.constant 1 : index
    %c0_16 = arith.constant 0 : index
    %c0_17 = arith.constant 0 : index
    %c0_18 = arith.constant 0 : index
    %24 = vector.load %arg4[%c1, %c0_16, %c0_17, %c0_18] : memref<3x3x128x128xbf16, #tpu.memory_space<vmem>>, vector<1x1x128x128xbf16>
    %25 = vector.shape_cast %24 : vector<1x1x128x128xbf16> to vector<128x128xbf16>
    %cst_19 = arith.constant dense<0.000000e+00> : vector<256x128xf32>
    %26 = tpu.matmul %23, %25, %cst_19 {dimension_numbers = #tpu.dot_dimension_numbers<[1], [0], [0], [1], [0, 0, 1, 1], [], []>} : vector<256x128xbf16>, vector<128x128xbf16>, vector<256x128xf32> -> vector<256x128xf32>
    %27 = arith.addf %21, %26 : vector<256x128xf32>
    %28 = vector.extract_strided_slice %16 {offsets = [2, 0, 0], sizes = [16, 16, 128], strides = [1, 1, 1]} : vector<18x16x128xbf16> to vector<16x16x128xbf16>
    %29 = vector.shape_cast %28 : vector<16x16x128xbf16> to vector<256x128xbf16>
    %c2 = arith.constant 2 : index
    %c0_20 = arith.constant 0 : index
    %c0_21 = arith.constant 0 : index
    %c0_22 = arith.constant 0 : index
    %30 = vector.load %arg4[%c2, %c0_20, %c0_21, %c0_22] : memref<3x3x128x128xbf16, #tpu.memory_space<vmem>>, vector<1x1x128x128xbf16>
    %31 = vector.shape_cast %30 : vector<1x1x128x128xbf16> to vector<128x128xbf16>
    %cst_23 = arith.constant dense<0.000000e+00> : vector<256x128xf32>
    %32 = tpu.matmul %29, %31, %cst_23 {dimension_numbers = #tpu.dot_dimension_numbers<[1], [0], [0], [1], [0, 0, 1, 1], [], []>} : vector<256x128xbf16>, vector<128x128xbf16>, vector<256x128xf32> -> vector<256x128xf32>
    %33 = arith.addf %27, %32 : vector<256x128xf32>
    %34 = vector.extract_strided_slice %15 {offsets = [0, 1, 0], sizes = [18, 16, 128], strides = [1, 1, 1]} : vector<18x24x128xbf16> to vector<18x16x128xbf16>
    %35 = vector.extract_strided_slice %34 {offsets = [0, 0, 0], sizes = [16, 16, 128], strides = [1, 1, 1]} : vector<18x16x128xbf16> to vector<16x16x128xbf16>
    %36 = vector.shape_cast %35 : vector<16x16x128xbf16> to vector<256x128xbf16>
    %c0_24 = arith.constant 0 : index
    %c1_25 = arith.constant 1 : index
    %c0_26 = arith.constant 0 : index
    %c0_27 = arith.constant 0 : index
    %37 = vector.load %arg4[%c0_24, %c1_25, %c0_26, %c0_27] : memref<3x3x128x128xbf16, #tpu.memory_space<vmem>>, vector<1x1x128x128xbf16>
    %38 = vector.shape_cast %37 : vector<1x1x128x128xbf16> to vector<128x128xbf16>
    %cst_28 = arith.constant dense<0.000000e+00> : vector<256x128xf32>
    %39 = tpu.matmul %36, %38, %cst_28 {dimension_numbers = #tpu.dot_dimension_numbers<[1], [0], [0], [1], [0, 0, 1, 1], [], []>} : vector<256x128xbf16>, vector<128x128xbf16>, vector<256x128xf32> -> vector<256x128xf32>
    %40 = arith.addf %33, %39 : vector<256x128xf32>
    %41 = vector.extract_strided_slice %34 {offsets = [1, 0, 0], sizes = [16, 16, 128], strides = [1, 1, 1]} : vector<18x16x128xbf16> to vector<16x16x128xbf16>
    %42 = vector.shape_cast %41 : vector<16x16x128xbf16> to vector<256x128xbf16>
    %c1_29 = arith.constant 1 : index
    %c1_30 = arith.constant 1 : index
    %c0_31 = arith.constant 0 : index
    %c0_32 = arith.constant 0 : index
    %43 = vector.load %arg4[%c1_29, %c1_30, %c0_31, %c0_32] : memref<3x3x128x128xbf16, #tpu.memory_space<vmem>>, vector<1x1x128x128xbf16>
    %44 = vector.shape_cast %43 : vector<1x1x128x128xbf16> to vector<128x128xbf16>
    %cst_33 = arith.constant dense<0.000000e+00> : vector<256x128xf32>
    %45 = tpu.matmul %42, %44, %cst_33 {dimension_numbers = #tpu.dot_dimension_numbers<[1], [0], [0], [1], [0, 0, 1, 1], [], []>} : vector<256x128xbf16>, vector<128x128xbf16>, vector<256x128xf32> -> vector<256x128xf32>
    %46 = arith.addf %40, %45 : vector<256x128xf32>
    %47 = vector.extract_strided_slice %34 {offsets = [2, 0, 0], sizes = [16, 16, 128], strides = [1, 1, 1]} : vector<18x16x128xbf16> to vector<16x16x128xbf16>
    %48 = vector.shape_cast %47 : vector<16x16x128xbf16> to vector<256x128xbf16>
    %c2_34 = arith.constant 2 : index
    %c1_35 = arith.constant 1 : index
    %c0_36 = arith.constant 0 : index
    %c0_37 = arith.constant 0 : index
    %49 = vector.load %arg4[%c2_34, %c1_35, %c0_36, %c0_37] : memref<3x3x128x128xbf16, #tpu.memory_space<vmem>>, vector<1x1x128x128xbf16>
    %50 = vector.shape_cast %49 : vector<1x1x128x128xbf16> to vector<128x128xbf16>
    %cst_38 = arith.constant dense<0.000000e+00> : vector<256x128xf32>
    %51 = tpu.matmul %48, %50, %cst_38 {dimension_numbers = #tpu.dot_dimension_numbers<[1], [0], [0], [1], [0, 0, 1, 1], [], []>} : vector<256x128xbf16>, vector<128x128xbf16>, vector<256x128xf32> -> vector<256x128xf32>
    %52 = arith.addf %46, %51 : vector<256x128xf32>
    %53 = vector.extract_strided_slice %15 {offsets = [0, 2, 0], sizes = [18, 16, 128], strides = [1, 1, 1]} : vector<18x24x128xbf16> to vector<18x16x128xbf16>
    %54 = vector.extract_strided_slice %53 {offsets = [0, 0, 0], sizes = [16, 16, 128], strides = [1, 1, 1]} : vector<18x16x128xbf16> to vector<16x16x128xbf16>
    %55 = vector.shape_cast %54 : vector<16x16x128xbf16> to vector<256x128xbf16>
    %c0_39 = arith.constant 0 : index
    %c2_40 = arith.constant 2 : index
    %c0_41 = arith.constant 0 : index
    %c0_42 = arith.constant 0 : index
    %56 = vector.load %arg4[%c0_39, %c2_40, %c0_41, %c0_42] : memref<3x3x128x128xbf16, #tpu.memory_space<vmem>>, vector<1x1x128x128xbf16>
    %57 = vector.shape_cast %56 : vector<1x1x128x128xbf16> to vector<128x128xbf16>
    %cst_43 = arith.constant dense<0.000000e+00> : vector<256x128xf32>
    %58 = tpu.matmul %55, %57, %cst_43 {dimension_numbers = #tpu.dot_dimension_numbers<[1], [0], [0], [1], [0, 0, 1, 1], [], []>} : vector<256x128xbf16>, vector<128x128xbf16>, vector<256x128xf32> -> vector<256x128xf32>
    %59 = arith.addf %52, %58 : vector<256x128xf32>
    %60 = vector.extract_strided_slice %53 {offsets = [1, 0, 0], sizes = [16, 16, 128], strides = [1, 1, 1]} : vector<18x16x128xbf16> to vector<16x16x128xbf16>
    %61 = vector.shape_cast %60 : vector<16x16x128xbf16> to vector<256x128xbf16>
    %c1_44 = arith.constant 1 : index
    %c2_45 = arith.constant 2 : index
    %c0_46 = arith.constant 0 : index
    %c0_47 = arith.constant 0 : index
    %62 = vector.load %arg4[%c1_44, %c2_45, %c0_46, %c0_47] : memref<3x3x128x128xbf16, #tpu.memory_space<vmem>>, vector<1x1x128x128xbf16>
    %63 = vector.shape_cast %62 : vector<1x1x128x128xbf16> to vector<128x128xbf16>
    %cst_48 = arith.constant dense<0.000000e+00> : vector<256x128xf32>
    %64 = tpu.matmul %61, %63, %cst_48 {dimension_numbers = #tpu.dot_dimension_numbers<[1], [0], [0], [1], [0, 0, 1, 1], [], []>} : vector<256x128xbf16>, vector<128x128xbf16>, vector<256x128xf32> -> vector<256x128xf32>
    %65 = arith.addf %59, %64 : vector<256x128xf32>
    %66 = vector.extract_strided_slice %53 {offsets = [2, 0, 0], sizes = [16, 16, 128], strides = [1, 1, 1]} : vector<18x16x128xbf16> to vector<16x16x128xbf16>
    %67 = vector.shape_cast %66 : vector<16x16x128xbf16> to vector<256x128xbf16>
    %c2_49 = arith.constant 2 : index
    %c2_50 = arith.constant 2 : index
    %c0_51 = arith.constant 0 : index
    %c0_52 = arith.constant 0 : index
    %68 = vector.load %arg4[%c2_49, %c2_50, %c0_51, %c0_52] : memref<3x3x128x128xbf16, #tpu.memory_space<vmem>>, vector<1x1x128x128xbf16>
    %69 = vector.shape_cast %68 : vector<1x1x128x128xbf16> to vector<128x128xbf16>
    %cst_53 = arith.constant dense<0.000000e+00> : vector<256x128xf32>
    %70 = tpu.matmul %67, %69, %cst_53 {dimension_numbers = #tpu.dot_dimension_numbers<[1], [0], [0], [1], [0, 0, 1, 1], [], []>} : vector<256x128xbf16>, vector<128x128xbf16>, vector<256x128xf32> -> vector<256x128xf32>
    %71 = arith.addf %65, %70 : vector<256x128xf32>
    %c0_54 = arith.constant 0 : index
    %c0_55 = arith.constant 0 : index
    %72 = vector.load %arg5[%c0_54, %c0_55] : memref<4x128xf32, #tpu.memory_space<vmem>>, vector<4x128xf32>
    %73 = vector.extract_strided_slice %72 {offsets = [0, 0], sizes = [1, 128], strides = [1, 1]} : vector<4x128xf32> to vector<1x128xf32>
    %74 = vector.broadcast %73 : vector<1x128xf32> to vector<256x128xf32>
    %75 = arith.mulf %71, %74 : vector<256x128xf32>
    %76 = vector.extract_strided_slice %72 {offsets = [1, 0], sizes = [1, 128], strides = [1, 1]} : vector<4x128xf32> to vector<1x128xf32>
    %77 = vector.broadcast %76 : vector<1x128xf32> to vector<256x128xf32>
    %78 = arith.addf %75, %77 : vector<256x128xf32>
    %cst_56 = arith.constant 0.000000e+00 : f32
    %79 = vector.broadcast %cst_56 : f32 to vector<256x128xf32>
    %80 = arith.maximumf %78, %79 : vector<256x128xf32>
    %81 = vector.shape_cast %80 : vector<256x128xf32> to vector<1x16x16x128xf32>
    %c0_57 = arith.constant 0 : index
    %c0_58 = arith.constant 0 : index
    %c0_59 = arith.constant 0 : index
    %c0_60 = arith.constant 0 : index
    %82 = vector.load %arg6[%c0_57, %c0_58, %c0_59, %c0_60] : memref<1x16x16x128xf32, #tpu.memory_space<vmem>>, vector<1x16x16x128xf32>
    tpu.vector_store %arg6[%c0_57, %c0_58, %c0_59, %c0_60], %81 {strides = array<i32>} : memref<1x16x16x128xf32, #tpu.memory_space<vmem>>, vector<1x16x16x128xf32>,
    return
  }
  func.func @transform_1(%arg0: i32, %arg1: i32, %arg2: i32) -> (i32, i32, i32, i32) {
    %c0_i32 = arith.constant 0 : i32
    %c0_i32_0 = arith.constant 0 : i32
    %c0_i32_1 = arith.constant 0 : i32
    %c0_i32_2 = arith.constant 0 : i32
    return %c0_i32, %c0_i32_0, %c0_i32_1, %arg0 : i32, i32, i32, i32
  }
  func.func @transform_2(%arg0: i32, %arg1: i32, %arg2: i32) -> (i32, i32) {
    %c0_i32 = arith.constant 0 : i32
    %c0_i32_0 = arith.constant 0 : i32
    return %c0_i32, %arg0 : i32, i32
  }
  func.func @transform_3(%arg0: i32, %arg1: i32, %arg2: i32) -> (i32, i32, i32, i32) {
    %c0_i32 = arith.constant 0 : i32
    %c0_i32_0 = arith.constant 0 : i32
    return %arg1, %arg2, %c0_i32, %arg0 : i32, i32, i32, i32
  }
}

</mosaic_0001>

<bundles_post_ra>
// kernel: tpu_custom_call.1
= control target key start
LH: loop header
LB: loop body
LE: loop exit
PB: predicated region body
PF: predicated region fallthrough
CT: control target
= control target key end

     0   :  { %8 = vsyncpa [#allocation6], 0  ;;  %s6395_s0 = inlined_call_operand.hbm [shape: bf16[36,24,128], index: 0, kind: input, shape index: {}]   ;;  %s6396_s1 = inlined_call_operand.hbm [shape: bf16[3,3,128,128], index: 1, kind: input, shape index: {}]   ;;  %s6397_s2 = inlined_call_operand.hbm [shape: f32[4,128], index: 2, kind: input, shape index: {}]   ;;  %s6398_s3 = inlined_call_operand.hbm [shape: f32[2,16,16,128], index: 3, kind: output, shape index: {}]  }
   0x1   :  { %9 = vsyncpa [#allocation9], 0 }
   0x2   :  { %10 = vsyncpa [#allocation7], 0 }
   0x3   :  { %12 = vsyncpa [#allocation7 + $0x1], 0  ;;  %s4886_s12 = smov 0   ;;  %s4888_s13 = smov 0  }
   0x4   :  { %s4890_s14 = smov 0   ;;  %s4892_s15 = smov 0  }
   0x5   :  { %s4894_s16 = smov 0   ;;  %s4896_s17 = smov 0  }
   0x6 LB: > { %s3664_s18 = sadd.s32 4294967295, %s4856_s17   ;;  %s3665_s19 = sadd.s32 4294967294, %s4856_s17   ;;  %s4856_s17 = sphi %s4896_s17, %s18_s17   ;;  %s4852_s16 = sphi %s4894_s16, %s6542_s16   ;;  %s4848_s15 = sphi %s4892_s15, %s6541_s15   ;;  %s4844_s14 = sphi %s4890_s14, %s6540_s14   ;;  %s4840_s13 = sphi %s4888_s13, %s6539_s13   ;;  %s4836_s12 = sphi %s4886_s12, %s6538_s12  }
   0x7   : > { %s33_s20 = sadd.s32 1, %s4852_s16  ;;  %s100_s21 = sadd.s32 1, %s4844_s14 }
   0x8   : > { %p35_p0 = scmp.ge.s32.totalorder %s33_s20, 2  ;;  %p110_p1 = scmp.ne.s32.totalorder %s4844_s14, %s4840_s13 }
   0x9   : > { %p111_p2 = scmp.eq.s32.totalorder %s3664_s18, 1  ;;  %p116_p3 = scmp.ne.s32.totalorder %s4840_s13, %s4836_s12 }
   0xa   : > { %s6544_s20 = smov (%p35_p0, %s33_s20), 0  ;;  %p117_p5 = scmp.eq.s32.totalorder %s3665_s19, 1 }
   0xb   : > { %p4926_p4 = por %p111_p2, %p110_p1  ;;  %s93_s23 = ssub.s32 %s4852_s16, %s6544_s20 }
   0xc   : > { %p3666_p6 = scmp.ge.s32.totalorder %s4856_s17, 1  ;;  %p98_p7 = scmp.eq.s32.totalorder %s93_s23, 0 }
   0xd   : > { %s6409_s22 = scalar_select %p4926_p4, 1, 0 }
   0xe   : > { %p4933_p8 = por %p117_p5, %p116_p3  ;;  %p124_p9 = scmp.lt.s32.totalorder %s4856_s17, 3 }
   0xf   : > { %s4939_s25 = scalar_select %p98_p7, %s4844_s14, %s100_s21  }
  0x10   : > { %s6410_s24 = scalar_select %p4933_p8, 1, 0 }
  0x11   : > { %p4941_p10 = pnand %p3666_p6, %p124_p9  ;;  %p4945_p11 = scmp.eq.s32.totalorder %s3664_s18, 0 }
  0x12   : > { %s4858_s28 = smov [#allocation5]   ;;  %s4859_s4 = smov [#allocation8]  }
  0x13   : > { %p4503_p12 = pneg %p4941_p10  ;;  %s138_s29 = sshll.u32 %s4858_s28, 4  ;;  %s139_s29 = int_to_ptr.vmem [resolvable:$true] %s138_s29 }
  0x14   : > { %s154_s5 = sshll.u32 %s4859_s4, 4  ;;  %s4707_s6 = scalar_lea.vmem %s139_s29, 9216  ;;  %s155_s5 = int_to_ptr.vmem [resolvable:$true] %s154_s5 }
  0x15   : > { %p4953_p13 = pnand %p4945_p11, %p4503_p12  ;;  %p4708_p1 = scmp.ne.s32.totalorder %s139_s29, %s4707_s6 }
  0x16   : > { %p4715_p5 = scmp.lt.s32.totalorder %s139_s29, %s139_s29  ;;  %p4716_p6 = scmp.lt.s32.totalorder %s4707_s6, %s4707_s6 }
  0x17   : > { %p4698_p0 = pneg %p4953_p13 }
  0x18   : > { %p4717_p7 = por %p4716_p6, %p4715_p5 }
  0x19   : > { %p4710_p2 = pnand %p4708_p1, %p4698_p0 }
  0x1b   : > { %p4711_p3 = pneg %p4710_p2 }
  0x1d   : > { %p4718_p9 = pnand %p4717_p7, %p4711_p3 }
  0x1f   : > { %4721 = shalt.err (!%p4718_p9)
}
  0x20   : > { %s4860_s7 = smov 64   ;;  %s4861_s8 = smov 4  }
  0x21   : > { %4506 = dma.hbm_to_vmem [thread:$0]  (!%p4953_p13), %s6396_s1, 9216, %s139_s29, [#allocation6], %s4860_s7, %s4860_s7, %s4861_s8  }
  0x22   : > { %s4733_s11 = scalar_lea.vmem %s155_s5, 64  ;;  %p4741_p8 = scmp.lt.s32.totalorder %s155_s5, %s155_s5 }
  0x23   : > { %p4734_p12 = scmp.ne.s32.totalorder %s155_s5, %s4733_s11  ;;  %p4742_p4 = scmp.lt.s32.totalorder %s4733_s11, %s4733_s11 }
  0x25   : > { %p4736_p1 = pnand %p4734_p12, %p4698_p0  ;;  %p4743_p5 = por %p4742_p4, %p4741_p8 }
  0x27   : > { %p4737_p2 = pneg %p4736_p1 }
  0x29   : > { %p4744_p3 = pnand %p4743_p5, %p4737_p2 }
  0x2b   : > { %4747 = shalt.err (!%p4744_p3)
}
  0x2c   : > { %4509 = dma.hbm_to_vmem [thread:$0]  (!%p4953_p13), %s6397_s2, 64, %s155_s5, [#allocation9]  }
  0x2d   : > { %167 = sbr.rel (%p4941_p10) target bundleno = 613 (0x265), region = 28 }
  0x32   : > { %4821 = dma.done.wait (%p4945_p11), [#allocation6], 9216  }
  0x33   : > { %4823 = vsyncadd (%p4945_p11), [#allocation6], 4294958080 }
  0x34   : > { %4825 = dma.done.wait (%p4945_p11), [#allocation9], 64  }
  0x35   : > { %4827 = vsyncadd (%p4945_p11), [#allocation9], 4294967232  ;;  %s185_s21 = sand.u32 1, %s4840_s13   ;;  %s3827_s23 = smul.u32 3456, %s4848_s15 }
  0x36   : > { %s3672_s26 = sshll.u32 %s185_s21, 8  ;;  %s4862_s4 = smov [#allocation2]  }
  0x37   : > { %s197_s30 = scalar_lea.hbm %s6395_s0, %s3827_s23  ;;  %s205_s5 = sshll.u32 %s4862_s4, 4  ;;  %s206_s5 = int_to_ptr.vmem [resolvable:$true] %s205_s5 }
  0x38   : > { %s4748_s6 = scalar_lea.hbm %s197_s30, 3456  ;;  %s4750_s27 = scalar_lea.hbm %s6395_s0, 6912 }
  0x39   : > { %p4749_p4 = scmp.ne.s32.totalorder %s197_s30, %s4748_s6  ;;  %p4751_p8 = scmp.lt.s32.totalorder %s197_s30, %s6395_s0 }
  0x3a   : > { %p4752_p10 = scmp.lt.s32.totalorder %s4750_s27, %s4748_s6 }
  0x3c   : > { %p4753_p11 = por %p4752_p10, %p4751_p8 }
  0x3e   : > { %p4754_p13 = pnand %p4753_p11, %p4749_p4 }
  0x40   : > { %4757 = shalt.err (!%p4754_p13)  }
  0x41   : > { %s4758_s11 = scalar_lea.vmem %s206_s5, 3456  ;;  %s4762_s18 = scalar_lea.vmem %s206_s5, 6912 }
  0x42   : > { %p4759_p0 = scmp.ne.s32.totalorder %s206_s5, %s4758_s11  ;;  %p4763_p6 = scmp.lt.s32.totalorder %s206_s5, %s206_s5 }
  0x43   : > { %p4764_p7 = scmp.lt.s32.totalorder %s4762_s18, %s4758_s11 }
  0x45   : > { %p4765_p9 = por %p4764_p7, %p4763_p6 }
  0x47   : > { %p4766_p12 = pnand %p4765_p9, %p4759_p0 }
  0x49   : > { %4769 = shalt.err (!%p4766_p12)  }
  0x4a   : > { %208 = dma.hbm_to_vmem [thread:$0]  %s197_s30, 3456, %s206_s5, [#allocation3] }
  0x4b   : > { %s4998_s19 = scalar_lea.vmem [#allocation10], %s3672_s26 }
  0x4c   : > { %4828 = dma.done.wait [#allocation3], 3456 }
  0x4d   : > { %4829 = vsyncadd [#allocation3], 4294963840  ;;  %v4574_v0 = vld [vmem:[#allocation5 + $0xf8] sm:$0xff]   ;;  %v4575_v1 = vld [vmem:[#allocation5 + $0xf0] sm:$0xff]   ;;  %vm1117_vm0 = vsmask.f32 3328 }
  0x4e   : > { %4045 = vmatprep.subr.bf16.mxu0 %v4574_v0  ;;  %4477 = vmatprep.subr.bf16.mxu1 %v4574_v0  ;;  %v4576_v2 = vld [vmem:[#allocation5 + $0xe8] sm:$0xff]   ;;  %v4577_v3 = vld [vmem:[#allocation5 + $0xe0] sm:$0xff]   ;;  %v5000_v4 = vld [vmem:[#allocation2 + $0xc] sm:$0xf]  ;;  %vm1118_vm1 = vsmask.f32 7440 }
  0x4f   : > { %4046 = vmatpush3.bf16.msra.mxu0 %v4574_v0  ;;  %4485 = vmatpush3.bf16.msra.mxu1 %v4574_v0  ;;  %v5002_v5 = vld [vmem:[#allocation2 + $0x10] sm:$0xf]  ;;  %v5004_v6 = vld [vmem:[#allocation2 + $0x6c] sm:$0xf]  ;;  %v4579_v11 = vld [vmem:[#allocation5 + $0xd0] sm:$0xff]   ;;  %v1145_v30 = vshrl.u32 %v5000_v4, 16 }
  0x50   : > { %4047 = vmatprep.subr.bf16.mxu0 %v4575_v1  ;;  %4478 = vmatprep.subr.bf16.mxu1 %v4575_v1  ;;  %v5008_v7 = vcombine.low %v5000_v4, %v5002_v5  ;;  %v5010_v8 = vld [vmem:[#allocation2 + $0x70] sm:$0xf]  ;;  %v4578_v10 = vld [vmem:[#allocation5 + $0xd8] sm:$0xff]   ;;  %v4580_v12 = vld [vmem:[#allocation5 + $0xc8] sm:$0xff]   ;;  %v1148_v37 = vshll.u32 %v5000_v4, 16  ;;  %v1158_v45 = vshrl.u32 %v5002_v5, 16 }
  0x51   : > { %v5014_v9 = vcombine.low %v5004_v6, %v5010_v8  ;;  %v4581_v13 = vld [vmem:[#allocation5 + $0xc0] sm:$0xff]   ;;  %v5018_v14 = vld [vmem:[#allocation2 + $0x18] sm:$0xf]  ;;  %v5020_v15 = vld [vmem:[#allocation2 + $0x1c] sm:$0xf]  ;;  %v1147_v44 = vrot.slane %v1145_v30, 4 }
  0x52   : > { %4061 = vmatprep.mubr.bf16.mxu0 %v5008_v7  ;;  %v5022_v16 = vld [vmem:[#allocation2 + $0x78] sm:$0xf]  ;;  %v5024_v17 = vld [vmem:[#allocation2 + $0x7c] sm:$0xf]  ;;  %v4586_v18 = vld [vmem:[#allocation5 + $0x38] sm:$0xff]   ;;  %v5030_v21 = vcombine.low %v5018_v14, %v5020_v15  ;;  %v1150_v51 = vrot.slane %v1148_v37, 5 }
  0x53   : > { %4048 = vmatpush3.bf16.msra.mxu0 %v4575_v1  ;;  %4486 = vmatpush3.bf16.msra.mxu1 %v4575_v1  ;;  %v4587_v19 = vld [vmem:[#allocation5 + $0x1b8] sm:$0xff]   ;;  %v5026_v20 = vld [vmem:[#allocation2 + $0x24] sm:$0xf]  ;;  %v5034_v22 = vcombine.low %v5022_v16, %v5024_v17  ;;  %v5053_v31 = vld [vmem:[#allocation2 + $0x30] sm:$0xf]  ;;  %v1154_v0 = vshll.u32 %v5002_v5, 16 }
  0x54   : > { %4049 = vmatprep.subr.bf16.mxu0 %v4576_v2  ;;  %4479 = vmatprep.subr.bf16.mxu1 %v4576_v2  ;;  %v5036_v23 = vld [vmem:[#allocation2 + $0x28] sm:$0xf]  ;;  %v5038_v24 = vld [vmem:[#allocation2 + $0x84] sm:$0xf]  ;;  %v5055_v32 = vld [vmem:[#allocation2 + $0x34] sm:$0xf] }
  0x55   : > { %4077 = vmatprep.mubr.bf16.mxu1 %v5014_v9  ;;  %v5040_v25 = vld [vmem:[#allocation2 + $0x88] sm:$0xf]  ;;  %v4588_v26 = vld [vmem:[#allocation5 + $0x30] sm:$0xff]   ;;  %v5044_v28 = vcombine.low %v5026_v20, %v5036_v23  ;;  %v5057_v33 = vld [vmem:[#allocation2 + $0x90] sm:$0xf]  ;;  %v5066_v39 = vcombine.low %v5053_v31, %v5055_v32  ;;  %vm2414_vm3 = vcmask 1042432  }
  0x56   : > { %v4589_v27 = vld [vmem:[#allocation5 + $0x1b0] sm:$0xff]   ;;  %v5048_v29 = vcombine.low %v5038_v24, %v5040_v25  ;;  %v283_v34 = vld [vmem:[#allocation2 + $0x94] sm:$0xf]  ;;  %v4594_v35 = vld [vmem:[#allocation5 + $0x28] sm:$0xff]   ;;  %vm2415_vm4 = vcmask 1046532   ;;  %s3828_s23 = sshll.u32 %s4848_s15, 12 }
  0x57   : > { %4050 = vmatpush3.bf16.msra.mxu0 %v4576_v2  ;;  %4487 = vmatpush3.bf16.msra.mxu1 %v4576_v2  ;;  %v4595_v36 = vld [vmem:[#allocation5 + $0x1a8] sm:$0xff]   ;;  %v5069_v40 = vcombine.low %v5057_v33, %v283_v34  ;;  %v5071_v41 = vld [vmem:[#allocation2 + $0x40] sm:$0xf]  ;;  %v4596_v46 = vld [vmem:[#allocation5 + $0x20] sm:$0xff]   ;;  %v1151_v2 = vor.u32 %v1150_v51, %v1147_v44  ;;  %s3546_s26 = sshll.u32 %s4998_s19, 4  ;;  %s6342_s30 = scalar_lea.hbm %s6398_s3, %s3828_s23  ;;  %s6344_s26 = int_to_ptr.vmem [resolvable:$true] %s3546_s26 }
  0x58   : > { %4051 = vmatprep.subr.bf16.mxu0 %v4577_v3  ;;  %4480 = vmatprep.subr.bf16.mxu1 %v4577_v3  ;;  %v5062_v38 = vld [vmem:[#allocation2 + $0x3c] sm:$0xf]  ;;  %v5075_v43 = vld [vmem:[#allocation2 + $0xa0] sm:$0xf]  ;;  %v4597_v47 = vld [vmem:[#allocation5 + $0x1a0] sm:$0xff]   ;;  %s6350_s15 = scalar_lea.sflag [#allocation7], %s185_s21 }
  0x59   : > { %v5073_v42 = vld [vmem:[#allocation2 + $0x9c] sm:$0xf]  ;;  %v5080_v48 = vcombine.low %v5062_v38, %v5071_v41  ;;  %v5086_v50 = vld [vmem:[#allocation2 + $0x48] sm:$0xf]  ;;  %v5090_v52 = vld [vmem:[#allocation2 + $0x4c] sm:$0xf] }
  0x5a   : > { %v5084_v49 = vcombine.low %v5073_v42, %v5075_v43  ;;  %v4602_v53 = vld [vmem:[#allocation5 + $0x18] sm:$0xff]   ;;  %vm5094_vm2 = vmor %vm1117_vm0, %vm1118_vm1  ;;  %v5098_v58 = vld [vmem:[#allocation2 + $0x54] sm:$0xf]  ;;  %v5106_v61 = vcombine.low %v5086_v50, %v5090_v52  ;;  %v1152_v30 = vrot.slane %v1151_v2, 4  ;;  %s4770_s4 = scalar_lea.vmem %s6344_s26, 4096  ;;  %p6536_p2 = scmp.ne.s32.totalorder %s6409_s22, 0 }
  0x5b   : > { %4052 = vmatpush3.bf16.msra.mxu0 %v4577_v3  ;;  %4488 = vmatpush3.bf16.msra.mxu1 %v4577_v3  ;;  %v4603_v54 = vld [vmem:[#allocation5 + $0x198] sm:$0xff]   ;;  %v5100_v59 = vld [vmem:[#allocation2 + $0x58] sm:$0xf]  ;;  %v291_v60 = vld [vmem:[#allocation2 + $0xb4] sm:$0xf]  ;;  %v1160_v3 = vrot.slane %v1158_v45, 4  ;;  %p4771_p1 = scmp.ne.s32.totalorder %s6344_s26, %s4770_s4 }
  0x5c   : > { %4053 = vmatprep.subr.bf16.mxu0 %v4578_v10  ;;  %4481 = vmatprep.subr.bf16.mxu1 %v4578_v10  ;;  %v288_v55 = vld [vmem:[#allocation2 + $0xa8] sm:$0xf]  ;;  %v289_v56 = vld [vmem:[#allocation2 + $0xac] sm:$0xf]  ;;  %v292_v63 = vld [vmem:[#allocation2 + $0xb8] sm:$0xf] }
  0x5d   : > { %v5108_v62 = vcombine.low %v288_v55, %v289_v56  ;;  %v4604_v1 = vld [vmem:[#allocation5 + $0x10] sm:$0xff]   ;;  %v4611_v34 = vld [vmem:[#allocation5 + $0x188] sm:$0xff]   ;;  %v4613_v51 = vld [vmem:[#allocation5 + $0x180] sm:$0xff]   ;;  %p4772_p5 = pnand %p4771_p1, %p6536_p2  ;;  %s4863_s5 = smov [#allocation10]  }
  0x5e   : > { %v5133_v45 = vld [vmem:[#allocation2 + $0x4] sm:$0xf]  ;;  %v4615_v55 = vld [vmem:[#allocation5 + $0x78] sm:$0xff]   ;;  %vm5238_vm5 = vmor %vm2414_vm3, %vm2415_vm4  ;;  %s4774_s6 = sshll.u32 %s4863_s5, 4  ;;  %s4775_s6 = int_to_ptr.vmem [resolvable:$false] %s4774_s6 }
  0x5f   : > { %4054 = vmatpush3.bf16.msra.mxu0 %v4578_v10  ;;  %4489 = vmatpush3.bf16.msra.mxu1 %v4578_v10  ;;  %v4605_v10 = vld [vmem:[#allocation5 + $0x190] sm:$0xff]   ;;  %v4616_v56 = vld [vmem:[#allocation5 + $0x138] sm:$0xff]   ;;  %p4773_p3 = pneg %p4772_p5  ;;  %s4776_s7 = scalar_lea.vmem %s4775_s6, 8192 }
  0x60   : > { %4055 = vmatprep.subr.bf16.mxu0 %v4579_v11  ;;  %4482 = vmatprep.subr.bf16.mxu1 %v4579_v11  ;;  %v4617_v2 = vld [vmem:[#allocation5 + $0x70] sm:$0xff]   ;;  %p4777_p4 = scmp.lt.s32.totalorder %s6344_s26, %s4775_s6  ;;  %p4778_p8 = scmp.lt.s32.totalorder %s4776_s7, %s4770_s4 }
  0x62   : > { %p4779_p10 = por %p4778_p8, %p4777_p4 }
  0x63   : > { %4056 = vmatpush3.bf16.msra.mxu0 %v4579_v11  ;;  %4490 = vmatpush3.bf16.msra.mxu1 %v4579_v11  ;;  %v5113_v11 = vcombine.low %v5098_v58, %v5100_v59 }
  0x64   : > { %4057 = vmatprep.subr.bf16.mxu0 %v4580_v12  ;;  %4483 = vmatprep.subr.bf16.mxu1 %v4580_v12  ;;  %p4780_p11 = pnand %p4779_p10, %p4773_p3 }
  0x67   : > { %4058 = vmatpush3.bf16.msra.mxu0 %v4580_v12  ;;  %4491 = vmatpush3.bf16.msra.mxu1 %v4580_v12  ;;  %v5115_v12 = vcombine.low %v291_v60, %v292_v63  ;;  %v5142_v60 = vld [vmem:[#allocation2 + $0x14] sm:$0xf] }
  0x68   : > { %4059 = vmatprep.subr.bf16.mxu0 %v4581_v13  ;;  %4484 = vmatprep.subr.bf16.mxu1 %v4581_v13 }
  0x6b   : > { %4060 = vmatpush3.bf16.msra.mxu0 %v4581_v13  ;;  %4492 = vmatpush3.bf16.msra.mxu1 %v4581_v13  ;;  %v5117_v13 = vld [vmem:[#allocation2 + $0x60] sm:$0xf] }
  0x6c   : > { %4093 = vmatprep.subr.bf16.mxu1 %v4586_v18  ;;  %4141 = vmatprep.subr.bf16.mxu0 %v4587_v19 }
  0x6e   : > { %4062 = vmatmul.mubr.bf16.vlgmr.msra.gmra.mxu0 %v5030_v21  ;;  %4078 = vmatmul.mubr.bf16.vlgmr.msra.gmra.mxu1 %v5034_v22 }
  0x6f   : > { %4094 = vmatpush3.bf16.msra.mxu1 %v4586_v18  ;;  %4142 = vmatpush3.bf16.msra.mxu0 %v4587_v19  ;;  %v5119_v18 = vld [vmem:[#allocation2 + $0x64] sm:$0xf]  ;;  %v294_v19 = vld [vmem:[#allocation2 + $0xc0] sm:$0xf] }
  0x70   : > { %4095 = vmatprep.subr.bf16.mxu1 %v4588_v26  ;;  %4143 = vmatprep.subr.bf16.mxu0 %v4589_v27  ;;  %v5129_v37 = vcombine.low %v5117_v13, %v5119_v18 }
  0x71   : > { %4065 = vmatprep.mubr.bf16.mxu0 %v5044_v28  ;;  %4081 = vmatprep.mubr.bf16.mxu1 %v5048_v29 }
  0x73   : > { %4096 = vmatpush3.bf16.msra.mxu1 %v4588_v26  ;;  %4144 = vmatpush3.bf16.msra.mxu0 %v4589_v27  ;;  %v295_v26 = vld [vmem:[#allocation2 + $0xc4] sm:$0xf]  ;;  %v4610_v27 = vld [vmem:[#allocation5 + $0x8] sm:$0xff]  }
  0x74   : > { %4097 = vmatprep.subr.bf16.mxu1 %v4594_v35  ;;  %4145 = vmatprep.subr.bf16.mxu0 %v4595_v36  ;;  %v5131_v44 = vcombine.low %v294_v19, %v295_v26  ;;  %v4619_v26 = vld [vmem:[#allocation5 + $0x68] sm:$0xff]  }
  0x76   : > { %4066 = vmatmul.mubr.bf16.gmra.mxu0 %v5066_v39  ;;  %4082 = vmatmul.mubr.bf16.gmra.mxu1 %v5069_v40 }
  0x77   : > { %4098 = vmatpush3.bf16.msra.mxu1 %v4594_v35  ;;  %4146 = vmatpush3.bf16.msra.mxu0 %v4595_v36  ;;  %v1156_v35 = vrot.slane %v1154_v0, 5  ;;  %v5125_v36 = vld [vmem:[#allocation2] sm:$0xf]  ;;  %v1164_v0 = vshll.u32 %v5142_v60, 16 }
  0x78   : > { %4099 = vmatprep.subr.bf16.mxu1 %v4596_v46  ;;  %4147 = vmatprep.subr.bf16.mxu0 %v4597_v47 }
  0x79   : > { %4069 = vmatprep.mubr.bf16.mxu0 %v5080_v48  ;;  %4085 = vmatprep.mubr.bf16.mxu1 %v5084_v49 }
  0x7b   : > { %4100 = vmatpush3.bf16.msra.mxu1 %v4596_v46  ;;  %4148 = vmatpush3.bf16.msra.mxu0 %v4597_v47  ;;  %v1157_v46 = vsel %vm5094_vm2, %v1152_v30, %v1156_v35  ;;  %v4612_v47 = vld [vmem:[#allocation5] sm:$0xff]  }
  0x7c   : > { %4101 = vmatprep.subr.bf16.mxu1 %v4602_v53  ;;  %4149 = vmatprep.subr.bf16.mxu0 %v4603_v54  ;;  %v4622_v30 = vld [vmem:[#allocation5 + $0x120] sm:$0xff]  }
  0x7e   : > { %4070 = vmatmul.mubr.bf16.gmra.mxu0 %v5106_v61  ;;  %4086 = vmatmul.mubr.bf16.gmra.mxu1 %v5108_v62 }
  0x7f   : > { %4102 = vmatpush3.bf16.msra.mxu1 %v4602_v53  ;;  %4150 = vmatpush3.bf16.msra.mxu0 %v4603_v54  ;;  %v3700_v53 = vcombine.low %v5125_v36, %v5133_v45  ;;  %v1161_v54 = vor.u32 %v1160_v3, %v1156_v35  ;;  %v4618_v3 = vld [vmem:[#allocation5 + $0x130] sm:$0xff]  }
  0x80   : > { %4103 = vmatprep.subr.bf16.mxu1 %v4604_v1  ;;  %4151 = vmatprep.subr.bf16.mxu0 %v4605_v10  ;;  %v4625_v35 = vld [vmem:[#allocation5 + $0x50] sm:$0xff]  }
  0x81   : > { %4073 = vmatprep.mubr.bf16.mxu0 %v5113_v11  ;;  %4089 = vmatprep.mubr.bf16.mxu1 %v5115_v12  ;;  %v1162_v63 = vrot.slane %v1161_v54, 4  ;;  %v1182_v54 = vshrl.u32 %v5020_v15, 16 }
  0x83   : > { %4104 = vmatpush3.bf16.msra.mxu1 %v4604_v1  ;;  %4152 = vmatpush3.bf16.msra.mxu0 %v4605_v10  ;;  %v1166_v1 = vrot.slane %v1164_v0, 5 }
  0x84   : > { %4105 = vmatprep.subr.bf16.mxu1 %v4610_v27  ;;  %4153 = vmatprep.subr.bf16.mxu0 %v4611_v34 }
  0x85   : > { %v1167_v10 = vsel %vm5094_vm2, %v1162_v63, %v1166_v1  ;;  %v1121_v63 = vshrl.u32 %v5125_v36, 16  ;;  %v1184_v1 = vrot.slane %v1182_v54, 4  ;;  %v1196_v54 = vshll.u32 %v5026_v20, 16 }
  0x86   : > { %4074 = vmatmul.mubr.bf16.gmra.mxu0 %v5129_v37  ;;  %4090 = vmatmul.mubr.bf16.gmra.mxu1 %v5131_v44  ;;  %v5149_v19 = vcombine.low %v1157_v46, %v1167_v10  ;;  %v4626_v46 = vld [vmem:[#allocation5 + $0x110] sm:$0xff]   ;;  %v3761_v10 = vrot.slane %v5000_v4, 9 }
  0x87   : > { %4106 = vmatpush3.bf16.msra.mxu1 %v4610_v27  ;;  %4154 = vmatpush3.bf16.msra.mxu0 %v4611_v34  ;;  %v4620_v27 = vld [vmem:[#allocation5 + $0x128] sm:$0xff]   ;;  %v4624_v34 = vld [vmem:[#allocation5 + $0x118] sm:$0xff]  }
  0x88   : > { %4107 = vmatprep.subr.bf16.mxu1 %v4612_v47  ;;  %4155 = vmatprep.subr.bf16.mxu0 %v4613_v51 }
  0x89   : > { %4109 = vmatprep.mubr.bf16.mxu1 %v3700_v53  ;;  %4157 = vmatprep.mubr.bf16.mxu0 %v5030_v21  ;;  %v1172_v53 = vshll.u32 %v5018_v14, 16 }
  0x8b   : > { %4108 = vmatpush3.bf16.msra.mxu1 %v4612_v47  ;;  %4156 = vmatpush3.bf16.msra.mxu0 %v4613_v51  ;;  %v4630_v47 = vld [vmem:[#allocation5 + $0x40] sm:$0xff]  }
  0x8c   : > { %4189 = vmatprep.subr.bf16.mxu1 %v4615_v55  ;;  %4237 = vmatprep.subr.bf16.mxu0 %v4616_v56  ;;  %v4631_v51 = vld [vmem:[#allocation5 + $0x100] sm:$0xff]  }
  0x8e   : > { %4110 = vmatmul.mubr.bf16.vlgmr.msra.gmra.mxu1 %v5008_v7  ;;  %4158 = vmatmul.mubr.bf16.vlgmr.msra.gmra.mxu0 %v5044_v28  ;;  %v4621_v7 = vld [vmem:[#allocation5 + $0x60] sm:$0xff]  }
  0x8f   : > { %4190 = vmatpush3.bf16.msra.mxu1 %v4615_v55  ;;  %4238 = vmatpush3.bf16.msra.mxu0 %v4616_v56  ;;  %v5169_v55 = vld [vmem:[#allocation5 + $0x1f8] sm:$0xff]  }
  0x90   : > { %4113 = vmatprep.mubr.bf16.mxu1 %v5030_v21  ;;  %4161 = vmatprep.mubr.bf16.mxu0 %v5066_v39  ;;  %v4623_v21 = vld [vmem:[#allocation5 + $0x58] sm:$0xff]  }
  0x91   : > { %4191 = vmatprep.subr.bf16.mxu1 %v4617_v2  ;;  %4239 = vmatprep.subr.bf16.mxu0 %v4618_v3  ;;  %v5171_v56 = vld [vmem:[#allocation5 + $0xb8] sm:$0xff]  }
  0x93   : > { %4192 = vmatpush3.bf16.msra.mxu1 %v4617_v2  ;;  %4240 = vmatpush3.bf16.msra.mxu0 %v4618_v3  ;;  %v1134_v2 = vshrl.u32 %v5133_v45, 16  ;;  %v2426_v3 = vrot.slane %v5002_v5, 5 }
  0x94   : > { %4193 = vmatprep.subr.bf16.mxu1 %v4619_v26  ;;  %4241 = vmatprep.subr.bf16.mxu0 %v4620_v27 }
  0x96   : > { %4114 = vmatmul.mubr.bf16.gmra.mxu1 %v5044_v28  ;;  %4162 = vmatmul.mubr.bf16.gmra.mxu0 %v5080_v48  ;;  %v4627_v28 = vld [vmem:[#allocation5 + $0x48] sm:$0xff]  }
  0x97   : > { %4117 = vmatprep.mubr.bf16.mxu1 %v5066_v39  ;;  %4165 = vmatprep.mubr.bf16.mxu0 %v5106_v61  ;;  %v4628_v39 = vld [vmem:[#allocation5 + $0x108] sm:$0xff]  }
  0x98   : > { %4194 = vmatpush3.bf16.msra.mxu1 %v4619_v26  ;;  %4242 = vmatpush3.bf16.msra.mxu0 %v4620_v27 }
  0x99   : > { %4195 = vmatprep.subr.bf16.mxu1 %v4621_v7  ;;  %4243 = vmatprep.subr.bf16.mxu0 %v4622_v30 }
  0x9c   : > { %4196 = vmatpush3.bf16.msra.mxu1 %v4621_v7  ;;  %4244 = vmatpush3.bf16.msra.mxu0 %v4622_v30  ;;  %v1136_v30 = vrot.slane %v1134_v2, 4  ;;  %v1241_v2 = vshrl.u32 %v5062_v38, 16 }
  0x9d   : > { %4197 = vmatprep.subr.bf16.mxu1 %v4623_v21  ;;  %4245 = vmatprep.subr.bf16.mxu0 %v4624_v34 }
  0x9e   : > { %4118 = vmatmul.mubr.bf16.gmra.mxu1 %v5080_v48  ;;  %4166 = vmatmul.mubr.bf16.gmra.mxu0 %v5113_v11  ;;  %v1169_v48 = vshrl.u32 %v5018_v14, 16 }
  0x9f   : > { %4121 = vmatprep.mubr.bf16.mxu1 %v5106_v61  ;;  %4169 = vmatprep.mubr.bf16.mxu0 %v5129_v37  ;;  %v1178_v61 = vshll.u32 %v5020_v15, 16  ;;  %v1130_v15 = vshll.u32 %v5133_v45, 16 }
  0xa0   : > { %4198 = vmatpush3.bf16.msra.mxu1 %v4623_v21  ;;  %4246 = vmatpush3.bf16.msra.mxu0 %v4624_v34  ;;  %v1171_v14 = vrot.slane %v1169_v48, 4  ;;  %v2428_v21 = vrot.slane %v2426_v3, 4  ;;  %v1193_v48 = vshrl.u32 %v5026_v20, 16  ;;  %v1244_v20 = vshll.u32 %v5062_v38, 16 }
  0xa1   : > { %4199 = vmatprep.subr.bf16.mxu1 %v4625_v35  ;;  %4247 = vmatprep.subr.bf16.mxu0 %v4626_v46  ;;  %v5175_v0 = vrot.slane %v1178_v61, 5  ;;  %v5188_v7 = vrot.slane %v1130_v15, 5  ;;  %v2429_v38 = vrot.slane %v5142_v60, 5 }
  0xa3   : > { %v1185_v45 = vor.u32 %v1184_v1, %v5175_v0  ;;  %v1137_v61 = vor.u32 %v1136_v30, %v5188_v7  ;;  %v1230_v1 = vshrl.u32 %v5055_v32, 16  ;;  %v5222_v30 = vld [vmem:[#allocation2 + $0x20] sm:$0xf] }
  0xa4   : > { %4200 = vmatpush3.bf16.msra.mxu1 %v4625_v35  ;;  %4248 = vmatpush3.bf16.msra.mxu0 %v4626_v46 }
  0xa5   : > { %4201 = vmatprep.subr.bf16.mxu1 %v4627_v28  ;;  %4249 = vmatprep.subr.bf16.mxu0 %v4628_v39 }
  0xa6   : > { %4122 = vmatmul.mubr.bf16.gmra.mxu1 %v5113_v11  ;;  %4170 = vmatmul.mubr.bf16.gmra.mxu0 %v5014_v9  ;;  %v1174_v11 = vrot.slane %v1172_v53, 5 }
  0xa7   : > { %4125 = vmatprep.mubr.bf16.mxu1 %v5129_v37  ;;  %4173 = vmatprep.mubr.bf16.mxu0 %v5034_v22  ;;  %v1124_v37 = vshll.u32 %v5125_v36, 16  ;;  %v1123_v36 = vrot.slane %v1121_v63, 4  ;;  %v1217_v63 = vshrl.u32 %v5053_v31, 16 }
  0xa8   : > { %4202 = vmatpush3.bf16.msra.mxu1 %v4627_v28  ;;  %4250 = vmatpush3.bf16.msra.mxu0 %v4628_v39  ;;  %v1175_v26 = vor.u32 %v1174_v11, %v1171_v14  ;;  %v1206_v14 = vshrl.u32 %v5036_v23, 16  ;;  %v1198_v11 = vrot.slane %v1196_v54, 5  ;;  %v5244_v54 = vld [vmem:[#allocation2 + $0xcc] sm:$0xf] }
  0xa9   : > { %4203 = vmatprep.subr.bf16.mxu1 %v4630_v47  ;;  %4251 = vmatprep.subr.bf16.mxu0 %v4631_v51  ;;  %v1126_v27 = vrot.slane %v1124_v37, 5  ;;  %v1220_v37 = vshll.u32 %v5053_v31, 16  ;;  %v1254_v31 = vshrl.u32 %v5071_v41, 16 }
  0xaa   : > { %v5195_v46 = vrot.slane %v1175_v26, 4  ;;  %v1202_v26 = vshll.u32 %v5036_v23, 16  ;;  %v1268_v23 = vshll.u32 %v5086_v50, 16 }
  0xab   : > { %v1127_v53 = vor.u32 %v1126_v27, %v1123_v36  ;;  %v1265_v36 = vshrl.u32 %v5086_v50, 16  ;;  %v1222_v4 = vrot.slane %v1220_v37, 5  ;;  %v1326_v50 = vshrl.u32 %v5119_v18, 16 }
  0xac   : > { %4204 = vmatpush3.bf16.msra.mxu1 %v4630_v47  ;;  %4252 = vmatpush3.bf16.msra.mxu0 %v4631_v51  ;;  %v5200_v47 = vld [vmem:[#allocation2 + $0x8] sm:$0xf]  ;;  %v5202_v51 = vrot.slane %v1185_v45, 4  ;;  %v1138_v45 = vrot.slane %v1137_v61, 4  ;;  %v5225_v28 = vrot.slane %v1202_v26, 5  ;;  %v1188_v61 = vshll.u32 %v5222_v30, 16 }
  0xad   : > { %4285 = vmatprep.subr.bf16.mxu1 %v5169_v55  ;;  %4333 = vmatprep.subr.bf16.mxu0 %v5171_v56  ;;  %v1140_v15 = vshll.u32 %v5200_v47, 16  ;;  %v1128_v27 = vrot.slane %v1127_v53, 4  ;;  %v1250_v26 = vshll.u32 %v5071_v41, 16 }
  0xae   : > { %4126 = vmatmul.mubr.bf16.gmra.mxu1 %v5014_v9  ;;  %4174 = vmatmul.mubr.bf16.gmra.mxu0 %v5048_v29 }
  0xaf   : > { %4129 = vmatprep.mubr.bf16.mxu1 %v5034_v22  ;;  %4177 = vmatprep.mubr.bf16.mxu0 %v5069_v40  ;;  %v1142_v39 = vrot.slane %v1140_v15, 5  ;;  %v1208_v22 = vrot.slane %v1206_v14, 4  ;;  %v1133_v53 = vsel %vm5094_vm2, %v1128_v27, %v5188_v7  ;;  %v5246_v14 = vld [vmem:[#allocation2 + $0xd0] sm:$0xf]  ;;  %v5276_v37 = vrot.slane %v1250_v26, 5 }
  0xb1   : > { %v1143_v7 = vsel %vm5094_vm2, %v1138_v45, %v1142_v39  ;;  %v2430_v39 = vsel %vm5238_vm5, %v2428_v21, %v2429_v38  ;;  %v1209_v5 = vor.u32 %v1208_v22, %v5225_v28  ;;  %v1246_v21 = vrot.slane %v1244_v20, 5 }
  0xb2   : > { %v3718_v41 = vcombine.low %v1133_v53, %v1143_v7  ;;  %v1232_v22 = vrot.slane %v1230_v1, 4  ;;  %v1302_v53 = vshrl.u32 %v5100_v59, 16  ;;  %v1274_v1 = vshll.u32 %v5090_v52, 16 }
  0xb3   : > { %v1313_v20 = vshrl.u32 %v5117_v13, 16  ;;  %v1316_v7 = vshll.u32 %v5117_v13, 16 }
  0xb6   : > { %4130 = vmatmul.mubr.bf16.gmra.mxu1 %v5048_v29  ;;  %4178 = vmatmul.mubr.bf16.gmra.mxu0 %v5084_v49  ;;  %v1195_v29 = vrot.slane %v1193_v48, 4  ;;  %v1181_v48 = vsel %vm5094_vm2, %v5195_v46, %v5175_v0  ;;  %v2427_v0 = vsel %vm5238_vm5, %v3761_v10, %v2426_v3  ;;  %v1226_v46 = vshll.u32 %v5055_v32, 16  ;;  %v5270_v32 = vld [vmem:[#allocation2 + $0x38] sm:$0xf] }
  0xb7   : > { %4133 = vmatprep.mubr.bf16.mxu1 %v5069_v40  ;;  %4181 = vmatprep.mubr.bf16.mxu0 %v5108_v62  ;;  %v5227_v40 = vld [vmem:[#allocation2 + $0x2c] sm:$0xf]  ;;  %v5264_v27 = vcombine.low %v2427_v0, %v2430_v39  ;;  %v1278_v3 = vshrl.u32 %v5090_v52, 16  ;;  %v1190_v10 = vrot.slane %v1188_v61, 5  ;;  %v1256_v0 = vrot.slane %v1254_v31, 4 }
  0xb8   : > { %v1199_v15 = vor.u32 %v1198_v11, %v1195_v29  ;;  %v1219_v11 = vrot.slane %v1217_v63, 4  ;;  %v1243_v29 = vrot.slane %v1241_v2, 4  ;;  %v5272_v38 = vrot.slane %v1226_v46, 5  ;;  %v5274_v63 = vld [vmem:[#allocation2 + $0x44] sm:$0xf] }
  0xb9   : > { %v1210_v39 = vrot.slane %v1209_v5, 4  ;;  %v1236_v34 = vshll.u32 %v5270_v32, 16  ;;  %v1292_v61 = vshll.u32 %v5098_v58, 16  ;;  %v1191_v2 = vsel %vm5094_vm2, %v5202_v51, %v1190_v10 }
  0xba   : > { %v1200_v45 = vrot.slane %v1199_v15, 4  ;;  %v1223_v9 = vor.u32 %v1222_v4, %v1219_v11  ;;  %v1247_v31 = vor.u32 %v1246_v21, %v1243_v29  ;;  %v1260_v15 = vshll.u32 %v5274_v63, 16 }
  0xbb   : > { %v1233_v51 = vor.u32 %v1232_v22, %v5272_v38  ;;  %v1257_v52 = vor.u32 %v1256_v0, %v5276_v37  ;;  %v5296_v13 = vcombine.low %v1181_v48, %v1191_v2  ;;  %v1238_v26 = vrot.slane %v1236_v34, 5  ;;  %v4635_v22 = vld [vmem:[#allocation5 + $0xb0] sm:$0xff]  }
  0xbc   : > { %v1224_v46 = vrot.slane %v1223_v9, 4  ;;  %v1267_v5 = vrot.slane %v1265_v36, 4  ;;  %v1270_v11 = vrot.slane %v1268_v23, 5  ;;  %v5302_v4 = vrot.slane %v1274_v1, 5  ;;  %v5312_v36 = vld [vmem:[#allocation2 + $0x5c] sm:$0xf] }
  0xbd   : > { %v1262_v10 = vrot.slane %v1260_v15, 5  ;;  %v1234_v48 = vrot.slane %v1233_v51, 4  ;;  %v1258_v29 = vrot.slane %v1257_v52, 4  ;;  %v1388_v34 = vshll.u32 %v5038_v24, 16 }
  0xbe   : > { %4134 = vmatmul.mubr.bf16.gmra.mxu1 %v5084_v49  ;;  %4182 = vmatmul.mubr.bf16.gmra.mxu0 %v5115_v12  ;;  %v1212_v49 = vshll.u32 %v5227_v40, 16  ;;  %v1322_v23 = vshll.u32 %v5119_v18, 16  ;;  %v1271_v0 = vor.u32 %v1270_v11, %v1267_v5  ;;  %v1315_v2 = vrot.slane %v1313_v20, 4 }
  0xbf   : > { %4137 = vmatprep.mubr.bf16.mxu1 %v5108_v62  ;;  %4185 = vmatprep.mubr.bf16.mxu0 %v5131_v44  ;;  %v1289_v62 = vshrl.u32 %v5098_v58, 16  ;;  %v3709_v44 = vcombine.low %v5244_v54, %v5246_v14  ;;  %v1205_v58 = vsel %vm5094_vm2, %v1200_v45, %v5225_v28  ;;  %v1280_v28 = vrot.slane %v1278_v3, 4 }
  0xc0   : > { %v1214_v35 = vrot.slane %v1212_v49, 5  ;;  %v1298_v49 = vshll.u32 %v5100_v59, 16  ;;  %v1294_v59 = vrot.slane %v1292_v61, 5  ;;  %v1229_v3 = vsel %vm5094_vm2, %v1224_v46, %v5272_v38 }
  0xc1   : > { %v1291_v45 = vrot.slane %v1289_v62, 4  ;;  %v4634_v62 = vld [vmem:[#allocation5 + $0x1f0] sm:$0xff]   ;;  %v1318_v1 = vrot.slane %v1316_v7, 5  ;;  %v1239_v38 = vsel %vm5094_vm2, %v1234_v48, %v1238_v26  ;;  %v1308_v15 = vshll.u32 %v5312_v36, 16  ;;  %v5338_v7 = vld [vmem:[#allocation2 + $0x70] sm:$0xf] }
  0xc2   : > { %v5306_v21 = vrot.slane %v1298_v49, 5  ;;  %v5336_v20 = vrot.slane %v1322_v23, 5  ;;  %v1346_v51 = vshll.u32 %v5338_v7, 16  ;;  %v1409_v52 = vshrl.u32 %v5057_v33, 16  ;;  %v5342_v26 = vld [vmem:[#allocation2 + $0x68] sm:$0xf] }
  0xc3   : > { %v1295_v18 = vor.u32 %v1294_v59, %v1291_v45  ;;  %v1272_v49 = vrot.slane %v1271_v0, 4  ;;  %v5344_v5 = vcombine.low %v1229_v3, %v1239_v38  ;;  %v1310_v45 = vrot.slane %v1308_v15, 5  ;;  %v5348_v59 = vld [vmem:[#allocation2 + $0x74] sm:$0xf] }
  0xc4   : > { %v6418_v48 = vshrl.u32 %v5004_v6, 16  ;;  %v1332_v3 = vshll.u32 %v5342_v26, 16  ;;  %v5356_v0 = vrot.slane %v1346_v51, 5  ;;  %v1356_v38 = vshll.u32 %v5348_v59, 16 }
  0xc5   : > { %v6421_v15 = vshrl.u32 %v5022_v16, 16  ;;  %v6422_v51 = vshll.u32 %v5022_v16, 16  ;;  %v6424_v16 = vshrl.u32 %v5038_v24, 16 }
  0xc6   : > { %4138 = vmatmul.mubr.bf16.gmra.mxu1 %v5115_v12  ;;  %4186 = vmatmul.mubr.bf16.gmra.mxu0 %v3709_v44  ;;  %v1215_v12 = vsel %vm5094_vm2, %v1210_v39, %v1214_v35  ;;  %v1248_v44 = vrot.slane %v1247_v31, 4  ;;  %v1304_v35 = vrot.slane %v1302_v53, 4  ;;  %v1281_v39 = vor.u32 %v1280_v28, %v5302_v4 }
  0xc7   : > { %4205 = vmatprep.mubr.bf16.mxu1 %v3718_v41  ;;  %4253 = vmatprep.mubr.bf16.mxu0 %v5149_v19  ;;  %v5304_v41 = vld [vmem:[#allocation2 + $0x50] sm:$0xf]  ;;  %v5310_v9 = vcombine.low %v1205_v58, %v1215_v12  ;;  %v1263_v31 = vsel %vm5094_vm2, %v1258_v29, %v1262_v10  ;;  %v1398_v58 = vshrl.u32 %v5040_v25, 16  ;;  %v1296_v28 = vrot.slane %v1295_v18, 4 }
  0xc8   : > { %v1284_v61 = vshll.u32 %v5304_v41, 16  ;;  %v1253_v53 = vsel %vm5094_vm2, %v1248_v44, %v5276_v37  ;;  %v4636_v37 = vld [vmem:[#allocation5 + $0x1e8] sm:$0xff]   ;;  %v1282_v12 = vrot.slane %v1281_v39, 4  ;;  %v1319_v44 = vor.u32 %v1318_v1, %v1315_v2  ;;  %v4639_v18 = vld [vmem:[#allocation5 + $0xa0] sm:$0xff]  }
  0xc9   : > { %v5346_v11 = vcombine.low %v1253_v53, %v1263_v31  ;;  %v1339_v29 = vrot.slane %v6418_v48, 4  ;;  %v1412_v39 = vshll.u32 %v5057_v33, 16  ;;  %v4638_v53 = vld [vmem:[#allocation5 + $0x1e0] sm:$0xff]   ;;  %v1370_v2 = vshll.u32 %v5024_v17, 16  ;;  %v4641_v48 = vld [vmem:[#allocation5 + $0x98] sm:$0xff]  }
  0xca   : > { %v1286_v46 = vrot.slane %v1284_v61, 5  ;;  %v1277_v61 = vsel %vm5094_vm2, %v1272_v49, %v5302_v4  ;;  %v1320_v1 = vrot.slane %v1319_v44, 4  ;;  %v1394_v4 = vshll.u32 %v5040_v25, 16  ;;  %v4640_v44 = vld [vmem:[#allocation5 + $0x1d8] sm:$0xff]  }
  0xcb   : > { %v1366_v49 = vrot.slane %v6422_v51, 5 }
  0xce   : > { %4206 = vmatmul.mubr.bf16.vlgmr.msra.gmra.mxu1 %v5149_v19  ;;  %4254 = vmatmul.mubr.bf16.vlgmr.msra.gmra.mxu0 %v5296_v13  ;;  %v1305_v19 = vor.u32 %v1304_v35, %v5306_v21  ;;  %v6419_v35 = vshll.u32 %v5004_v6, 16  ;;  %v1287_v6 = vsel %vm5094_vm2, %v1282_v12, %v1286_v46  ;;  %v1334_v12 = vrot.slane %v1332_v3, 5 }
  0xcf   : > { %4286 = vmatpush3.bf16.msra.mxu1 %v5169_v55  ;;  %4334 = vmatpush3.bf16.msra.mxu0 %v5171_v56  ;;  %v4637_v55 = vld [vmem:[#allocation5 + $0xa8] sm:$0xff]   ;;  %v1328_v56 = vrot.slane %v1326_v50, 4  ;;  %v5399_v3 = vrot.slane %v1394_v4, 5  ;;  %v4643_v4 = vld [vmem:[#allocation5 + $0x90] sm:$0xff]  }
  0xd0   : > { %4209 = vmatprep.mubr.bf16.mxu1 %v5296_v13  ;;  %4257 = vmatprep.mubr.bf16.mxu0 %v5310_v9  ;;  %v1306_v10 = vrot.slane %v1305_v19, 4  ;;  %v1342_v50 = vrot.slane %v6419_v35, 5  ;;  %v5389_v35 = vld [vmem:[#allocation2 + $0x8c] sm:$0xf] }
  0xd1   : > { %4287 = vmatprep.subr.bf16.mxu1 %v4634_v62  ;;  %4335 = vmatprep.subr.bf16.mxu0 %v4635_v22  ;;  %v1329_v23 = vor.u32 %v1328_v56, %v5336_v20  ;;  %v1363_v56 = vrot.slane %v6421_v15, 4 }
  0xd2   : > { %v1311_v31 = vsel %vm5094_vm2, %v1306_v10, %v1310_v45  ;;  %v1343_v19 = vor.u32 %v1342_v50, %v1339_v29  ;;  %v5385_v10 = vrot.slane %v1370_v2, 5  ;;  %v6423_v45 = vshrl.u32 %v5024_v17, 16 }
  0xd3   : > { %4288 = vmatpush3.bf16.msra.mxu1 %v4634_v62  ;;  %4336 = vmatpush3.bf16.msra.mxu0 %v4635_v22  ;;  %v6420_v62 = vshrl.u32 %v5010_v8, 16  ;;  %v1301_v8 = vsel %vm5094_vm2, %v1296_v28, %v5306_v21  ;;  %v1330_v21 = vrot.slane %v1329_v23, 4  ;;  %v5383_v28 = vld [vmem:[#allocation2 + $0x80] sm:$0xf]  ;;  %v5395_v50 = vcombine.low %v1277_v61, %v1287_v6 }
  0xd4   : > { %4289 = vmatprep.subr.bf16.mxu1 %v4636_v37  ;;  %4337 = vmatprep.subr.bf16.mxu0 %v4637_v55  ;;  %v1376_v29 = vrot.slane %v6423_v45, 4  ;;  %v5397_v23 = vcombine.low %v1301_v8, %v1311_v31  ;;  %v1325_v17 = vsel %vm5094_vm2, %v1320_v1, %v5336_v20  ;;  %v1358_v2 = vrot.slane %v1356_v38, 5  ;;  %v5410_v8 = vld [vmem:[#allocation2 + $0x94] sm:$0xf]  ;;  %v4642_v38 = vld [vmem:[#allocation5 + $0x1d0] sm:$0xff]  }
  0xd5   : > { %v1352_v22 = vrot.slane %v6420_v62, 4  ;;  %v1400_v62 = vrot.slane %v1398_v58, 4  ;;  %v1367_v15 = vor.u32 %v1366_v49, %v1363_v56  ;;  %v1335_v24 = vsel %vm5094_vm2, %v1330_v21, %v1334_v12 }
  0xd6   : > { %4210 = vmatmul.mubr.bf16.gmra.mxu1 %v5310_v9  ;;  %4258 = vmatmul.mubr.bf16.gmra.mxu0 %v5344_v5  ;;  %v1380_v61 = vshll.u32 %v5383_v28, 16  ;;  %v1404_v6 = vshll.u32 %v5389_v35, 16  ;;  %v1422_v25 = vshrl.u32 %v5410_v8, 16  ;;  %v1433_v58 = vshrl.u32 %v5073_v42, 16 }
  0xd7   : > { %4213 = vmatprep.mubr.bf16.mxu1 %v5344_v5  ;;  %4261 = vmatprep.mubr.bf16.mxu0 %v5346_v11  ;;  %v1353_v46 = vor.u32 %v1352_v22, %v5356_v0  ;;  %v1344_v22 = vrot.slane %v1343_v19, 4  ;;  %v1377_v20 = vor.u32 %v1376_v29, %v5385_v10  ;;  %v1401_v31 = vor.u32 %v1400_v62, %v5399_v3  ;;  %v4645_v62 = vld [vmem:[#allocation5 + $0x88] sm:$0xff]  }
  0xd8   : > { %4290 = vmatpush3.bf16.msra.mxu1 %v4636_v37  ;;  %4338 = vmatpush3.bf16.msra.mxu0 %v4637_v55  ;;  %v1387_v37 = vrot.slane %v6424_v16, 4  ;;  %v1390_v55 = vrot.slane %v1388_v34, 5  ;;  %v1418_v19 = vshll.u32 %v5410_v8, 16  ;;  %v5423_v56 = vcombine.low %v1325_v17, %v1335_v24 }
  0xd9   : > { %4291 = vmatprep.subr.bf16.mxu1 %v4638_v53  ;;  %4339 = vmatprep.subr.bf16.mxu0 %v4639_v18  ;;  %v1354_v34 = vrot.slane %v1353_v46, 4  ;;  %v1368_v51 = vrot.slane %v1367_v15, 4  ;;  %v1382_v12 = vrot.slane %v1380_v61, 5  ;;  %v1406_v46 = vrot.slane %v1404_v6, 5  ;;  %v5451_v61 = vld [vmem:[#allocation2 + $0xa4] sm:$0xf] }
  0xda   : > { %v1391_v1 = vor.u32 %v1390_v55, %v1387_v37  ;;  %v1411_v45 = vrot.slane %v1409_v52, 4  ;;  %v1378_v29 = vrot.slane %v1377_v20, 4  ;;  %v1424_v37 = vrot.slane %v1422_v25, 4  ;;  %v4644_v55 = vld [vmem:[#allocation5 + $0x1c8] sm:$0xff]   ;;  %6428 = vst [vmem:[#allocation24_spill] sm:$0xff] %v5451_v61 }
  0xdb   : > { %v1359_v21 = vsel %vm5094_vm2, %v1354_v34, %v1358_v2  ;;  %v1402_v17 = vrot.slane %v1401_v31, 4  ;;  %v5439_v2 = vrot.slane %v1418_v19, 5  ;;  %v5445_v34 = vld [vmem:[#allocation2 + $0xa8] sm:$0xf] }
  0xdc   : > { %4292 = vmatpush3.bf16.msra.mxu1 %v4638_v53  ;;  %4340 = vmatpush3.bf16.msra.mxu0 %v4639_v18  ;;  %v1436_v53 = vshll.u32 %v5073_v42, 16  ;;  %v1446_v18 = vshrl.u32 %v5075_v43, 16  ;;  %v1349_v42 = vsel %vm5094_vm2, %v1344_v22, %v5356_v0  ;;  %v5428_v43 = vld [vmem:[#allocation2 + $0xa0] sm:$0xf]  ;;  %v1392_v16 = vrot.slane %v1391_v1, 4  ;;  %6427 = vst [vmem:[#allocation23_spill] sm:$0xff] %v5445_v34 }
  0xdd   : > { %4293 = vmatprep.subr.bf16.mxu1 %v4640_v44  ;;  %4341 = vmatprep.subr.bf16.mxu0 %v4641_v48  ;;  %6425 = vst [vmem:[#allocation21_spill] sm:$0xff] %v5428_v43  ;;  %v1442_v49 = vshll.u32 %v5428_v43, 16  ;;  %v1414_v0 = vrot.slane %v1412_v39, 5  ;;  %v5437_v22 = vld [vmem:[#allocation2 + $0x98] sm:$0xf]  ;;  %v5441_v15 = vcombine.low %v1349_v42, %v1359_v21  ;;  %v1457_v33 = vshrl.u32 %v5445_v34, 16 }
  0xde   : > { %4214 = vmatmul.mubr.bf16.gmra.mxu1 %v5346_v11  ;;  %4262 = vmatmul.mubr.bf16.gmra.mxu0 %v5395_v50  ;;  %6426 = vst [vmem:[#allocation22_spill] sm:$0xff] %v5437_v22  ;;  %v1448_v24 = vrot.slane %v1446_v18, 4  ;;  %v1373_v39 = vsel %vm5094_vm2, %v1368_v51, %v5385_v10  ;;  %v1383_v6 = vsel %vm5094_vm2, %v1378_v29, %v1382_v12  ;;  %v1428_v20 = vshll.u32 %v5437_v22, 16  ;;  %v4646_v1 = vld [vmem:[#allocation5 + $0x1c0] sm:$0xff]  }
  0xdf   : > { %4217 = vmatprep.mubr.bf16.mxu1 %v5395_v50  ;;  %4265 = vmatprep.mubr.bf16.mxu0 %v5397_v23  ;;  %v5443_v52 = vrot.slane %v1442_v49, 5  ;;  %v1397_v25 = vsel %vm5094_vm2, %v1392_v16, %v5399_v3  ;;  %v1460_v10 = vshll.u32 %v5445_v34, 16  ;;  %v5465_v3 = vld [vmem:[#allocation2 + $0xac] sm:$0xf]  ;;  %v1452_v42 = vshll.u32 %v5451_v61, 16 }
  0xe0   : > { %4294 = vmatpush3.bf16.msra.mxu1 %v4640_v44  ;;  %4342 = vmatpush3.bf16.msra.mxu0 %v4641_v48  ;;  %v1435_v44 = vrot.slane %v1433_v58, 4  ;;  %v1438_v48 = vrot.slane %v1436_v53, 5  ;;  %v1415_v58 = vor.u32 %v1414_v0, %v1411_v45  ;;  %v4647_v53 = vld [vmem:[#allocation5 + $0x80] sm:$0xff]   ;;  %6429 = vst [vmem:[#allocation25_spill] sm:$0xff] %v5465_v3  ;;  %v1470_v31 = vshrl.u32 %v5465_v3, 16 }
  0xe1   : > { %4295 = vmatprep.subr.bf16.mxu1 %v4642_v38  ;;  %4343 = vmatprep.subr.bf16.mxu0 %v4643_v4  ;;  %v1449_v19 = vor.u32 %v1448_v24, %v5443_v52  ;;  %v1466_v51 = vshll.u32 %v5465_v3, 16  ;;  %v5473_v49 = vld [vmem:[#allocation2 + $0xb4] sm:$0xf]  ;;  %v5481_v16 = vcombine.low %v1373_v39, %v1383_v6  ;;  %v1459_v34 = vrot.slane %v1457_v33, 4  ;;  %v5489_v3 = vld [vmem:[#allocation2 + $0xb0] sm:$0xf] }
  0xe2   : > { %v1439_v18 = vor.u32 %v1438_v48, %v1435_v44  ;;  %6430 = vst [vmem:[#allocation26_spill] sm:$0xff] %v5473_v49  ;;  %v1481_v21 = vshrl.u32 %v5473_v49, 16  ;;  %v1484_v12 = vshll.u32 %v5473_v49, 16  ;;  %v5485_v44 = vld [vmem:[#allocation5 + $0x178] sm:$0xff]   ;;  %v1462_v61 = vrot.slane %v1460_v10, 5  ;;  %6432 = vst [vmem:[#allocation28_spill] sm:$0xff] %v5489_v3 }
  0xe3   : > { %v5487_v48 = vld [vmem:[#allocation5 + $0x238] sm:$0xff]   ;;  %v1468_v39 = vrot.slane %v1466_v51, 5  ;;  %v1472_v6 = vrot.slane %v1470_v31, 4  ;;  %v5495_v33 = vld [vmem:[#allocation2 + $0xc4] sm:$0xf] }
  0xe4   : > { %4296 = vmatpush3.bf16.msra.mxu1 %v4642_v38  ;;  %4344 = vmatpush3.bf16.msra.mxu0 %v4643_v4  ;;  %v1407_v38 = vsel %vm5094_vm2, %v1402_v17, %v1406_v46  ;;  %v1425_v4 = vor.u32 %v1424_v37, %v5439_v2  ;;  %v5477_v46 = vld [vmem:[#allocation2 + $0xb8] sm:$0xf]  ;;  %v1416_v37 = vrot.slane %v1415_v58, 4  ;;  %v1430_v17 = vrot.slane %v1428_v20, 5 }
  0xe5   : > { %4297 = vmatprep.subr.bf16.mxu1 %v4644_v55  ;;  %4345 = vmatprep.subr.bf16.mxu0 %v4645_v62  ;;  %6431 = vst [vmem:[#allocation27_spill] sm:$0xff] %v5477_v46  ;;  %v1494_v45 = vshrl.u32 %v5477_v46, 16  ;;  %v1490_v29 = vshll.u32 %v5477_v46, 16  ;;  %v5483_v0 = vcombine.low %v1397_v25, %v1407_v38  ;;  %v1440_v49 = vrot.slane %v1439_v18, 4  ;;  %v5491_v46 = vld [vmem:[#allocation2 + $0xc0] sm:$0xf] }
  0xe6   : > { %4218 = vmatmul.mubr.bf16.gmra.mxu1 %v5397_v23  ;;  %4266 = vmatmul.mubr.bf16.gmra.mxu0 %v5423_v56  ;;  %v1426_v24 = vrot.slane %v1425_v4, 4  ;;  %v1483_v25 = vrot.slane %v1481_v21, 4  ;;  %v1486_v38 = vrot.slane %v1484_v12, 5  ;;  %6433 = vst [vmem:[#allocation29_spill] sm:$0xff] %v5491_v46  ;;  %v1827_v43 = vshrl.u32 %v5491_v46, 16 }
  0xe7   : > { %4221 = vmatprep.mubr.bf16.mxu1 %v5423_v56  ;;  %4269 = vmatprep.mubr.bf16.mxu0 %v5441_v15  ;;  %v1492_v58 = vrot.slane %v1490_v29, 5  ;;  %v1496_v20 = vrot.slane %v1494_v45, 4  ;;  %v1830_v4 = vshll.u32 %v5491_v46, 16  ;;  %v1840_v10 = vshrl.u32 %v5495_v33, 16  ;;  %v5498_v18 = vld [vmem:[#allocation2 + $0xbc] sm:$0xf] }
  0xe8   : > { %4298 = vmatpush3.bf16.msra.mxu1 %v4644_v55  ;;  %4346 = vmatpush3.bf16.msra.mxu0 %v4645_v62  ;;  %v1450_v55 = vrot.slane %v1449_v19, 4  ;;  %v1454_v62 = vrot.slane %v1452_v42, 5  ;;  %v1463_v31 = vor.u32 %v1462_v61, %v1459_v34  ;;  %v1476_v19 = vshll.u32 %v5489_v3, 16 }
  0xe9   : > { %4299 = vmatprep.subr.bf16.mxu1 %v4646_v1  ;;  %4347 = vmatprep.subr.bf16.mxu0 %v4647_v53  ;;  %v1445_v42 = vsel %vm5094_vm2, %v1440_v49, %v5443_v52  ;;  %v1473_v21 = vor.u32 %v1472_v6, %v1468_v39  ;;  %v1487_v12 = vor.u32 %v1486_v38, %v1483_v25  ;;  %v1500_v34 = vshll.u32 %v5498_v18, 16  ;;  %v5523_v6 = vld [vmem:[#allocation2 + $0xc8] sm:$0xf] }
  0xea   : > { %v1455_v51 = vsel %vm5094_vm2, %v1450_v55, %v1454_v62  ;;  %v1497_v45 = vor.u32 %v1496_v20, %v1492_v58  ;;  %v1832_v3 = vrot.slane %v1830_v4, 5  ;;  %v1842_v49 = vrot.slane %v1840_v10, 4 }
  0xeb   : > { %v5521_v29 = vcombine.low %v1445_v42, %v1455_v51  ;;  %v1474_v46 = vrot.slane %v1473_v21, 4  ;;  %v1488_v22 = vrot.slane %v1487_v12, 4  ;;  %v1502_v62 = vrot.slane %v1500_v34, 5 }
  0xec   : > { %4300 = vmatpush3.bf16.msra.mxu1 %v4646_v1  ;;  %4348 = vmatpush3.bf16.msra.mxu0 %v4647_v53  ;;  %v1421_v1 = vsel %vm5094_vm2, %v1416_v37, %v5439_v2  ;;  %v1431_v53 = vsel %vm5094_vm2, %v1426_v24, %v1430_v17  ;;  %v1836_v2 = vshll.u32 %v5495_v33, 16  ;;  %v1464_v37 = vrot.slane %v1463_v31, 4 }
  0xed   : > { %4381 = vmatprep.subr.bf16.mxu1 %v5485_v44  ;;  %4429 = vmatprep.subr.bf16.mxu0 %v5487_v48  ;;  %v5519_v61 = vcombine.low %v1421_v1, %v1431_v53  ;;  %v1478_v17 = vrot.slane %v1476_v19, 5  ;;  %v1829_v24 = vrot.slane %v1827_v43, 4  ;;  %v1498_v55 = vrot.slane %v1497_v45, 4  ;;  %v4673_v53 = vld [vmem:[#allocation2 + $0x4] sm:$0xf] }
  0xee   : > { %4222 = vmatmul.mubr.bf16.gmra.mxu1 %v5441_v15  ;;  %4270 = vmatmul.mubr.bf16.gmra.mxu0 %v5481_v16  ;;  %v1838_v52 = vrot.slane %v1836_v2, 5  ;;  %v1469_v25 = vsel %vm5094_vm2, %v1464_v37, %v1468_v39  ;;  %v1846_v4 = vshll.u32 %v5523_v6, 16  ;;  %v1493_v10 = vsel %vm5094_vm2, %v1488_v22, %v1492_v58  ;;  %v5546_v22 = vld [vmem:[#allocation2 + $0xd4] sm:$0xf] }
  0xef   : > { %4225 = vmatprep.mubr.bf16.mxu1 %v5481_v16  ;;  %4273 = vmatprep.mubr.bf16.mxu0 %v5483_v0  ;;  %v1479_v43 = vsel %vm5094_vm2, %v1474_v46, %v1478_v17  ;;  %v1833_v38 = vor.u32 %v1832_v3, %v1829_v24  ;;  %v1503_v1 = vsel %vm5094_vm2, %v1498_v55, %v1502_v62  ;;  %v2419_v31 = vrot.slane %v4673_v53, 5  ;;  %v4674_v46 = vld [vmem:[#allocation2] sm:$0xf] }
  0xf0   : > { %v1843_v20 = vor.u32 %v1842_v49, %v1838_v52  ;;  %v5538_v39 = vcombine.low %v1469_v25, %v1479_v43  ;;  %v5540_v19 = vcombine.low %v1493_v10, %v1503_v1  ;;  %v1848_v21 = vrot.slane %v1846_v4, 5  ;;  %v4675_v49 = vld [vmem:[#allocation2 + $0x1c] sm:$0xf]  ;;  %v4676_v4 = vld [vmem:[#allocation2 + $0x18] sm:$0xf] }
  0xf1   : > { %v1834_v42 = vrot.slane %v1833_v38, 4  ;;  %v3760_v3 = vrot.slane %v4674_v46, 9  ;;  %v2421_v2 = vrot.slane %v2419_v31, 4  ;;  %v2422_v12 = vrot.slane %v5200_v47, 5 }
  0xf2   : > { %v1844_v51 = vrot.slane %v1843_v20, 4  ;;  %v3124_v45 = vrot.slane %v5246_v14, 5  ;;  %v3810_v58 = vrot.slane %v5244_v54, 9  ;;  %v3127_v37 = vrot.slane %v5546_v22, 5 }
  0xf3   : > { %v1839_v34 = vsel %vm5094_vm2, %v1834_v42, %v1838_v52  ;;  %v2420_v17 = vsel %vm5238_vm5, %v3760_v3, %v2419_v31  ;;  %v2423_v24 = vsel %vm5238_vm5, %v2421_v2, %v2422_v12  ;;  %v2433_v55 = vrot.slane %v4675_v49, 5  ;;  %v4677_v31 = vld [vmem:[#allocation2 + $0x28] sm:$0xf]  ;;  %v4679_v2 = vld [vmem:[#allocation2 + $0x24] sm:$0xf] }
  0xf4   : > { %v1849_v47 = vsel %vm5094_vm2, %v1844_v51, %v1848_v21  ;;  %v3126_v62 = vrot.slane %v3124_v45, 4  ;;  %v3776_v43 = vcombine.low %v2420_v17, %v2423_v24  ;;  %v5564_v52 = vsel %vm5238_vm5, %v3810_v58, %v3124_v45  ;;  %v4678_v51 = vld [vmem:[#allocation2 + $0x34] sm:$0xf]  ;;  %v4650_v17 = vld [vmem:[#allocation5 + $0x170] sm:$0xff]  }
  0xf5   : > { %v5560_v25 = vcombine.low %v1839_v34, %v1849_v47  ;;  %v3762_v10 = vrot.slane %v4676_v4, 9  ;;  %v2435_v1 = vrot.slane %v2433_v55, 4  ;;  %v2436_v53 = vrot.slane %v5222_v30, 5  ;;  %v4680_v34 = vld [vmem:[#allocation2 + $0x30] sm:$0xf]  ;;  %v4651_v24 = vld [vmem:[#allocation5 + $0x230] sm:$0xff]  }
  0xf6   : > { %4226 = vmatmul.mubr.bf16.gmra.mxu1 %v5483_v0  ;;  %4274 = vmatmul.mubr.bf16.gmra.mxu0 %v5519_v61  ;;  %v5568_v38 = vsel %vm5238_vm5, %v3126_v62, %v3127_v37  ;;  %v2440_v42 = vrot.slane %v4677_v31, 5  ;;  %v2447_v21 = vrot.slane %v4678_v51, 5  ;;  %v3763_v12 = vrot.slane %v4679_v2, 9  ;;  %v4684_v51 = vld [vmem:[#allocation2 + $0x48] sm:$0xf]  ;;  %v4654_v2 = vld [vmem:[#allocation5 + $0x160] sm:$0xff]  }
  0xf7   : > { %4229 = vmatprep.mubr.bf16.mxu1 %v5519_v61  ;;  %4277 = vmatprep.mubr.bf16.mxu0 %v5521_v29  ;;  %v2434_v46 = vsel %vm5238_vm5, %v3762_v10, %v2433_v55  ;;  %v2437_v3 = vsel %vm5238_vm5, %v2435_v1, %v2436_v53  ;;  %v2443_v45 = vrot.slane %v5227_v40, 5  ;;  %v2450_v37 = vrot.slane %v5270_v32, 5  ;;  %v4681_v55 = vld [vmem:[#allocation2 + $0x40] sm:$0xf] }
  0xf8   : > { %v2442_v30 = vrot.slane %v2440_v42, 4  ;;  %v5581_v58 = vcombine.low %v2434_v46, %v2437_v3  ;;  %v2449_v47 = vrot.slane %v2447_v21, 4  ;;  %v2441_v40 = vsel %vm5238_vm5, %v3763_v12, %v2440_v42  ;;  %v4655_v12 = vld [vmem:[#allocation5 + $0x220] sm:$0xff]  }
  0xf9   : > { %v2454_v62 = vrot.slane %v4681_v55, 5  ;;  %v2457_v42 = vrot.slane %v5274_v63, 5  ;;  %v2464_v3 = vrot.slane %v5304_v41, 5 }
  0xfa   : > { %v2444_v49 = vsel %vm5238_vm5, %v2442_v30, %v2443_v45  ;;  %v4685_v45 = vld [vmem:[#allocation2 + $0x58] sm:$0xf] }
  0xfb   : > { %v5598_v10 = vcombine.low %v2441_v40, %v2444_v49  ;;  %v2456_v31 = vrot.slane %v2454_v62, 4  ;;  %v4687_v40 = vld [vmem:[#allocation2 + $0x54] sm:$0xf] }
  0xfc   : > { %v3767_v49 = vrot.slane %v4687_v40, 9  ;;  %v4693_v40 = vld [vmem:[#allocation2 + $0x84] sm:$0xf] }
  0xfd   : > { %v2458_v30 = vsel %vm5238_vm5, %v2456_v31, %v2457_v42  ;;  %v4689_v31 = vld [vmem:[#allocation2 + $0x7c] sm:$0xf] }
  0xfe   : > { %4230 = vmatmul.mubr.bf16.gmra.mxu1 %v5521_v29  ;;  %4278 = vmatmul.mubr.bf16.gmra.mxu0 %v5538_v39  ;;  %v4660_v42 = vld [vmem:[#allocation5 + $0x148] sm:$0xff]  }
  0xff   : > { %4233 = vmatprep.mubr.bf16.mxu1 %v5538_v39  ;;  %4281 = vmatprep.mubr.bf16.mxu0 %v5540_v19 }
 0x106   : > { %4234 = vmatmul.mubr.bf16.gmra.mxu1 %v5540_v19  ;;  %4282 = vmatmul.mubr.bf16.gmra.mxu0 %v5560_v25 }
 0x107   : > { %4301 = vmatprep.mubr.bf16.mxu1 %v5296_v13  ;;  %4349 = vmatprep.mubr.bf16.mxu0 %v3776_v43  ;;  %v3764_v13 = vrot.slane %v4680_v34, 9  ;;  %v4682_v43 = vld [vmem:[#allocation2 + $0x4c] sm:$0xf]  ;;  %v2468_v34 = vrot.slane %v4685_v45, 5 }
 0x108   : > { %v2461_v4 = vrot.slane %v4682_v43, 5  ;;  %v4658_v43 = vld [vmem:[#allocation5 + $0x150] sm:$0xff]  }
 0x109   : > { %v2448_v32 = vsel %vm5238_vm5, %v3764_v13, %v2447_v21  ;;  %v3766_v21 = vrot.slane %v4684_v51, 9  ;;  %v4686_v13 = vld [vmem:[#allocation2 + $0x64] sm:$0xf]  ;;  %v2470_v55 = vrot.slane %v2468_v34, 4  ;;  %v4661_v51 = vld [vmem:[#allocation5 + $0x208] sm:$0xff]  }
 0x10a   : > { %v2463_v46 = vrot.slane %v2461_v4, 4 }
 0x10b   : > { %v2462_v41 = vsel %vm5238_vm5, %v3766_v21, %v2461_v4  ;;  %v4659_v4 = vld [vmem:[#allocation5 + $0x210] sm:$0xff]  }
 0x10e   : > { %4302 = vmatmul.mubr.bf16.vlgmr.msra.gmra.mxu1 %v5310_v9  ;;  %4350 = vmatmul.mubr.bf16.vlgmr.msra.gmra.mxu0 %v5264_v27  ;;  %v2451_v9 = vsel %vm5238_vm5, %v2449_v47, %v2450_v37  ;;  %v4656_v47 = vld [vmem:[#allocation5 + $0x158] sm:$0xff]  }
 0x10f   : > { %4382 = vmatpush3.bf16.msra.mxu1 %v5485_v44  ;;  %4430 = vmatpush3.bf16.msra.mxu0 %v5487_v48  ;;  %v4652_v44 = vld [vmem:[#allocation5 + $0x168] sm:$0xff]   ;;  %v5600_v1 = vcombine.low %v2448_v32, %v2451_v9  ;;  %v4657_v37 = vld [vmem:[#allocation5 + $0x218] sm:$0xff]   ;;  %v4688_v32 = vld [vmem:[#allocation2 + $0x60] sm:$0xf] }
 0x110   : > { %4305 = vmatprep.mubr.bf16.mxu1 %v5344_v5  ;;  %4353 = vmatprep.mubr.bf16.mxu0 %v5581_v58  ;;  %v4653_v48 = vld [vmem:[#allocation5 + $0x228] sm:$0xff]   ;;  %v3768_v9 = vrot.slane %v4688_v32, 9 }
 0x111   : > { %4383 = vmatprep.subr.bf16.mxu1 %v4650_v17  ;;  %4431 = vmatprep.subr.bf16.mxu0 %v4651_v24  ;;  %v4683_v5 = vld [vmem:[#allocation2 + $0x3c] sm:$0xf] }
 0x112   : > { %v3765_v53 = vrot.slane %v4683_v5, 9 }
 0x113   : > { %4384 = vmatpush3.bf16.msra.mxu1 %v4650_v17  ;;  %4432 = vmatpush3.bf16.msra.mxu0 %v4651_v24 }
 0x114   : > { %4385 = vmatprep.subr.bf16.mxu1 %v4652_v44  ;;  %4433 = vmatprep.subr.bf16.mxu0 %v4653_v48  ;;  %v2455_v63 = vsel %vm5238_vm5, %v3765_v53, %v2454_v62  ;;  %v2471_v62 = vrot.slane %v5312_v36, 5  ;;  %v2469_v36 = vsel %vm5238_vm5, %v3767_v49, %v2468_v34  ;;  %v2492_v34 = vrot.slane %v5383_v28, 5 }
 0x115   : > { %v5616_v17 = vcombine.low %v2455_v63, %v2458_v30  ;;  %v4691_v63 = vld [vmem:[#allocation2 + $0x78] sm:$0xf]  ;;  %v3771_v49 = vrot.slane %v4693_v40, 9 }
 0x116   : > { %4306 = vmatmul.mubr.bf16.gmra.mxu1 %v5346_v11  ;;  %4354 = vmatmul.mubr.bf16.gmra.mxu0 %v5598_v10  ;;  %v2465_v11 = vsel %vm5238_vm5, %v2463_v46, %v2464_v3  ;;  %v2472_v5 = vsel %vm5238_vm5, %v2470_v55, %v2471_v62  ;;  %v4690_v3 = vld [vmem:[#allocation2 + $0x6c] sm:$0xf]  ;;  %v3770_v30 = vrot.slane %v4691_v63, 9  ;;  %v2499_v62 = vrot.slane %v5389_v35, 5  ;;  %v4695_v63 = vld [vmem:[#allocation2 + $0x9c] sm:$0xf] }
 0x117   : > { %4309 = vmatprep.mubr.bf16.mxu1 %v5395_v50  ;;  %4357 = vmatprep.mubr.bf16.mxu0 %v5600_v1  ;;  %v2475_v50 = vrot.slane %v4686_v13, 5  ;;  %v5618_v24 = vcombine.low %v2462_v41, %v2465_v11  ;;  %v5635_v21 = vcombine.low %v2469_v36, %v2472_v5  ;;  %v4662_v41 = vld [vmem:[#allocation5 + $0x140] sm:$0xff]   ;;  %v4692_v13 = vld [vmem:[#allocation2 + $0x88] sm:$0xf]  ;;  %v2113_v5 = vshrl.u32 %v5244_v54, 16 }
 0x118   : > { %4386 = vmatpush3.bf16.msra.mxu1 %v4652_v44  ;;  %4434 = vmatpush3.bf16.msra.mxu0 %v4653_v48  ;;  %v2478_v48 = vrot.slane %v5342_v26, 5  ;;  %v2482_v26 = vrot.slane %v5338_v7, 5  ;;  %v3769_v7 = vrot.slane %v4690_v3, 9  ;;  %v4663_v11 = vld [vmem:[#allocation5 + $0x200] sm:$0xff]  }
 0x119   : > { %4387 = vmatprep.subr.bf16.mxu1 %v4654_v2  ;;  %4435 = vmatprep.subr.bf16.mxu0 %v4655_v12  ;;  %v2477_v44 = vrot.slane %v2475_v50, 4  ;;  %v2476_v53 = vsel %vm5238_vm5, %v3768_v9, %v2475_v50  ;;  %v2496_v50 = vrot.slane %v4692_v13, 5  ;;  %v4694_v9 = vld [vmem:[#allocation2 + $0x90] sm:$0xf] }
 0x11b   : > { %v2498_v55 = vrot.slane %v2496_v50, 4  ;;  %v2497_v35 = vsel %vm5238_vm5, %v3771_v49, %v2496_v50  ;;  %v6439_v50 = vld [vmem:[#allocation28_spill] sm:$0xff] }
 0x11c   : > { %4388 = vmatpush3.bf16.msra.mxu1 %v4654_v2  ;;  %4436 = vmatpush3.bf16.msra.mxu0 %v4655_v12  ;;  %v2484_v2 = vrot.slane %v2482_v26, 4  ;;  %v2485_v12 = vrot.slane %v5348_v59, 5  ;;  %v2483_v59 = vsel %vm5238_vm5, %v3769_v7, %v2482_v26  ;;  %v2116_v26 = vshll.u32 %v5244_v54, 16  ;;  %v6436_v54 = vld [vmem:[#allocation25_spill] sm:$0xff] }
 0x11d   : > { %4389 = vmatprep.subr.bf16.mxu1 %v4656_v47  ;;  %4437 = vmatprep.subr.bf16.mxu0 %v4657_v37 }
 0x11e   : > { %4310 = vmatmul.mubr.bf16.gmra.mxu1 %v5397_v23  ;;  %4358 = vmatmul.mubr.bf16.gmra.mxu0 %v5616_v17  ;;  %v2479_v23 = vsel %vm5238_vm5, %v2477_v44, %v2478_v48  ;;  %v2486_v28 = vsel %vm5238_vm5, %v2484_v2, %v2485_v12  ;;  %v3772_v44 = vrot.slane %v4694_v9, 9 }
 0x11f   : > { %4313 = vmatprep.mubr.bf16.mxu1 %v5423_v56  ;;  %4361 = vmatprep.mubr.bf16.mxu0 %v5618_v24  ;;  %v2489_v56 = vrot.slane %v4689_v31, 5  ;;  %v5637_v46 = vcombine.low %v2476_v53, %v2479_v23  ;;  %v2500_v31 = vsel %vm5238_vm5, %v2498_v55, %v2499_v62 }
 0x120   : > { %4390 = vmatpush3.bf16.msra.mxu1 %v4656_v47  ;;  %4438 = vmatpush3.bf16.msra.mxu0 %v4657_v37  ;;  %v2503_v37 = vrot.slane %v5410_v8, 5  ;;  %v6435_v8 = vld [vmem:[#allocation21_spill] sm:$0xff]  ;;  %v5686_v12 = vcombine.low %v2497_v35, %v2500_v31 }
 0x121   : > { %4391 = vmatprep.subr.bf16.mxu1 %v4658_v43  ;;  %4439 = vmatprep.subr.bf16.mxu0 %v4659_v4  ;;  %v2491_v45 = vrot.slane %v2489_v56, 4  ;;  %v2490_v47 = vsel %vm5238_vm5, %v3770_v30, %v2489_v56  ;;  %v2510_v36 = vrot.slane %v6435_v8, 5  ;;  %v2126_v56 = vshrl.u32 %v5246_v14, 16 }
 0x122   : > { %v2505_v48 = vrot.slane %v2503_v37, 4  ;;  %v2504_v7 = vsel %vm5238_vm5, %v3772_v44, %v2503_v37 }
 0x123   : > { %v2512_v30 = vrot.slane %v2510_v36, 4  ;;  %v2128_v49 = vrot.slane %v2126_v56, 4 }
 0x124   : > { %4392 = vmatpush3.bf16.msra.mxu1 %v4658_v43  ;;  %4440 = vmatpush3.bf16.msra.mxu0 %v4659_v4  ;;  %v6434_v43 = vld [vmem:[#allocation22_spill] sm:$0xff] }
 0x125   : > { %4393 = vmatprep.subr.bf16.mxu1 %v4660_v42  ;;  %4441 = vmatprep.subr.bf16.mxu0 %v4661_v51  ;;  %v2506_v4 = vrot.slane %v6434_v43, 5 }
 0x126   : > { %4314 = vmatmul.mubr.bf16.gmra.mxu1 %v5441_v15  ;;  %4362 = vmatmul.mubr.bf16.gmra.mxu0 %v5635_v21  ;;  %v2493_v15 = vsel %vm5238_vm5, %v2491_v45, %v2492_v34  ;;  %v6437_v45 = vld [vmem:[#allocation24_spill] sm:$0xff] }
 0x127   : > { %4317 = vmatprep.mubr.bf16.mxu1 %v5481_v16  ;;  %4365 = vmatprep.mubr.bf16.mxu0 %v5637_v46  ;;  %v5654_v16 = vcombine.low %v2483_v59, %v2486_v28  ;;  %v5657_v32 = vcombine.low %v2490_v47, %v2493_v15  ;;  %v2507_v2 = vsel %vm5238_vm5, %v2505_v48, %v2506_v4  ;;  %v2513_v34 = vrot.slane %v6437_v45, 5 }
 0x128   : > { %4394 = vmatpush3.bf16.msra.mxu1 %v4660_v42  ;;  %4442 = vmatpush3.bf16.msra.mxu0 %v4661_v51  ;;  %v2517_v42 = vrot.slane %v6436_v54, 5  ;;  %v2122_v51 = vshll.u32 %v5246_v14, 16  ;;  %v2520_v59 = vrot.slane %v6439_v50, 5  ;;  %v2115_v28 = vrot.slane %v2113_v5, 4 }
 0x129   : > { %4395 = vmatprep.subr.bf16.mxu1 %v4662_v41  ;;  %4443 = vmatprep.subr.bf16.mxu0 %v4663_v11  ;;  %v2118_v47 = vrot.slane %v2116_v26, 5  ;;  %v5695_v15 = vcombine.low %v2504_v7, %v2507_v2  ;;  %v2514_v43 = vsel %vm5238_vm5, %v2512_v30, %v2513_v34  ;;  %v2132_v26 = vshll.u32 %v5546_v22, 16  ;;  %v6441_v2 = vld [vmem:[#allocation26_spill] sm:$0xff] }
 0x12a   : > { %v2519_v37 = vrot.slane %v2517_v42, 4  ;;  %v2124_v40 = vrot.slane %v2122_v51, 5  ;;  %v2527_v45 = vrot.slane %v5498_v18, 5 }
 0x12b   : > { %v2119_v8 = vor.u32 %v2118_v47, %v2115_v28  ;;  %v2134_v30 = vrot.slane %v2132_v26, 5 }
 0x12c   : > { %4396 = vmatpush3.bf16.msra.mxu1 %v4662_v41  ;;  %4444 = vmatpush3.bf16.msra.mxu0 %v4663_v11  ;;  %v6438_v11 = vld [vmem:[#allocation23_spill] sm:$0xff]  ;;  %v2129_v5 = vor.u32 %v2128_v49, %v2124_v40 }
 0x12d   : > { %v3774_v13 = vrot.slane %v6438_v11, 9  ;;  %v2120_v7 = vrot.slane %v2119_v8, 4 }
 0x12e   : > { %v5663_v53 = vpop.f32.mrf.mxu0  ;;  %v5665_v23 = vpop.f32.mrf.mxu1  ;;  %4318 = vmatmul.mubr.bf16.gmra.mxu1 %v5483_v0  ;;  %4366 = vmatmul.mubr.bf16.gmra.mxu0 %v5654_v16 }
 0x12f   : > { %4321 = vmatprep.mubr.bf16.mxu1 %v5519_v61  ;;  %4369 = vmatprep.mubr.bf16.mxu0 %v5657_v32  ;;  %v3773_v61 = vrot.slane %v4695_v63, 9  ;;  %v2518_v4 = vsel %vm5238_vm5, %v3774_v13, %v2517_v42  ;;  %v3775_v63 = vrot.slane %v6441_v2, 9  ;;  %v2125_v18 = vsel %vm5094_vm2, %v2120_v7, %v2124_v40 }
 0x130   : > { %v5678_v3 = vpop.f32.mrf.mxu0  ;;  %v5680_v0 = vpop.f32.mrf.mxu1 }
 0x131   : > { %v2511_v9 = vsel %vm5238_vm5, %v3773_v61, %v2510_v36  ;;  %v2521_v36 = vsel %vm5238_vm5, %v2519_v37, %v2520_v59  ;;  %v2130_v61 = vrot.slane %v2129_v5, 4 }
 0x132   : > { %v5689_v41 = vpop.f32.mrf.mxu0  ;;  %v5691_v14 = vpop.f32.mrf.mxu1  ;;  %v5727_v51 = vcombine.low %v2511_v9, %v2514_v43 }
 0x133   : > { %v2135_v28 = vsel %vm5094_vm2, %v2130_v61, %v2134_v30 }
 0x134   : > { %v5697_v55 = vpop.f32.mrf.mxu0  ;;  %v5699_v62 = vpop.f32.mrf.mxu1 }
 0x136   : > { %v5703_v44 = vpop.f32.mrf.mxu0  ;;  %v5705_v48 = vpop.f32.mrf.mxu1  ;;  %4322 = vmatmul.mubr.bf16.gmra.mxu1 %v5521_v29  ;;  %4370 = vmatmul.mubr.bf16.gmra.mxu0 %v5686_v12  ;;  %v6440_v29 = vld [vmem:[#allocation27_spill] sm:$0xff] }
 0x137   : > { %4325 = vmatprep.mubr.bf16.mxu1 %v5538_v39  ;;  %4373 = vmatprep.mubr.bf16.mxu0 %v5695_v15  ;;  %v2524_v35 = vrot.slane %v6440_v29, 5  ;;  %v5729_v39 = vcombine.low %v2518_v4, %v2521_v36 }
 0x138   : > { %v5719_v31 = vpop.f32.mrf.mxu0  ;;  %v5721_v56 = vpop.f32.mrf.mxu1 }
 0x139   : > { %v2526_v22 = vrot.slane %v2524_v35, 4  ;;  %v2525_v59 = vsel %vm5238_vm5, %v3775_v63, %v2524_v35 }
 0x13a   : > { %v5723_v54 = vpop.f32.mrf.mxu0  ;;  %v5725_v42 = vpop.f32.mrf.mxu1 }
 0x13b   : > { %v2528_v47 = vsel %vm5238_vm5, %v2526_v22, %v2527_v45 }
 0x13c   : > { %v5733_v34 = vpop.f32.mrf.mxu0  ;;  %v5735_v11 = vpop.f32.mrf.mxu1  ;;  %v5761_v43 = vcombine.low %v2525_v59, %v2528_v47 }
 0x13e   : > { %v5737_v13 = vpop.f32.mrf.mxu0  ;;  %v5739_v50 = vpop.f32.mrf.mxu1  ;;  %4326 = vmatmul.mubr.bf16.gmra.mxu1 %v5540_v19  ;;  %4374 = vmatmul.mubr.bf16.gmra.mxu0 %v5727_v51 }
 0x13f   : > { %4329 = vmatprep.mubr.bf16.mxu1 %v5560_v25  ;;  %4377 = vmatprep.mubr.bf16.mxu0 %v5729_v39  ;;  %v3751_v25 = vcombine.low %v2125_v18, %v2135_v28 }
 0x140   : > { %v5753_v37 = vpop.f32.mrf.mxu0  ;;  %v5755_v19 = vpop.f32.mrf.mxu1 }
 0x142   : > { %v5757_v49 = vpop.f32.mrf.mxu0  ;;  %v5759_v9 = vpop.f32.mrf.mxu1 }
 0x144   : > { %v5763_v4 = vpop.f32.mrf.mxu0  ;;  %v5765_v40 = vpop.f32.mrf.mxu1 }
 0x146   : > { %v5767_v57 = vpop.f32.mrf.mxu0  ;;  %v5769_v8 = vpop.f32.mrf.mxu1  ;;  %4330 = vmatmul.mubr.bf16.gmra.mxu1 %v3751_v25  ;;  %4378 = vmatmul.mubr.bf16.gmra.mxu0 %v5761_v43 }
 0x147   : > { %4397 = vmatprep.mubr.bf16.mxu1 %v5264_v27  ;;  %4445 = vmatprep.mubr.bf16.mxu0 %v5581_v58 }
 0x148   : > { %v5774_v36 = vpop.f32.mrf.mxu0  ;;  %v5776_v5 = vpop.f32.mrf.mxu1 }
 0x14a   : > { %v5778_v26 = vpop.f32.mrf.mxu0  ;;  %v5780_v29 = vpop.f32.mrf.mxu1 }
 0x14c   : > { %v5782_v35 = vpop.f32.mrf.mxu0  ;;  %v5784_v7 = vpop.f32.mrf.mxu1 }
 0x14e   : > { %v4111_v2 = vpop.f32.mrf.mxu1  ;;  %v4159_v63 = vpop.f32.mrf.mxu0  ;;  %4398 = vmatmul.mubr.bf16.vlgmr.msra.gmra.mxu1 %v5581_v58  ;;  %4446 = vmatmul.mubr.bf16.vlgmr.msra.gmra.mxu0 %v5598_v10 }
 0x14f   : > { %v735_v27 = vadd.f32 %v4111_v2, %v5663_v53  ;;  %4401 = vmatprep.mubr.bf16.mxu1 %v5598_v10  ;;  %4449 = vmatprep.mubr.bf16.mxu0 %v5600_v1 }
 0x150   : > { %v726_v61 = vpop.f32.mrf.mxu1  ;;  %v958_v30 = vpop.f32.mrf.mxu0 }
 0x151   : > { %v5791_v22 = vadd.f32 %v4159_v63, %v735_v27  ;;  %v727_v45 = vadd.f32 %v726_v61, %v5678_v3 }
 0x152   : > { %v4112_v59 = vpop.f32.mrf.mxu1  ;;  %v4160_v18 = vpop.f32.mrf.mxu0 }
 0x153   : > { %v5794_v28 = vadd.f32 %v958_v30, %v727_v45  ;;  %v738_v58 = vadd.f32 %v4112_v59, %v5689_v41 }
 0x154   : > { %v729_v47 = vpop.f32.mrf.mxu1  ;;  %v961_v25 = vpop.f32.mrf.mxu0 }
 0x155   : > { %v5797_v20 = vadd.f32 %v4160_v18, %v738_v58  ;;  %v730_v10 = vadd.f32 %v729_v47, %v5697_v55 }
 0x156   : > { %v4115_v53 = vpop.f32.mrf.mxu1  ;;  %v4163_v2 = vpop.f32.mrf.mxu0  ;;  %4402 = vmatmul.mubr.bf16.gmra.mxu1 %v5600_v1  ;;  %4450 = vmatmul.mubr.bf16.gmra.mxu0 %v5616_v17 }
 0x157   : > { %v5802_v63 = vadd.f32 %v961_v25, %v730_v10  ;;  %v751_v3 = vadd.f32 %v4115_v53, %v5703_v44  ;;  %4405 = vmatprep.mubr.bf16.mxu1 %v5616_v17  ;;  %4453 = vmatprep.mubr.bf16.mxu0 %v5618_v24 }
 0x158   : > { %v742_v41 = vpop.f32.mrf.mxu1  ;;  %v974_v27 = vpop.f32.mrf.mxu0 }
 0x159   : > { %v5807_v61 = vadd.f32 %v4163_v2, %v751_v3  ;;  %v743_v55 = vadd.f32 %v742_v41, %v5719_v31 }
 0x15a   : > { %v4116_v30 = vpop.f32.mrf.mxu1  ;;  %v4164_v45 = vpop.f32.mrf.mxu0 }
 0x15b   : > { %v5810_v59 = vadd.f32 %v974_v27, %v743_v55  ;;  %v754_v1 = vadd.f32 %v4116_v30, %v5723_v54 }
 0x15c   : > { %v745_v18 = vpop.f32.mrf.mxu1  ;;  %v977_v58 = vpop.f32.mrf.mxu0 }
 0x15d   : > { %v5813_v47 = vadd.f32 %v4164_v45, %v754_v1  ;;  %v746_v17 = vadd.f32 %v745_v18, %v5733_v34 }
 0x15e   : > { %v4119_v44 = vpop.f32.mrf.mxu1  ;;  %v4167_v25 = vpop.f32.mrf.mxu0  ;;  %4406 = vmatmul.mubr.bf16.gmra.mxu1 %v5618_v24  ;;  %4454 = vmatmul.mubr.bf16.gmra.mxu0 %v5635_v21 }
 0x15f   : > { %v5818_v10 = vadd.f32 %v977_v58, %v746_v17  ;;  %v767_v31 = vadd.f32 %v4119_v44, %v5737_v13  ;;  %4409 = vmatprep.mubr.bf16.mxu1 %v5635_v21  ;;  %4457 = vmatprep.mubr.bf16.mxu0 %v5637_v46 }
 0x160   : > { %v758_v54 = vpop.f32.mrf.mxu1  ;;  %v990_v53 = vpop.f32.mrf.mxu0 }
 0x161   : > { %v5823_v2 = vadd.f32 %v4167_v25, %v767_v31  ;;  %v759_v34 = vadd.f32 %v758_v54, %v5753_v37 }
 0x162   : > { %v4120_v3 = vpop.f32.mrf.mxu1  ;;  %v4168_v41 = vpop.f32.mrf.mxu0 }
 0x163   : > { %v5826_v27 = vadd.f32 %v990_v53, %v759_v34  ;;  %v770_v24 = vadd.f32 %v4120_v3, %v5757_v49 }
 0x164   : > { %v761_v55 = vpop.f32.mrf.mxu1  ;;  %v993_v30 = vpop.f32.mrf.mxu0 }
 0x165   : > { %v5829_v45 = vadd.f32 %v4168_v41, %v770_v24  ;;  %v762_v21 = vadd.f32 %v761_v55, %v5763_v4  ;;  %v2854_v55 = vrot.slane %v5495_v33, 5 }
 0x166   : > { %v4123_v13 = vpop.f32.mrf.mxu1  ;;  %v4171_v1 = vpop.f32.mrf.mxu0  ;;  %4410 = vmatmul.mubr.bf16.gmra.mxu1 %v5637_v46  ;;  %4458 = vmatmul.mubr.bf16.gmra.mxu0 %v5654_v16 }
 0x167   : > { %v5834_v18 = vadd.f32 %v993_v30, %v762_v21  ;;  %v783_v37 = vadd.f32 %v4123_v13, %v5767_v57  ;;  %4413 = vmatprep.mubr.bf16.mxu1 %v5654_v16  ;;  %4461 = vmatprep.mubr.bf16.mxu0 %v5657_v32 }
 0x168   : > { %v774_v49 = vpop.f32.mrf.mxu1  ;;  %v1006_v58 = vpop.f32.mrf.mxu0 }
 0x169   : > { %v5839_v17 = vadd.f32 %v4171_v1, %v783_v37  ;;  %v775_v4 = vadd.f32 %v774_v49, %v5774_v36  ;;  %v6442_v49 = vld [vmem:[#allocation29_spill] sm:$0xff] }
 0x16a   : > { %v4124_v44 = vpop.f32.mrf.mxu1  ;;  %v4172_v25 = vpop.f32.mrf.mxu0 }
 0x16b   : > { %v5842_v31 = vadd.f32 %v1006_v58, %v775_v4  ;;  %v786_v46 = vadd.f32 %v4124_v44, %v5778_v26  ;;  %v2856_v58 = vrot.slane %v2854_v55, 4  ;;  %v2857_v4 = vrot.slane %v5523_v6, 5 }
 0x16c   : > { %v777_v54 = vpop.f32.mrf.mxu1  ;;  %v1009_v53 = vpop.f32.mrf.mxu0 }
 0x16d   : > { %v5845_v34 = vadd.f32 %v4172_v25, %v786_v46  ;;  %v778_v16 = vadd.f32 %v777_v54, %v5782_v35 }
 0x16e   : > { %v4127_v57 = vpop.f32.mrf.mxu1  ;;  %v4175_v3 = vpop.f32.mrf.mxu0  ;;  %4414 = vmatmul.mubr.bf16.gmra.mxu1 %v5657_v32  ;;  %4462 = vmatmul.mubr.bf16.gmra.mxu0 %v5686_v12 }
 0x16f   : > { %v5850_v41 = vadd.f32 %v1009_v53, %v778_v16  ;;  %v799_v36 = vadd.f32 %v4127_v57, %v5665_v23  ;;  %4417 = vmatprep.mubr.bf16.mxu1 %v5686_v12  ;;  %4465 = vmatprep.mubr.bf16.mxu0 %v5695_v15  ;;  %v3800_v12 = vrot.slane %v6442_v49, 9 }
 0x170   : > { %v790_v26 = vpop.f32.mrf.mxu1  ;;  %v1022_v24 = vpop.f32.mrf.mxu0 }
 0x171   : > { %v5856_v30 = vadd.f32 %v4175_v3, %v799_v36  ;;  %v791_v35 = vadd.f32 %v790_v26, %v5680_v0  ;;  %v2855_v53 = vsel %vm5238_vm5, %v3800_v12, %v2854_v55 }
 0x172   : > { %v4128_v21 = vpop.f32.mrf.mxu1  ;;  %v4176_v32 = vpop.f32.mrf.mxu0 }
 0x173   : > { %v5859_v13 = vadd.f32 %v1022_v24, %v791_v35  ;;  %v802_v1 = vadd.f32 %v4128_v21, %v5691_v14 }
 0x174   : > { %v793_v37 = vpop.f32.mrf.mxu1  ;;  %v1025_v23 = vpop.f32.mrf.mxu0 }
 0x175   : > { %v5864_v44 = vadd.f32 %v4176_v32, %v802_v1  ;;  %v794_v33 = vadd.f32 %v793_v37, %v5699_v62  ;;  %v2858_v62 = vsel %vm5238_vm5, %v2856_v58, %v2857_v4 }
 0x176   : > { %v4131_v25 = vpop.f32.mrf.mxu1  ;;  %v4179_v46 = vpop.f32.mrf.mxu0  ;;  %4418 = vmatmul.mubr.bf16.gmra.mxu1 %v5695_v15  ;;  %4466 = vmatmul.mubr.bf16.gmra.mxu0 %v5727_v51 }
 0x177   : > { %v5869_v0 = vadd.f32 %v1025_v23, %v794_v33  ;;  %v815_v14 = vadd.f32 %v4131_v25, %v5705_v48  ;;  %4421 = vmatprep.mubr.bf16.mxu1 %v5727_v51  ;;  %4469 = vmatprep.mubr.bf16.mxu0 %v5729_v39  ;;  %v3801_v51 = vcombine.low %v2855_v53, %v2858_v62 }
 0x178   : > { %v806_v54 = vpop.f32.mrf.mxu1  ;;  %v1038_v6 = vpop.f32.mrf.mxu0 }
 0x179   : > { %v5878_v16 = vadd.f32 %v4179_v46, %v815_v14  ;;  %v807_v15 = vadd.f32 %v806_v54, %v5721_v56  ;;  %v6443_v46 = vcombine.low %v5564_v52, %v5568_v38 }
 0x17a   : > { %v4132_v57 = vpop.f32.mrf.mxu1  ;;  %v4180_v3 = vpop.f32.mrf.mxu0 }
 0x17b   : > { %v5881_v36 = vadd.f32 %v1038_v6, %v807_v15  ;;  %v818_v48 = vadd.f32 %v4132_v57, %v5725_v42 }
 0x17c   : > { %v809_v26 = vpop.f32.mrf.mxu1  ;;  %v1041_v24 = vpop.f32.mrf.mxu0 }
 0x17d   : > { %v5884_v35 = vadd.f32 %v4180_v3, %v818_v48  ;;  %v810_v55 = vadd.f32 %v809_v26, %v5735_v11 }
 0x17e   : > { %v4135_v21 = vpop.f32.mrf.mxu1  ;;  %v4183_v60 = vpop.f32.mrf.mxu0  ;;  %4422 = vmatmul.mubr.bf16.gmra.mxu1 %v5729_v39  ;;  %4470 = vmatmul.mubr.bf16.gmra.mxu0 %v5761_v43 }
 0x17f   : > { %v5889_v56 = vadd.f32 %v1041_v24, %v810_v55  ;;  %v831_v32 = vadd.f32 %v4135_v21, %v5739_v50  ;;  %4425 = vmatprep.mubr.bf16.mxu1 %v5761_v43  ;;  %4473 = vmatprep.mubr.bf16.mxu0 %v3801_v51 }
 0x180   : > { %v822_v42 = vpop.f32.mrf.mxu1  ;;  %v1054_v1 = vpop.f32.mrf.mxu0 }
 0x181   : > { %v5893_v37 = vadd.f32 %v4183_v60, %v831_v32  ;;  %v823_v23 = vadd.f32 %v822_v42, %v5755_v19 }
 0x182   : > { %v4136_v11 = vpop.f32.mrf.mxu1  ;;  %v4184_v49 = vpop.f32.mrf.mxu0 }
 0x183   : > { %v5896_v12 = vadd.f32 %v1054_v1, %v823_v23  ;;  %v834_v39 = vadd.f32 %v4136_v11, %v5759_v9 }
 0x184   : > { %v825_v58 = vpop.f32.mrf.mxu1  ;;  %v1057_v4 = vpop.f32.mrf.mxu0 }
 0x185   : > { %v5899_v33 = vadd.f32 %v4184_v49, %v834_v39  ;;  %v826_v50 = vadd.f32 %v825_v58, %v5765_v40 }
 0x186   : > { %v4139_v43 = vpop.f32.mrf.mxu1  ;;  %v4187_v25 = vpop.f32.mrf.mxu0  ;;  %4426 = vmatmul.mubr.bf16.gmra.mxu1 %v3801_v51  ;;  %4474 = vmatmul.mubr.bf16.gmra.mxu0 %v6443_v46 }
 0x187   : > { %v5905_v19 = vadd.f32 %v1057_v4, %v826_v50  ;;  %v847_v14 = vadd.f32 %v4139_v43, %v5769_v8 }
 0x188   : > { %v838_v54 = vpop.f32.mrf.mxu1  ;;  %v1070_v6 = vpop.f32.mrf.mxu0 }
 0x189   : > { %v5908_v9 = vadd.f32 %v4187_v25, %v847_v14  ;;  %v839_v53 = vadd.f32 %v838_v54, %v5776_v5 }
 0x18a   : > { %v4140_v62 = vpop.f32.mrf.mxu1  ;;  %v4188_v15 = vpop.f32.mrf.mxu0 }
 0x18b   : > { %v5911_v40 = vadd.f32 %v1070_v6, %v839_v53  ;;  %v850_v57 = vadd.f32 %v4140_v62, %v5780_v29 }
 0x18c   : > { %v841_v3 = vpop.f32.mrf.mxu1  ;;  %v1073_v48 = vpop.f32.mrf.mxu0 }
 0x18d   : > { %v5914_v52 = vadd.f32 %v4188_v15, %v850_v57  ;;  %v842_v38 = vadd.f32 %v841_v3, %v5784_v7 }
 0x18e   : > { %v4207_v51 = vpop.f32.mrf.mxu1  ;;  %v4255_v8 = vpop.f32.mrf.mxu0 }
 0x18f   : > { %v5917_v26 = vadd.f32 %v1073_v48, %v842_v38  ;;  %v1796_v24 = vadd.f32 %v4207_v51, %v5791_v22 }
 0x190   : > { %v1667_v55 = vpop.f32.mrf.mxu1  ;;  %v1953_v5 = vpop.f32.mrf.mxu0 }
 0x191   : > { %v5920_v21 = vadd.f32 %v4255_v8, %v1796_v24  ;;  %v1794_v60 = vadd.f32 %v1667_v55, %v5794_v28 }
 0x192   : > { %v4208_v32 = vpop.f32.mrf.mxu1  ;;  %v4256_v29 = vpop.f32.mrf.mxu0 }
 0x193   : > { %v5923_v42 = vadd.f32 %v1953_v5, %v1794_v60  ;;  %v1797_v1 = vadd.f32 %v4208_v32, %v5797_v20 }
 0x194   : > { %v1670_v23 = vpop.f32.mrf.mxu1  ;;  %v1956_v7 = vpop.f32.mrf.mxu0 }
 0x195   : > { %v5926_v11 = vadd.f32 %v4256_v29, %v1797_v1  ;;  %v1795_v49 = vadd.f32 %v1670_v23, %v5802_v63 }
 0x196   : > { %v4211_v39 = vpop.f32.mrf.mxu1  ;;  %v4259_v22 = vpop.f32.mrf.mxu0 }
 0x197   : > { %v5929_v58 = vadd.f32 %v1956_v7, %v1795_v49  ;;  %v1800_v4 = vadd.f32 %v4211_v39, %v5807_v61 }
 0x198   : > { %v1683_v50 = vpop.f32.mrf.mxu1  ;;  %v1969_v28 = vpop.f32.mrf.mxu0 }
 0x199   : > { %v5932_v43 = vadd.f32 %v4259_v22, %v1800_v4  ;;  %v1798_v25 = vadd.f32 %v1683_v50, %v5810_v59 }
 0x19a   : > { %v4212_v46 = vpop.f32.mrf.mxu1  ;;  %v4260_v20 = vpop.f32.mrf.mxu0 }
 0x19b   : > { %v5935_v14 = vadd.f32 %v1969_v28, %v1798_v25  ;;  %v1801_v54 = vadd.f32 %v4212_v46, %v5813_v47 }
 0x19c   : > { %v1686_v6 = vpop.f32.mrf.mxu1  ;;  %v1972_v63 = vpop.f32.mrf.mxu0 }
 0x19d   : > { %v5938_v53 = vadd.f32 %v4260_v20, %v1801_v54  ;;  %v1799_v62 = vadd.f32 %v1686_v6, %v5818_v10 }
 0x19e   : > { %v4215_v15 = vpop.f32.mrf.mxu1  ;;  %v4263_v61 = vpop.f32.mrf.mxu0 }
 0x19f   : > { %v5941_v57 = vadd.f32 %v1972_v63, %v1799_v62  ;;  %v1804_v3 = vadd.f32 %v4215_v15, %v5823_v2 }
 0x1a0   : > { %v1699_v48 = vpop.f32.mrf.mxu1  ;;  %v1985_v59 = vpop.f32.mrf.mxu0 }
 0x1a1   : > { %v5944_v38 = vadd.f32 %v4263_v61, %v1804_v3  ;;  %v1802_v51 = vadd.f32 %v1699_v48, %v5826_v27 }
 0x1a2   : > { %v4216_v8 = vpop.f32.mrf.mxu1  ;;  %v4264_v47 = vpop.f32.mrf.mxu0 }
 0x1a3   : > { %v5947_v24 = vadd.f32 %v1985_v59, %v1802_v51  ;;  %v1805_v55 = vadd.f32 %v4216_v8, %v5829_v45 }
 0x1a4   : > { %v1702_v5 = vpop.f32.mrf.mxu1  ;;  %v1988_v10 = vpop.f32.mrf.mxu0 }
 0x1a5   : > { %v5950_v60 = vadd.f32 %v4264_v47, %v1805_v55  ;;  %v1803_v32 = vadd.f32 %v1702_v5, %v5834_v18 }
 0x1a6   : > { %v4219_v29 = vpop.f32.mrf.mxu1  ;;  %v4267_v2 = vpop.f32.mrf.mxu0 }
 0x1a7   : > { %v5953_v1 = vadd.f32 %v1988_v10, %v1803_v32  ;;  %v1808_v23 = vadd.f32 %v4219_v29, %v5839_v17 }
 0x1a8   : > { %v1715_v7 = vpop.f32.mrf.mxu1  ;;  %v2001_v27 = vpop.f32.mrf.mxu0 }
 0x1a9   : > { %v5956_v49 = vadd.f32 %v4267_v2, %v1808_v23  ;;  %v1806_v39 = vadd.f32 %v1715_v7, %v5842_v31 }
 0x1aa   : > { %v4220_v22 = vpop.f32.mrf.mxu1  ;;  %v4268_v45 = vpop.f32.mrf.mxu0 }
 0x1ab   : > { %v5959_v4 = vadd.f32 %v2001_v27, %v1806_v39  ;;  %v1809_v50 = vadd.f32 %v4220_v22, %v5845_v34 }
 0x1ac   : > { %v1718_v28 = vpop.f32.mrf.mxu1  ;;  %v2004_v18 = vpop.f32.mrf.mxu0 }
 0x1ad   : > { %v5962_v25 = vadd.f32 %v4268_v45, %v1809_v50  ;;  %v1807_v46 = vadd.f32 %v1718_v28, %v5850_v41 }
 0x1ae   : > { %v4223_v20 = vpop.f32.mrf.mxu1  ;;  %v4271_v17 = vpop.f32.mrf.mxu0 }
 0x1af   : > { %v5965_v54 = vadd.f32 %v2004_v18, %v1807_v46  ;;  %v1812_v6 = vadd.f32 %v4223_v20, %v5856_v30 }
 0x1b0   : > { %v1731_v63 = vpop.f32.mrf.mxu1  ;;  %v2017_v31 = vpop.f32.mrf.mxu0 }
 0x1b1   : > { %v5968_v62 = vadd.f32 %v4271_v17, %v1812_v6  ;;  %v1810_v15 = vadd.f32 %v1731_v63, %v5859_v13 }
 0x1b2   : > { %v4224_v61 = vpop.f32.mrf.mxu1  ;;  %v4272_v34 = vpop.f32.mrf.mxu0 }
 0x1b3   : > { %v5971_v3 = vadd.f32 %v2017_v31, %v1810_v15  ;;  %v1813_v48 = vadd.f32 %v4224_v61, %v5864_v44 }
 0x1b4   : > { %v1734_v59 = vpop.f32.mrf.mxu1  ;;  %v2020_v41 = vpop.f32.mrf.mxu0 }
 0x1b5   : > { %6444 = vst [vmem:[#allocation22_spill] sm:$0xff] %v5971_v3  ;;  %v5974_v51 = vadd.f32 %v4272_v34, %v1813_v48  ;;  %v1811_v8 = vadd.f32 %v1734_v59, %v5869_v0 }
 0x1b6   : > { %v4227_v47 = vpop.f32.mrf.mxu1  ;;  %v4275_v30 = vpop.f32.mrf.mxu0 }
 0x1b7   : > { %6445 = vst [vmem:[#allocation21_spill] sm:$0xff] %v5974_v51  ;;  %v5977_v55 = vadd.f32 %v2020_v41, %v1811_v8  ;;  %v1816_v5 = vadd.f32 %v4227_v47, %v5878_v16 }
 0x1b8   : > { %v1747_v10 = vpop.f32.mrf.mxu1  ;;  %v2033_v13 = vpop.f32.mrf.mxu0 }
 0x1b9   : > { %6446 = vst [vmem:[#allocation25_spill] sm:$0xff] %v5977_v55  ;;  %v5980_v32 = vadd.f32 %v4275_v30, %v1816_v5  ;;  %v1814_v29 = vadd.f32 %v1747_v10, %v5881_v36 }
 0x1ba   : > { %v4228_v2 = vpop.f32.mrf.mxu1  ;;  %v4276_v44 = vpop.f32.mrf.mxu0 }
 0x1bb   : > { %6447 = vst [vmem:[#allocation24_spill] sm:$0xff] %v5980_v32  ;;  %v5983_v23 = vadd.f32 %v2033_v13, %v1814_v29  ;;  %v1817_v7 = vadd.f32 %v4228_v2, %v5884_v35 }
 0x1bc   : > { %v1750_v27 = vpop.f32.mrf.mxu1  ;;  %v2036_v0 = vpop.f32.mrf.mxu0 }
 0x1bd   : > { %6448 = vst [vmem:[#allocation23_spill] sm:$0xff] %v5983_v23  ;;  %v5986_v39 = vadd.f32 %v4276_v44, %v1817_v7  ;;  %v1815_v22 = vadd.f32 %v1750_v27, %v5889_v56 }
 0x1be   : > { %v4231_v45 = vpop.f32.mrf.mxu1  ;;  %v4279_v16 = vpop.f32.mrf.mxu0 }
 0x1bf   : > { %6449 = vst [vmem:[#allocation28_spill] sm:$0xff] %v5986_v39  ;;  %v5989_v50 = vadd.f32 %v2036_v0, %v1815_v22  ;;  %v1820_v28 = vadd.f32 %v4231_v45, %v5893_v37 }
 0x1c0   : > { %v1763_v18 = vpop.f32.mrf.mxu1  ;;  %v2049_v36 = vpop.f32.mrf.mxu0 }
 0x1c1   : > { %6450 = vst [vmem:[#allocation27_spill] sm:$0xff] %v5989_v50  ;;  %v5992_v46 = vadd.f32 %v4279_v16, %v1820_v28  ;;  %v1818_v20 = vadd.f32 %v1763_v18, %v5896_v12 }
 0x1c2   : > { %v4232_v17 = vpop.f32.mrf.mxu1  ;;  %v4280_v35 = vpop.f32.mrf.mxu0 }
 0x1c3   : > { %6451 = vst [vmem:[#allocation26_spill] sm:$0xff] %v5992_v46  ;;  %v5995_v6 = vadd.f32 %v2049_v36, %v1818_v20  ;;  %v1821_v63 = vadd.f32 %v4232_v17, %v5899_v33 }
 0x1c4   : > { %v1766_v31 = vpop.f32.mrf.mxu1  ;;  %v2052_v56 = vpop.f32.mrf.mxu0 }
 0x1c5   : > { %6452 = vst [vmem:[#allocation29_spill] sm:$0xff] %v5995_v6  ;;  %v5998_v15 = vadd.f32 %v4280_v35, %v1821_v63  ;;  %v1819_v61 = vadd.f32 %v1766_v31, %v5905_v19 }
 0x1c6   : > { %v4235_v34 = vpop.f32.mrf.mxu1  ;;  %v4283_v37 = vpop.f32.mrf.mxu0 }
 0x1c7   : > { %6453 = vst [vmem:[#allocation30_spill] sm:$0xff] %v5998_v15  ;;  %v6001_v48 = vadd.f32 %v2052_v56, %v1819_v61  ;;  %v1824_v59 = vadd.f32 %v4235_v34, %v5908_v9 }
 0x1c8   : > { %v1779_v41 = vpop.f32.mrf.mxu1  ;;  %v2065_v12 = vpop.f32.mrf.mxu0 }
 0x1c9   : > { %6454 = vst [vmem:[#allocation31_spill] sm:$0xff] %v6001_v48  ;;  %v6004_v8 = vadd.f32 %v4283_v37, %v1824_v59  ;;  %v1822_v47 = vadd.f32 %v1779_v41, %v5911_v40 }
 0x1ca   : > { %v4236_v30 = vpop.f32.mrf.mxu1  ;;  %v4284_v33 = vpop.f32.mrf.mxu0 }
 0x1cb   : > { %6455 = vst [vmem:[#allocation32_spill] sm:$0xff] %v6004_v8  ;;  %v6007_v5 = vadd.f32 %v2065_v12, %v1822_v47  ;;  %v1825_v10 = vadd.f32 %v4236_v30, %v5914_v52 }
 0x1cc   : > { %v1782_v13 = vpop.f32.mrf.mxu1  ;;  %v2068_v19 = vpop.f32.mrf.mxu0 }
 0x1cd   : > { %6456 = vst [vmem:[#allocation33_spill] sm:$0xff] %v6007_v5  ;;  %v6010_v29 = vadd.f32 %v4284_v33, %v1825_v10  ;;  %v1823_v2 = vadd.f32 %v1782_v13, %v5917_v26 }
 0x1ce   : > { %v6013_v44 = vpop.f32.mrf.mxu1  ;;  %v6015_v9 = vpop.f32.mrf.mxu0 }
 0x1cf   : > { %6457 = vst [vmem:[#allocation34_spill] sm:$0xff] %v6010_v29  ;;  %v6017_v7 = vadd.f32 %v2068_v19, %v1823_v2 }
 0x1d0   : > { %v6019_v27 = vpop.f32.mrf.mxu1  ;;  %v6021_v40 = vpop.f32.mrf.mxu0 }
 0x1d1   : > { %6458 = vst [vmem:[#allocation35_spill] sm:$0xff] %v6017_v7 }
 0x1d2   : > { %v6023_v0 = vpop.f32.mrf.mxu1  ;;  %v6025_v22 = vpop.f32.mrf.mxu0 }
 0x1d4   : > { %v6027_v52 = vpop.f32.mrf.mxu1  ;;  %v6029_v45 = vpop.f32.mrf.mxu0 }
 0x1d6   : > { %v6031_v16 = vpop.f32.mrf.mxu1  ;;  %v6033_v26 = vpop.f32.mrf.mxu0 }
 0x1d8   : > { %v6035_v28 = vpop.f32.mrf.mxu1  ;;  %v6037_v18 = vpop.f32.mrf.mxu0 }
 0x1da   : > { %v6039_v36 = vpop.f32.mrf.mxu1  ;;  %v6041_v20 = vpop.f32.mrf.mxu0 }
 0x1dc   : > { %v6043_v17 = vpop.f32.mrf.mxu1  ;;  %v6045_v35 = vpop.f32.mrf.mxu0 }
 0x1de   : > { %v6047_v63 = vpop.f32.mrf.mxu1  ;;  %v6049_v31 = vpop.f32.mrf.mxu0 }
 0x1e0   : > { %v6051_v56 = vpop.f32.mrf.mxu1  ;;  %v6053_v61 = vpop.f32.mrf.mxu0 }
 0x1e2   : > { %v6055_v34 = vpop.f32.mrf.mxu1  ;;  %v6057_v37 = vpop.f32.mrf.mxu0 }
 0x1e4   : > { %v6059_v59 = vpop.f32.mrf.mxu1  ;;  %v6061_v41 = vpop.f32.mrf.mxu0 }
 0x1e6   : > { %v6063_v12 = vpop.f32.mrf.mxu1  ;;  %v6065_v47 = vpop.f32.mrf.mxu0 }
 0x1e8   : > { %v6067_v30 = vpop.f32.mrf.mxu1  ;;  %v6069_v33 = vpop.f32.mrf.mxu0 }
 0x1ea   : > { %v6071_v10 = vpop.f32.mrf.mxu1  ;;  %v6073_v13 = vpop.f32.mrf.mxu0 }
 0x1ec   : > { %v6075_v19 = vpop.f32.mrf.mxu1  ;;  %v6077_v2 = vpop.f32.mrf.mxu0 }
 0x1ee   : > { %v6079_v7 = vpop.f32.mrf.mxu1  ;;  %v6081_v29 = vpop.f32.mrf.mxu0 }
 0x1ef   : > { %6459 = vst [vmem:[#allocation36_spill] sm:$0xff] %v6081_v29 }
 0x1f0   : > { %v6083_v5 = vpop.f32.mrf.mxu1  ;;  %v6085_v8 = vpop.f32.mrf.mxu0 }
 0x1f1   : > { %6460 = vst [vmem:[#allocation37_spill] sm:$0xff] %v6083_v5  ;;  %6461 = vst [vmem:[#allocation38_spill] sm:$0xff] %v6085_v8 }
 0x1f2   : > { %v6087_v48 = vpop.f32.mrf.mxu1  ;;  %v6089_v15 = vpop.f32.mrf.mxu0 }
 0x1f3   : > { %6462 = vst [vmem:[#allocation39_spill] sm:$0xff] %v6087_v48  ;;  %6463 = vst [vmem:[#allocation40_spill] sm:$0xff] %v6089_v15 }
 0x1f4   : > { %v6091_v6 = vpop.f32.mrf.mxu1  ;;  %v6093_v46 = vpop.f32.mrf.mxu0 }
 0x1f5   : > { %6464 = vst [vmem:[#allocation41_spill] sm:$0xff] %v6091_v6  ;;  %6465 = vst [vmem:[#allocation42_spill] sm:$0xff] %v6093_v46 }
 0x1f6   : > { %v6095_v50 = vpop.f32.mrf.mxu1  ;;  %v6097_v39 = vpop.f32.mrf.mxu0 }
 0x1f7   : > { %6466 = vst [vmem:[#allocation43_spill] sm:$0xff] %v6095_v50  ;;  %6467 = vst [vmem:[#allocation44_spill] sm:$0xff] %v6097_v39 }
 0x1f8   : > { %v6099_v23 = vpop.f32.mrf.mxu1  ;;  %v6101_v32 = vpop.f32.mrf.mxu0 }
 0x1f9   : > { %6468 = vst [vmem:[#allocation45_spill] sm:$0xff] %v6099_v23  ;;  %6469 = vst [vmem:[#allocation46_spill] sm:$0xff] %v6101_v32  ;;  %v3392_v32 = vlaneseq }
 0x1fa   : > { %v6103_v55 = vpop.f32.mrf.mxu1  ;;  %v6105_v51 = vpop.f32.mrf.mxu0 }
 0x1fb   : > { %6470 = vst [vmem:[#allocation47_spill] sm:$0xff] %v6103_v55  ;;  %6471 = vst [vmem:[#allocation48_spill] sm:$0xff] %v6105_v51 }
 0x1fc   : > { %v6107_v8 = vpop.f32.mrf.mxu1  ;;  %v6109_v48 = vpop.f32.mrf.mxu0 }
 0x1fd   : > { %6472 = vst [vmem:[#allocation49_spill] sm:$0xff] %v6107_v8  ;;  %6473 = vst [vmem:[#allocation50_spill] sm:$0xff] %v6109_v48 }
 0x1fe   : > { %v6111_v15 = vpop.f32.mrf.mxu1  ;;  %v6113_v6 = vpop.f32.mrf.mxu0 }
 0x1ff   : > { %6474 = vst [vmem:[#allocation51_spill] sm:$0xff] %v6111_v15  ;;  %6475 = vst [vmem:[#allocation52_spill] sm:$0xff] %v6113_v6  ;;  %v3393_v15 = vshrl.u32 %v3392_v32, 7  ;;  %v3391_v32 = vld [vmem:[#allocation8] sm:$0xf] }
 0x200   : > { %v6115_v46 = vpop.f32.mrf.mxu1  ;;  %v6117_v50 = vpop.f32.mrf.mxu0 }
 0x201   : > { %6476 = vst [vmem:[#allocation53_spill] sm:$0xff] %v6115_v46  ;;  %6477 = vst [vmem:[#allocation54_spill] sm:$0xff] %v6117_v50  ;;  %v2368_v50 = vadd.f32 %v6013_v44, %v5920_v21 }
 0x202   : > { %v6119_v39 = vpop.f32.mrf.mxu1  ;;  %v6121_v23 = vpop.f32.mrf.mxu0 }
 0x203   : > { %6478 = vst [vmem:[#allocation55_spill] sm:$0xff] %v6119_v39  ;;  %6479 = vst [vmem:[#allocation56_spill] sm:$0xff] %v6121_v23 }
 0x204   : > { %v6123_v55 = vpop.f32.mrf.mxu1  ;;  %v6125_v51 = vpop.f32.mrf.mxu0 }
 0x205   : > { %6480 = vst [vmem:[#allocation57_spill] sm:$0xff] %v6123_v55  ;;  %6481 = vst [vmem:[#allocation58_spill] sm:$0xff] %v6125_v51  ;;  %v2366_v55 = vadd.f32 %v6019_v27, %v5923_v42  ;;  %v3394_v51 = vsub.s32 0, %v3393_v15 }
 0x206   : > { %v6127_v8 = vpop.f32.mrf.mxu1  ;;  %v6129_v48 = vpop.f32.mrf.mxu0 }
 0x207   : > { %6482 = vst [vmem:[#allocation59_spill] sm:$0xff] %v6127_v8  ;;  %6483 = vst [vmem:[#allocation60_spill] sm:$0xff] %v6129_v48  ;;  %v3430_v48 = vsub.s32 1, %v3393_v15  ;;  %v6153_v27 = vrot.slane %v3391_v32, %v3394_v51 }
 0x208   : > { %v6131_v29 = vpop.f32.mrf.mxu1  ;;  %v6133_v6 = vpop.f32.mrf.mxu0 }
 0x209   : > { %6484 = vst [vmem:[#allocation61_spill] sm:$0xff] %v6131_v29  ;;  %6485 = vst [vmem:[#allocation62_spill] sm:$0xff] %v6133_v6  ;;  %v2821_v29 = vadd.f32 %v6015_v9, %v2368_v50  ;;  %v2369_v6 = vadd.f32 %v6023_v0, %v5926_v11  ;;  %v6156_v50 = vrot.slane %v3391_v32, %v3430_v48 }
 0x20a   : > { %v6137_v39 = vpop.f32.mrf.mxu1  ;;  %v6139_v23 = vpop.f32.mrf.mxu0  ;;  %v2372_v11 = vadd.f32 %v6031_v16, %v5932_v43  ;;  %v2376_v32 = vadd.f32 %v6047_v63, %v5944_v38 }
 0x20b   : > { %6486 = vst [vmem:[#allocation63_spill] sm:$0xff] %v6137_v39  ;;  %6487 = vst [vmem:[#allocation64_spill] sm:$0xff] %v6139_v23  ;;  %v2819_v39 = vadd.f32 %v6021_v40, %v2366_v55  ;;  %v2367_v23 = vadd.f32 %v6027_v52, %v5929_v58  ;;  %v2370_v55 = vadd.f32 %v6035_v28, %v5935_v14 }
 0x20c   : > { %v6143_v46 = vpop.f32.mrf.mxu1  ;;  %v6145_v8 = vpop.f32.mrf.mxu0  ;;  %v2825_v52 = vadd.f32 %v6033_v26, %v2372_v11 }
 0x20d   : > { %6488 = vst [vmem:[#allocation65_spill] sm:$0xff] %v6143_v46  ;;  %6489 = vst [vmem:[#allocation66_spill] sm:$0xff] %v6145_v8  ;;  %v2822_v8 = vadd.f32 %v6025_v22, %v2369_v6  ;;  %v2820_v58 = vadd.f32 %v6029_v45, %v2367_v23  ;;  %v2373_v6 = vadd.f32 %v6039_v36, %v5938_v53 }
 0x20e   : > { %v4399_v21 = vpop.f32.mrf.mxu1  ;;  %v4447_v44 = vpop.f32.mrf.mxu0  ;;  %v2823_v23 = vadd.f32 %v6037_v18, %v2370_v55 }
 0x20f   : > { %v3091_v42 = vadd.f32 %v4399_v21, %v2821_v29  ;;  %v2826_v36 = vadd.f32 %v6041_v20, %v2373_v6 }
 0x210   : > { %v2962_v46 = vpop.f32.mrf.mxu1  ;;  %v3232_v5 = vpop.f32.mrf.mxu0 }
 0x211   : > { %v3361_v3 = vadd.f32 %v4447_v44, %v3091_v42  ;;  %v3089_v9 = vadd.f32 %v2962_v46, %v2819_v39 }
 0x212   : > { %v4400_v15 = vpop.f32.mrf.mxu1  ;;  %v4448_v40 = vpop.f32.mrf.mxu0 }
 0x213   : > { %v3398_v51 = vmul.f32 %v6153_v27, %v3361_v3  ;;  %v3359_v29 = vadd.f32 %v3232_v5, %v3089_v9  ;;  %v3092_v0 = vadd.f32 %v4400_v15, %v2822_v8  ;;  %v2371_v3 = vadd.f32 %v6043_v17, %v5941_v57 }
 0x214   : > { %v2965_v48 = vpop.f32.mrf.mxu1  ;;  %v3235_v22 = vpop.f32.mrf.mxu0 }
 0x215   : > { %v3434_v39 = vadd.f32 %v6156_v50, %v3398_v51  ;;  %v3396_v43 = vmul.f32 %v6153_v27, %v3359_v29  ;;  %v3362_v46 = vadd.f32 %v4448_v40, %v3092_v0  ;;  %v3090_v14 = vadd.f32 %v2965_v48, %v2820_v58 }
 0x216   : > { %v4403_v8 = vpop.f32.mrf.mxu1  ;;  %v4451_v5 = vpop.f32.mrf.mxu0  ;;  %v2824_v9 = vadd.f32 %v6045_v35, %v2371_v3  ;;  %v2829_v58 = vadd.f32 %v6049_v31, %v2376_v32  ;;  %v2374_v51 = vadd.f32 %v6051_v56, %v5947_v24  ;;  %v2377_v29 = vadd.f32 %v6055_v34, %v5950_v60 }
 0x217   : > { %v3466_v45 = vmax.f32 %v3434_v39, 0.0  ;;  %v3432_v53 = vadd.f32 %v6156_v50, %v3396_v43  ;;  %v3399_v16 = vmul.f32 %v6153_v27, %v3362_v46  ;;  %v3360_v28 = vadd.f32 %v3235_v22, %v3090_v14 }
 0x218   : > { %v3095_v26 = vadd.f32 %v4403_v8, %v2825_v52  ;;  %v2978_v21 = vpop.f32.mrf.mxu1  ;;  %v3248_v18 = vpop.f32.mrf.mxu0  ;;  %v2375_v46 = vadd.f32 %v6059_v59, %v5953_v1  ;;  %v2830_v3 = vadd.f32 %v6057_v37, %v2377_v29  ;;  %v2380_v1 = vadd.f32 %v6063_v12, %v5956_v49 }
 0x219   : > { %3498 = vst [vmem:[%s4998_s19 + $0x10] sm:$0xff] %v3466_v45  ;;  %v3464_v44 = vmax.f32 %v3432_v53, 0.0  ;;  %v3435_v57 = vadd.f32 %v6156_v50, %v3399_v16  ;;  %v3397_v17 = vmul.f32 %v6153_v27, %v3360_v28  ;;  %v3093_v42 = vadd.f32 %v2978_v21, %v2823_v23 }
 0x21a   : > { %v3365_v11 = vadd.f32 %v4451_v5, %v3095_v26  ;;  %v4404_v55 = vpop.f32.mrf.mxu1  ;;  %v4452_v15 = vpop.f32.mrf.mxu0  ;;  %v2827_v23 = vadd.f32 %v6053_v61, %v2374_v51  ;;  %v2378_v61 = vadd.f32 %v6067_v30, %v5959_v4  ;;  %v2384_v29 = vadd.f32 %v6079_v7, %v5968_v62 }
 0x21b   : > { %3496 = vst [vmem:[%s4998_s19] sm:$0xff] %v3464_v44  ;;  %v3467_v20 = vmax.f32 %v3435_v57, 0.0  ;;  %v3433_v38 = vadd.f32 %v6156_v50, %v3397_v17  ;;  %v3363_v63 = vadd.f32 %v3248_v18, %v3093_v42  ;;  %v3096_v40 = vadd.f32 %v4404_v55, %v2826_v36 }
 0x21c   : > { %v3402_v35 = vmul.f32 %v6153_v27, %v3365_v11  ;;  %v2981_v0 = vpop.f32.mrf.mxu1  ;;  %v3251_v6 = vpop.f32.mrf.mxu0  ;;  %v2828_v36 = vadd.f32 %v6061_v41, %v2375_v46  ;;  %v2833_v44 = vadd.f32 %v6065_v47, %v2380_v1  ;;  %v2831_v11 = vadd.f32 %v6069_v33, %v2378_v61 }
 0x21d   : > { %3499 = vst [vmem:[%s4998_s19 + $0x18] sm:$0xff] %v3467_v20  ;;  %v3465_v48 = vmax.f32 %v3433_v38, 0.0  ;;  %v3400_v22 = vmul.f32 %v6153_v27, %v3363_v63  ;;  %v3366_v39 = vadd.f32 %v4452_v15, %v3096_v40  ;;  %v3094_v43 = vadd.f32 %v2981_v0, %v2824_v9 }
 0x21e   : > { %v3438_v31 = vadd.f32 %v6156_v50, %v3402_v35  ;;  %v4407_v14 = vpop.f32.mrf.mxu1  ;;  %v4455_v24 = vpop.f32.mrf.mxu0  ;;  %v2381_v55 = vadd.f32 %v6071_v10, %v5962_v25  ;;  %v2379_v15 = vadd.f32 %v6075_v19, %v5965_v54 }
 0x21f   : > { %3497 = vst [vmem:[%s4998_s19 + $0x8] sm:$0xff] %v3465_v48  ;;  %v3436_v60 = vadd.f32 %v6156_v50, %v3400_v22  ;;  %v3403_v56 = vmul.f32 %v6153_v27, %v3366_v39  ;;  %v3364_v34 = vadd.f32 %v3251_v6, %v3094_v43  ;;  %v3099_v52 = vadd.f32 %v4407_v14, %v2829_v58  ;;  %v6490_v22 = vld [vmem:[#allocation22_spill] sm:$0xff]  ;;  %v6491_v39 = vld [vmem:[#allocation37_spill] sm:$0xff] }
 0x220   : > { %v3470_v59 = vmax.f32 %v3438_v31, 0.0  ;;  %v2994_v8 = vpop.f32.mrf.mxu1  ;;  %v3264_v5 = vpop.f32.mrf.mxu0  ;;  %v2834_v6 = vadd.f32 %v6073_v13, %v2381_v55  ;;  %v2832_v48 = vadd.f32 %v6077_v2, %v2379_v15  ;;  %v2382_v62 = vadd.f32 %v6491_v39, %v6490_v22  ;;  %v6494_v13 = vld [vmem:[#allocation39_spill] sm:$0xff] }
 0x221   : > { %v3468_v45 = vmax.f32 %v3436_v60, 0.0  ;;  %v3439_v53 = vadd.f32 %v6156_v50, %v3403_v56  ;;  %v3401_v16 = vmul.f32 %v6153_v27, %v3364_v34  ;;  %v3369_v28 = vadd.f32 %v4455_v24, %v3099_v52  ;;  %v6492_v56 = vld [vmem:[#allocation36_spill] sm:$0xff]  ;;  %v6493_v52 = vld [vmem:[#allocation21_spill] sm:$0xff] }
 0x222   : > { %3502 = vst [vmem:[%s4998_s19 + $0x30] sm:$0xff] %v3470_v59  ;;  %v3097_v37 = vadd.f32 %v2994_v8, %v2827_v23  ;;  %v4408_v32 = vpop.f32.mrf.mxu1  ;;  %v4456_v26 = vpop.f32.mrf.mxu0  ;;  %v2837_v34 = vadd.f32 %v6492_v56, %v2384_v29  ;;  %v2385_v23 = vadd.f32 %v6494_v13, %v6493_v52  ;;  %v6508_v56 = vld [vmem:[#allocation27_spill] sm:$0xff] }
 0x223   : > { %3500 = vst [vmem:[%s4998_s19 + $0x20] sm:$0xff] %v3468_v45  ;;  %v3471_v49 = vmax.f32 %v3439_v53, 0.0  ;;  %v3437_v12 = vadd.f32 %v6156_v50, %v3401_v16  ;;  %v3406_v21 = vmul.f32 %v6153_v27, %v3369_v28  ;;  %v3100_v18 = vadd.f32 %v4408_v32, %v2830_v3  ;;  %v6495_v53 = vld [vmem:[#allocation38_spill] sm:$0xff] }
 0x224   : > { %v3367_v57 = vadd.f32 %v3264_v5, %v3097_v37  ;;  %v2997_v17 = vpop.f32.mrf.mxu1  ;;  %v3267_v41 = vpop.f32.mrf.mxu0  ;;  %v2835_v16 = vadd.f32 %v6495_v53, %v2382_v62 }
 0x225   : > { %3503 = vst [vmem:[%s4998_s19 + $0x38] sm:$0xff] %v3471_v49  ;;  %v3469_v42 = vmax.f32 %v3437_v12, 0.0  ;;  %v3442_v4 = vadd.f32 %v6156_v50, %v3406_v21  ;;  %v3370_v30 = vadd.f32 %v4456_v26, %v3100_v18  ;;  %v3098_v9 = vadd.f32 %v2997_v17, %v2828_v36  ;;  %v6496_v12 = vld [vmem:[#allocation40_spill] sm:$0xff]  ;;  %v6497_v18 = vld [vmem:[#allocation25_spill] sm:$0xff] }
 0x226   : > { %v3404_v47 = vmul.f32 %v6153_v27, %v3367_v57  ;;  %v4411_v20 = vpop.f32.mrf.mxu1  ;;  %v4459_v38 = vpop.f32.mrf.mxu0  ;;  %v2838_v21 = vadd.f32 %v6496_v12, %v2385_v23  ;;  %v6499_v17 = vld [vmem:[#allocation24_spill] sm:$0xff]  ;;  %v6512_v12 = vld [vmem:[#allocation26_spill] sm:$0xff] }
 0x227   : > { %3501 = vst [vmem:[%s4998_s19 + $0x28] sm:$0xff] %v3469_v42  ;;  %v3474_v63 = vmax.f32 %v3442_v4, 0.0  ;;  %v3407_v40 = vmul.f32 %v6153_v27, %v3370_v30  ;;  %v3368_v58 = vadd.f32 %v3267_v41, %v3098_v9  ;;  %v3103_v51 = vadd.f32 %v4411_v20, %v2833_v44  ;;  %v6498_v44 = vld [vmem:[#allocation41_spill] sm:$0xff]  ;;  %v6500_v41 = vld [vmem:[#allocation43_spill] sm:$0xff] }
 0x228   : > { %v3440_v33 = vadd.f32 %v6156_v50, %v3404_v47  ;;  %v3010_v35 = vpop.f32.mrf.mxu1  ;;  %v3280_v25 = vpop.f32.mrf.mxu0  ;;  %v2383_v57 = vadd.f32 %v6498_v44, %v6497_v18  ;;  %v2388_v42 = vadd.f32 %v6500_v41, %v6499_v17  ;;  %v6501_v20 = vld [vmem:[#allocation23_spill] sm:$0xff]  ;;  %v6514_v44 = vld [vmem:[#allocation29_spill] sm:$0xff] }
 0x229   : > { %3506 = vst [vmem:[%s4998_s19 + $0x50] sm:$0xff] %v3474_v63  ;;  %v3443_v54 = vadd.f32 %v6156_v50, %v3407_v40  ;;  %v3405_v10 = vmul.f32 %v6153_v27, %v3368_v58  ;;  %v3373_v19 = vadd.f32 %v4459_v38, %v3103_v51  ;;  %v3101_v0 = vadd.f32 %v3010_v35, %v2831_v11  ;;  %v6502_v38 = vld [vmem:[#allocation45_spill] sm:$0xff] }
 0x22a   : > { %v3472_v7 = vmax.f32 %v3440_v33, 0.0  ;;  %v4412_v43 = vpop.f32.mrf.mxu1  ;;  %v4460_v46 = vpop.f32.mrf.mxu0  ;;  %v2386_v63 = vadd.f32 %v6502_v38, %v6501_v20 }
 0x22b   : > { %v3475_v31 = vmax.f32 %v3443_v54, 0.0  ;;  %v3441_v14 = vadd.f32 %v6156_v50, %v3405_v10  ;;  %v3410_v24 = vmul.f32 %v6153_v27, %v3373_v19  ;;  %v3371_v60 = vadd.f32 %v3280_v25, %v3101_v0  ;;  %v6503_v54 = vld [vmem:[#allocation42_spill] sm:$0xff]  ;;  %v6504_v19 = vld [vmem:[#allocation44_spill] sm:$0xff] }
 0x22c   : > { %3504 = vst [vmem:[%s4998_s19 + $0x40] sm:$0xff] %v3472_v7  ;;  %v3104_v2 = vadd.f32 %v4412_v43, %v2834_v6  ;;  %v3013_v3 = vpop.f32.mrf.mxu1  ;;  %v3283_v1 = vpop.f32.mrf.mxu0  ;;  %v2836_v10 = vadd.f32 %v6503_v54, %v2383_v57  ;;  %v2841_v0 = vadd.f32 %v6504_v19, %v2388_v42  ;;  %v6505_v6 = vld [vmem:[#allocation28_spill] sm:$0xff]  ;;  %v6515_v57 = vld [vmem:[#allocation53_spill] sm:$0xff]  ;;  %v6519_v54 = vld [vmem:[#allocation54_spill] sm:$0xff] }
 0x22d   : > { %3507 = vst [vmem:[%s4998_s19 + $0x58] sm:$0xff] %v3475_v31  ;;  %v3473_v59 = vmax.f32 %v3441_v14, 0.0  ;;  %v3446_v8 = vadd.f32 %v6156_v50, %v3410_v24  ;;  %v3408_v5 = vmul.f32 %v6153_v27, %v3371_v60  ;;  %v3102_v45 = vadd.f32 %v3013_v3, %v2832_v48  ;;  %v6506_v48 = vld [vmem:[#allocation47_spill] sm:$0xff]  ;;  %v6507_v24 = vld [vmem:[#allocation46_spill] sm:$0xff] }
 0x22e   : > { %v3374_v28 = vadd.f32 %v4460_v46, %v3104_v2  ;;  %v4415_v36 = vpop.f32.mrf.mxu1  ;;  %v4463_v61 = vpop.f32.mrf.mxu0  ;;  %v2389_v22 = vadd.f32 %v6506_v48, %v6505_v6  ;;  %v2839_v60 = vadd.f32 %v6507_v24, %v2386_v63  ;;  %v2390_v17 = vadd.f32 %v6515_v57, %v6514_v44  ;;  %v6520_v19 = vld [vmem:[#allocation31_spill] sm:$0xff]  ;;  %v6523_v24 = vld [vmem:[#allocation32_spill] sm:$0xff] }
 0x22f   : > { %3505 = vst [vmem:[%s4998_s19 + $0x48] sm:$0xff] %v3473_v59  ;;  %v3478_v37 = vmax.f32 %v3446_v8, 0.0  ;;  %v3444_v32 = vadd.f32 %v6156_v50, %v3408_v5  ;;  %v3372_v26 = vadd.f32 %v3283_v1, %v3102_v45  ;;  %v3107_v49 = vadd.f32 %v4415_v36, %v2837_v34  ;;  %v6509_v34 = vld [vmem:[#allocation49_spill] sm:$0xff]  ;;  %v6510_v5 = vld [vmem:[#allocation48_spill] sm:$0xff] }
 0x230   : > { %v3411_v4 = vmul.f32 %v6153_v27, %v3374_v28  ;;  %v3026_v30 = vpop.f32.mrf.mxu1  ;;  %v3296_v9 = vpop.f32.mrf.mxu0  ;;  %v2387_v52 = vadd.f32 %v6509_v34, %v6508_v56  ;;  %v2842_v45 = vadd.f32 %v6510_v5, %v2389_v22 }
 0x231   : > { %3510 = vst [vmem:[%s4998_s19 + $0x70] sm:$0xff] %v3478_v37  ;;  %v3476_v11 = vmax.f32 %v3444_v32, 0.0  ;;  %v3409_v55 = vmul.f32 %v6153_v27, %v3372_v26  ;;  %v3377_v15 = vadd.f32 %v4463_v61, %v3107_v49  ;;  %v3105_v47 = vadd.f32 %v3026_v30, %v2835_v16  ;;  %v6511_v26 = vld [vmem:[#allocation50_spill] sm:$0xff] }
 0x232   : > { %v3447_v40 = vadd.f32 %v6156_v50, %v3411_v4  ;;  %v4416_v58 = vpop.f32.mrf.mxu1  ;;  %v4464_v51 = vpop.f32.mrf.mxu0  ;;  %v2840_v49 = vadd.f32 %v6511_v26, %v2387_v52  ;;  %v6527_v26 = vld [vmem:[#allocation33_spill] sm:$0xff] }
 0x233   : > { %3508 = vst [vmem:[%s4998_s19 + $0x60] sm:$0xff] %v3476_v11  ;;  %v3445_v29 = vadd.f32 %v6156_v50, %v3409_v55  ;;  %v3414_v33 = vmul.f32 %v6153_v27, %v3377_v15  ;;  %v3375_v35 = vadd.f32 %v3296_v9, %v3105_v47  ;;  %v3108_v25 = vadd.f32 %v4416_v58, %v2838_v21  ;;  %v6513_v21 = vld [vmem:[#allocation51_spill] sm:$0xff]  ;;  %v6516_v15 = vld [vmem:[#allocation30_spill] sm:$0xff] }
 0x234   : > { %v3479_v39 = vmax.f32 %v3447_v40, 0.0  ;;  %v3029_v62 = vpop.f32.mrf.mxu1  ;;  %v3299_v7 = vpop.f32.mrf.mxu0  ;;  %v2392_v18 = vadd.f32 %v6513_v21, %v6512_v12  ;;  %v6517_v47 = vld [vmem:[#allocation55_spill] sm:$0xff]  ;;  %v6529_v21 = vld [vmem:[#allocation34_spill] sm:$0xff] }
 0x235   : > { %v3477_v43 = vmax.f32 %v3445_v29, 0.0  ;;  %v3450_v46 = vadd.f32 %v6156_v50, %v3414_v33  ;;  %v3412_v31 = vmul.f32 %v6153_v27, %v3375_v35  ;;  %v3378_v14 = vadd.f32 %v4464_v51, %v3108_v25  ;;  %v6518_v35 = vld [vmem:[#allocation52_spill] sm:$0xff] }
 0x236   : > { %3511 = vst [vmem:[%s4998_s19 + $0x78] sm:$0xff] %v3479_v39  ;;  %v3106_v13 = vadd.f32 %v3029_v62, %v2836_v10  ;;  %v4419_v23 = vpop.f32.mrf.mxu1  ;;  %v4467_v2 = vpop.f32.mrf.mxu0  ;;  %v2393_v20 = vadd.f32 %v6517_v47, %v6516_v15  ;;  %v2845_v25 = vadd.f32 %v6518_v35, %v2392_v18  ;;  %v2843_v10 = vadd.f32 %v6519_v54, %v2390_v17  ;;  %v6530_v18 = vld [vmem:[#allocation63_spill] sm:$0xff]  ;;  %v6534_v35 = vld [vmem:[#allocation64_spill] sm:$0xff] }
 0x237   : > { %3509 = vst [vmem:[%s4998_s19 + $0x68] sm:$0xff] %v3477_v43  ;;  %v3482_v3 = vmax.f32 %v3450_v46, 0.0  ;;  %v3448_v1 = vadd.f32 %v6156_v50, %v3412_v31  ;;  %v3415_v59 = vmul.f32 %v6153_v27, %v3378_v14  ;;  %v3111_v8 = vadd.f32 %v4419_v23, %v2841_v0  ;;  %v6521_v0 = vld [vmem:[#allocation57_spill] sm:$0xff]  ;;  %v6522_v31 = vld [vmem:[#allocation56_spill] sm:$0xff] }
 0x238   : > { %v3376_v53 = vadd.f32 %v3299_v7, %v3106_v13  ;;  %v3042_v16 = vpop.f32.mrf.mxu1  ;;  %v3312_v28 = vpop.f32.mrf.mxu0  ;;  %v2391_v6 = vadd.f32 %v6521_v0, %v6520_v19  ;;  %v2846_v14 = vadd.f32 %v6522_v31, %v2393_v20  ;;  %v2397_v44 = vadd.f32 %v6530_v18, %v6529_v21 }
 0x239   : > { %3514 = vst [vmem:[%s4998_s19 + $0x90] sm:$0xff] %v3482_v3  ;;  %v3480_v36 = vmax.f32 %v3448_v1, 0.0  ;;  %v3451_v61 = vadd.f32 %v6156_v50, %v3415_v59  ;;  %v3381_v37 = vadd.f32 %v4467_v2, %v3111_v8  ;;  %v3109_v32 = vadd.f32 %v3042_v16, %v2839_v60  ;;  %v6524_v60 = vld [vmem:[#allocation59_spill] sm:$0xff]  ;;  %v6525_v59 = vld [vmem:[#allocation58_spill] sm:$0xff] }
 0x23a   : > { %v3413_v41 = vmul.f32 %v6153_v27, %v3376_v53  ;;  %v4420_v42 = vpop.f32.mrf.mxu1  ;;  %v4468_v4 = vpop.f32.mrf.mxu0  ;;  %v2396_v56 = vadd.f32 %v6524_v60, %v6523_v24  ;;  %v2844_v8 = vadd.f32 %v6525_v59, %v2391_v6 }
 0x23b   : > { %3512 = vst [vmem:[%s4998_s19 + $0x80] sm:$0xff] %v3480_v36  ;;  %v3483_v30 = vmax.f32 %v3451_v61, 0.0  ;;  %v3418_v9 = vmul.f32 %v6153_v27, %v3381_v37  ;;  %v3379_v11 = vadd.f32 %v3312_v28, %v3109_v32  ;;  %v3112_v55 = vadd.f32 %v4420_v42, %v2842_v45  ;;  %v6526_v37 = vld [vmem:[#allocation60_spill] sm:$0xff] }
 0x23c   : > { %v3449_v38 = vadd.f32 %v6156_v50, %v3413_v41  ;;  %v3045_v63 = vpop.f32.mrf.mxu1  ;;  %v3315_v40 = vpop.f32.mrf.mxu0  ;;  %v2849_v32 = vadd.f32 %v6526_v37, %v2396_v56 }
 0x23d   : > { %3515 = vst [vmem:[%s4998_s19 + $0x98] sm:$0xff] %v3483_v30  ;;  %v3454_v58 = vadd.f32 %v6156_v50, %v3418_v9  ;;  %v3416_v51 = vmul.f32 %v6153_v27, %v3379_v11  ;;  %v3382_v29 = vadd.f32 %v4468_v4, %v3112_v55  ;;  %v3110_v33 = vadd.f32 %v3045_v63, %v2840_v49  ;;  %v6528_v49 = vld [vmem:[#allocation61_spill] sm:$0xff]  ;;  %v6531_v11 = vld [vmem:[#allocation35_spill] sm:$0xff] }
 0x23e   : > { %v3481_v48 = vmax.f32 %v3449_v38, 0.0  ;;  %v4423_v22 = vpop.f32.mrf.mxu1  ;;  %v4471_v39 = vpop.f32.mrf.mxu0  ;;  %v2394_v12 = vadd.f32 %v6528_v49, %v6527_v26  ;;  %v6532_v55 = vld [vmem:[#allocation65_spill] sm:$0xff] }
 0x23f   : > { %v3486_v62 = vmax.f32 %v3454_v58, 0.0  ;;  %v3452_v7 = vadd.f32 %v6156_v50, %v3416_v51  ;;  %v3419_v43 = vmul.f32 %v6153_v27, %v3382_v29  ;;  %v3380_v46 = vadd.f32 %v3315_v40, %v3110_v33  ;;  %v6533_v29 = vld [vmem:[#allocation62_spill] sm:$0xff] }
 0x240   : > { %3513 = vst [vmem:[%s4998_s19 + $0x88] sm:$0xff] %v3481_v48  ;;  %v3115_v34 = vadd.f32 %v4423_v22, %v2845_v25  ;;  %v3058_v52 = vpop.f32.mrf.mxu1  ;;  %v3328_v13 = vpop.f32.mrf.mxu0  ;;  %v2395_v15 = vadd.f32 %v6532_v55, %v6531_v11  ;;  %v2847_v33 = vadd.f32 %v6533_v29, %v2394_v12  ;;  %v2850_v25 = vadd.f32 %v6534_v35, %v2397_v44 }
 0x241   : > { %3518 = vst [vmem:[%s4998_s19 + $0xb0] sm:$0xff] %v3486_v62  ;;  %v3484_v23 = vmax.f32 %v3452_v7, 0.0  ;;  %v3455_v2 = vadd.f32 %v6156_v50, %v3419_v43  ;;  %v3417_v3 = vmul.f32 %v6153_v27, %v3380_v46  ;;  %v3113_v1 = vadd.f32 %v3058_v52, %v2843_v10 }
 0x242   : > { %v3385_v5 = vadd.f32 %v4471_v39, %v3115_v34  ;;  %v4424_v45 = vpop.f32.mrf.mxu1  ;;  %v4472_v53 = vpop.f32.mrf.mxu0  ;;  %v6535_v39 = vld [vmem:[#allocation66_spill] sm:$0xff] }
 0x243   : > { %3516 = vst [vmem:[%s4998_s19 + $0xa0] sm:$0xff] %v3484_v23  ;;  %v3487_v16 = vmax.f32 %v3455_v2, 0.0  ;;  %v3453_v28 = vadd.f32 %v6156_v50, %v3417_v3  ;;  %v3383_v36 = vadd.f32 %v3328_v13, %v3113_v1  ;;  %v3116_v61 = vadd.f32 %v4424_v45, %v2846_v14 }
 0x244   : > { %v3422_v57 = vmul.f32 %v6153_v27, %v3385_v5  ;;  %v3061_v17 = vpop.f32.mrf.mxu1  ;;  %v3331_v41 = vpop.f32.mrf.mxu0  ;;  %v2848_v62 = vadd.f32 %v6535_v39, %v2395_v15 }
 0x245   : > { %3519 = vst [vmem:[%s4998_s19 + $0xb8] sm:$0xff] %v3487_v16  ;;  %v3485_v42 = vmax.f32 %v3453_v28, 0.0  ;;  %v3420_v4 = vmul.f32 %v6153_v27, %v3383_v36  ;;  %v3386_v30 = vadd.f32 %v4472_v53, %v3116_v61  ;;  %v3114_v9 = vadd.f32 %v3061_v17, %v2844_v8 }
 0x246   : > { %v3458_v47 = vadd.f32 %v6156_v50, %v3422_v57  ;;  %v4427_v20 = vpop.f32.mrf.mxu1  ;;  %v4475_v38 = vpop.f32.mrf.mxu0 }
 0x247   : > { %3517 = vst [vmem:[%s4998_s19 + $0xa8] sm:$0xff] %v3485_v42  ;;  %v3456_v63 = vadd.f32 %v6156_v50, %v3420_v4  ;;  %v3423_v40 = vmul.f32 %v6153_v27, %v3386_v30  ;;  %v3384_v58 = vadd.f32 %v3331_v41, %v3114_v9  ;;  %v3119_v51 = vadd.f32 %v4427_v20, %v2849_v32 }
 0x248   : > { %v3490_v54 = vmax.f32 %v3458_v47, 0.0  ;;  %v3074_v10 = vpop.f32.mrf.mxu1  ;;  %v3344_v19 = vpop.f32.mrf.mxu0 }
 0x249   : > { %v3488_v0 = vmax.f32 %v3456_v63, 0.0  ;;  %v3459_v6 = vadd.f32 %v6156_v50, %v3423_v40  ;;  %v3421_v48 = vmul.f32 %v6153_v27, %v3384_v58  ;;  %v3389_v22 = vadd.f32 %v4475_v38, %v3119_v51 }
 0x24a   : > { %3522 = vst [vmem:[%s4998_s19 + $0xd0] sm:$0xff] %v3490_v54  ;;  %v3117_v7 = vadd.f32 %v3074_v10, %v2847_v33  ;;  %v4428_v43 = vpop.f32.mrf.mxu1  ;;  %v4476_v46 = vpop.f32.mrf.mxu0 }
 0x24b   : > { %3520 = vst [vmem:[%s4998_s19 + $0xc0] sm:$0xff] %v3488_v0  ;;  %v3491_v31 = vmax.f32 %v3459_v6, 0.0  ;;  %v3457_v14 = vadd.f32 %v6156_v50, %v3421_v48  ;;  %v3426_v24 = vmul.f32 %v6153_v27, %v3389_v22  ;;  %v3120_v60 = vadd.f32 %v4428_v43, %v2850_v25 }
 0x24c   : > { %v3387_v56 = vadd.f32 %v3344_v19, %v3117_v7  ;;  %v3077_v34 = vpop.f32.mrf.mxu1  ;;  %v3347_v1 = vpop.f32.mrf.mxu0 }
 0x24d   : > { %3523 = vst [vmem:[%s4998_s19 + $0xd8] sm:$0xff] %v3491_v31  ;;  %v3489_v52 = vmax.f32 %v3457_v14, 0.0  ;;  %v3462_v13 = vadd.f32 %v6156_v50, %v3426_v24  ;;  %v3390_v23 = vadd.f32 %v4476_v46, %v3120_v60  ;;  %v3118_v2 = vadd.f32 %v3077_v34, %v2848_v62 }
 0x24e   : > { %v3424_v3 = vmul.f32 %v6153_v27, %v3387_v56 }
 0x24f   : > { %3521 = vst [vmem:[%s4998_s19 + $0xc8] sm:$0xff] %v3489_v52  ;;  %v3494_v59 = vmax.f32 %v3462_v13, 0.0  ;;  %v3427_v8 = vmul.f32 %v6153_v27, %v3390_v23  ;;  %v3388_v5 = vadd.f32 %v3347_v1, %v3118_v2 }
 0x250   : > { %v3460_v45 = vadd.f32 %v6156_v50, %v3424_v3 }
 0x251   : > { %3526 = vst [vmem:[%s4998_s19 + $0xf0] sm:$0xff] %v3494_v59  ;;  %v3463_v53 = vadd.f32 %v6156_v50, %v3427_v8  ;;  %v3425_v16 = vmul.f32 %v6153_v27, %v3388_v5 }
 0x252   : > { %v3492_v28 = vmax.f32 %v3460_v45, 0.0 }
 0x253   : > { %v3495_v36 = vmax.f32 %v3463_v53, 0.0  ;;  %v3461_v61 = vadd.f32 %v6156_v50, %v3425_v16 }
 0x254   : > { %3524 = vst [vmem:[%s4998_s19 + $0xe0] sm:$0xff] %v3492_v28 }
 0x255   : > { %3527 = vst [vmem:[%s4998_s19 + $0xf8] sm:$0xff] %v3495_v36  ;;  %v3493_v37 = vmax.f32 %v3461_v61, 0.0 }
 0x257   : > { %3525 = vst [vmem:[%s4998_s19 + $0xe8] sm:$0xff] %v3493_v37 }
 0x258   : > { %4783 = shalt.err (!%p4780_p11)
}
 0x259   : > { %s4784_s21 = scalar_lea.hbm %s6342_s30, 4096  ;;  %s4788_s9 = scalar_lea.hbm %s6398_s3, 8192 }
 0x25a   : > { %p4785_p13 = scmp.ne.s32.totalorder %s6342_s30, %s4784_s21  ;;  %p4789_p7 = scmp.lt.s32.totalorder %s6342_s30, %s6398_s3 }
 0x25b   : > { %p4790_p9 = scmp.lt.s32.totalorder %s4788_s9, %s4784_s21 }
 0x25c   : > { %p4786_p0 = pnand %p4785_p13, %p6536_p2 }
 0x25d   : > { %p4791_p12 = por %p4790_p9, %p4789_p7 }
 0x25e   : > { %p4787_p6 = pneg %p4786_p0 }
 0x260   : > { %p4792_p1 = pnand %p4791_p12, %p4787_p6 }
 0x262   : > { %4795 = shalt.err (!%p4792_p1)
}
 0x263   : > { %s4864_s18 = smov 128   ;;  %s4865_s19 = smov 8  }
 0x264   : > { %4501 = dma.vmem_to_hbm [thread:$0]  (%p6536_p2), %s6344_s26, 4096, %s6342_s30, %s6350_s15, %s4864_s18, %s4864_s18, %s4865_s19  }
 0x265 PF: > { %p4518_p5 = scmp.ge.s32.totalorder %s4856_s17, 2  ;;  %s3561_s23 = sand.u32 1, %s4836_s12  }
 0x266   : > { %p6537_p3 = scmp.ne.s32.totalorder %s6410_s24, 0  ;;  %s3562_s28 = scalar_lea.sflag [#allocation7], %s3561_s23 }
 0x268   : > { %p4511_p4 = pnand %p4518_p5, %p6537_p3 }
 0x26a   : > { %p4512_p8 = pneg %p4511_p4 }
 0x26c   : > { %4831 = dma.done.wait (%p4512_p8), %s3562_s28, 4096  }
 0x26d   : > { %4833 = vsyncadd (%p4512_p8), %s3562_s28, 4294963200  ;;  %s18_s17 = sadd.s32 1, %s4856_s17   ;;  %s6538_s12 = smov %s4840_s13 }
 0x26e   : > { %p15_p10 = scmp.ge.s32.totalorder %s18_s17, 4   ;;  %s6539_s13 = smov %s4844_s14 }
 0x26f   : > { %s6540_s14 = smov %s4939_s25  ;;  %s6541_s15 = smov %s4852_s16 }
 0x270   : > { %s6542_s16 = smov %s6544_s20  ;;  %17 = sbr.rel (!%p15_p10) target bundleno = 6 (0x6), region = 102 }
 0x275   :  { %3567 = vsyncpa [#allocation6], 1 }
 0x276   :  { %3569 = vsyncpa [#allocation6 + $0x1], 1 }
 0x277   :  { %3570 = vsyncpa [#allocation9], 1 }
 0x278   :  { %3571 = vsyncpa [#allocation7], 1 }
 0x279   :  { %3573 = vsyncpa [#allocation7 + $0x1], 1 }
 0x27a   :  { %3574 = vsyncmov [#allocation3] }
 0x27d   :  { %s3575_s22 = vpop.sfrf %3574 }
 0x27e   :  { %p3825_p2 = scmp.ne.s32.totalorder %s3575_s22, 0 }
 0x280   :  { %3579 = shalt.err (%p3825_p2)  }
 0x281   :  { %3581 = vsyncmov [#allocation3 + $0x1] }
 0x284   :  { %s3582_s24 = vpop.sfrf %3581 }
 0x285   :  { %p3826_p11 = scmp.ne.s32.totalorder %s3582_s24, 0 }
 0x287   :  { %3586 = shalt.err (%p3826_p11)  }

</bundles_post_ra>
